<compile_context>
chip_gen: v7x
topology: tpu7x:2x2x1
jax: 0.10.0
libtpu: 0.0.40
codegen_flags: <defaults>
</compile_context>

<pallas_src>
import functools

import jax
import jax.numpy as jnp
from jax.experimental import pallas as pl
from jax.experimental.pallas import tpu as pltpu


@functools.lru_cache(maxsize=None)
def _vmem_limit_bytes():
    """Per-generation scoped-VMEM budget (~half of physical VMEM, capped at 64 MiB).

    Every kernel below needs < 8 MiB with the fixed tile sizes, so this only buys
    pipelining headroom while staying safe on v7x (64 MiB physical VMEM)."""
    cap = 128 * 1024 * 1024
    try:
        cap = int(pltpu.get_tpu_info().vmem_capacity_bytes)
    except Exception:
        pass
    return int(min(64 * 1024 * 1024, max(16 * 1024 * 1024, cap // 2)))


def _divisor_tile(dim, candidates):
    """Largest candidate that divides `dim`; otherwise the full dim (exact tiling)."""
    for c in candidates:
        if dim % c == 0:
            return c
    return dim


# ----------------------------- GEMM kernel (bias / GELU / LS+residual epilogue) --- #

def _gemm_kernel(a_ref, b_ref, bias_ref, *rest, activation, fuse_residual, multi_k):
    if fuse_residual:
        ls_ref, res_ref = rest[0], rest[1]
        rest = rest[2:]
    o_ref = rest[0]

    def epilogue(acc):
        out = acc + bias_ref[...].astype(jnp.float32)
        if activation == "gelu":
            # TODO(synk): HF Dinov2 uses exact erf-GELU; tanh-approx GELU is used here
            # for robust Mosaic lowering (numerically ~1e-3 close).
            out = jax.nn.gelu(out, approximate=True)
        if fuse_residual:
            out = res_ref[...].astype(jnp.float32) + out * ls_ref[...].astype(jnp.float32)
        o_ref[...] = out.astype(o_ref.dtype)

    if multi_k:
        acc_ref = rest[1]

        @pl.when(pl.program_id(2) == 0)
        def _():
            acc_ref[...] = jnp.zeros_like(acc_ref)

        acc_ref[...] += jnp.dot(a_ref[...], b_ref[...],
                                preferred_element_type=jnp.float32)

        @pl.when(pl.program_id(2) == pl.num_programs(2) - 1)
        def _():
            epilogue(acc_ref[...])
    else:
        epilogue(jnp.dot(a_ref[...], b_ref[...], preferred_element_type=jnp.float32))


def gemm(a, w, bias, *, activation="none", ls=None, res=None, out_dtype=jnp.bfloat16):
    """[M, K] @ [K, N] + bias[N], optional GELU, optional fused LayerScale+residual.

    bf16 in / bf16 out, fp32 accumulation.  Rows use a fixed 512 tile with a
    ceil-div grid (ragged M = B*257 still pipelines / megacore-splits); K <= 1024
    is a single block (no accumulator RMW), larger K uses an exactly-dividing tile.
    """
    M, K = a.shape
    K2, N = w.shape
    assert K == K2
    tm = M if M <= 512 else 512
    tn = _divisor_tile(N, (512, 256, 128))
    tk = K if K <= 1024 else _divisor_tile(K, (512, 256, 128))
    assert K % tk == 0, "K tiling must be exact (padded K would pollute accumulation)"
    gm, gn, gk = pl.cdiv(M, tm), pl.cdiv(N, tn), pl.cdiv(K, tk)
    multi_k = gk > 1
    fuse_residual = res is not None

    if multi_k:
        grid = (gm, gn, gk)
        a_map = lambda i, j, k: (i, k)
        w_map = lambda i, j, k: (k, j)
        n_map = lambda i, j, k: (0, j)
        o_map = lambda i, j, k: (i, j)
        semantics = ("parallel", "parallel", "arbitrary")
        scratch = [pltpu.VMEM((tm, tn), jnp.float32)]
    else:
        grid = (gm, gn)
        a_map = lambda i, j: (i, 0)
        w_map = lambda i, j: (0, j)
        n_map = lambda i, j: (0, j)
        o_map = lambda i, j: (i, j)
        semantics = ("parallel", "parallel")
        scratch = []

    in_specs = [
        pl.BlockSpec((tm, tk), a_map),
        pl.BlockSpec((tk, tn), w_map),
        pl.BlockSpec((1, tn), n_map),
    ]
    args = [a, w, bias.reshape(1, N)]
    if fuse_residual:
        in_specs += [pl.BlockSpec((1, tn), n_map), pl.BlockSpec((tm, tn), o_map)]
        args += [ls.reshape(1, N), res]

    return pl.pallas_call(
        functools.partial(_gemm_kernel, activation=activation,
                          fuse_residual=fuse_residual, multi_k=multi_k),
        out_shape=jax.ShapeDtypeStruct((M, N), out_dtype),
        grid=grid,
        in_specs=in_specs,
        out_specs=pl.BlockSpec((tm, tn), o_map),
        scratch_shapes=scratch,
        compiler_params=pltpu.CompilerParams(
            dimension_semantics=semantics,
            vmem_limit_bytes=_vmem_limit_bytes()),
    )(*args)


# ----------------------------- LayerNorm (row-tiled, ceil-div grid) --------------- #

def _layernorm_kernel(x_ref, g_ref, b_ref, o_ref, *, eps):
    x = x_ref[...].astype(jnp.float32)
    mu = jnp.mean(x, axis=-1, keepdims=True)
    xc = x - mu
    var = jnp.mean(xc * xc, axis=-1, keepdims=True)
    y = xc * jax.lax.rsqrt(var + eps) * g_ref[...].astype(jnp.float32) \
        + b_ref[...].astype(jnp.float32)
    o_ref[...] = y.astype(o_ref.dtype)


def layernorm(x, gamma, beta, eps=1e-6, out_dtype=jnp.bfloat16):
    M, D = x.shape
    tm = M if M <= 256 else 256
    return pl.pallas_call(
        functools.partial(_layernorm_kernel, eps=eps),
        out_shape=jax.ShapeDtypeStruct((M, D), out_dtype),
        grid=(pl.cdiv(M, tm),),
        in_specs=[
            pl.BlockSpec((tm, D), lambda i: (i, 0)),
            pl.BlockSpec((1, D), lambda i: (0, 0)),
            pl.BlockSpec((1, D), lambda i: (0, 0)),
        ],
        out_specs=pl.BlockSpec((tm, D), lambda i: (i, 0)),
        compiler_params=pltpu.CompilerParams(
            dimension_semantics=("parallel",),
            vmem_limit_bytes=_vmem_limit_bytes()),
    )(x, gamma.reshape(1, D), beta.reshape(1, D))


# ----------------------------- Multi-head attention ------------------------------- #

def _attention_kernel(*refs, heads_per_block, head_dim, scale, split):
    """One (batch, head-block) step: per-head softmax(q k^T) v with fp32 softmax.

    Heads are contiguous column groups (exactly the PyTorch reshape(B,S,H,Dh)
    layout), so each head is a static column slice.  Per-head ctx tiles are
    concatenated and stored once, lane-dense (no narrow masked stores)."""
    if split:
        q_ref, k_ref, v_ref, o_ref = refs
        q_base = k_base = v_base = 0
    else:
        qkv_ref, o_ref = refs
        q_ref = k_ref = v_ref = qkv_ref
        d_model = heads_per_block * head_dim
        q_base, k_base, v_base = 0, d_model, 2 * d_model

    # TODO(synk): at real resolution S=257 pads the score lane dim 257->384; a
    # flash-style KV tiling (online max/sum over 128-wide KV tiles) would remove that
    # ~33% lane waste and further shrink the live score footprint.
    ctxs = []
    for h in range(heads_per_block):
        q = q_ref[0, :, pl.ds(q_base + h * head_dim, head_dim)] * scale  # scale folded into q
        k = k_ref[0, :, pl.ds(k_base + h * head_dim, head_dim)]
        v = v_ref[0, :, pl.ds(v_base + h * head_dim, head_dim)]
        # TODO(synk): verify via pl.lower_as_mlir that this transposed-RHS dot_general
        # feeds the MXU without an extra per-head XLU transpose of k.
        s = jax.lax.dot_general(q, k, (((1,), (1,)), ((), ())),
                                preferred_element_type=jnp.float32)
        m = jnp.max(s, axis=-1, keepdims=True)
        p = jnp.exp(s - m)
        denom = jnp.sum(p, axis=-1, keepdims=True)
        p = p * pl.reciprocal(denom, approx=True)
        ctxs.append(jnp.dot(p.astype(v.dtype), v, preferred_element_type=jnp.float32))
    out = ctxs[0] if len(ctxs) == 1 else jnp.concatenate(ctxs, axis=-1)
    o_ref[0, :, :] = out.astype(o_ref.dtype)


def multihead_attention(qkv, num_heads, scale, hidden):
    """qkv: [B, S, 3*hidden], column order q | k | v (heads contiguous within each).

    Reads q/k/v straight out of the fused QKV activation via column-block index maps
    (no XLA slice copies).  At Dh=64 two heads (128 lanes) are processed per grid
    step; grid (B, n_head_blocks) feeds both TensorCores."""
    B, S, threeD = qkv.shape
    assert threeD == 3 * hidden
    head_dim = hidden // num_heads

    hb, c = None, 1
    while c <= num_heads:
        if num_heads % c == 0 and (c * head_dim) % 128 == 0:
            hb = c
            break
        c *= 2

    kern = functools.partial(_attention_kernel, head_dim=head_dim, scale=scale)

    if hb is not None:
        nhb = num_heads // hb
        width = hb * head_dim

        def spec(off):
            return pl.BlockSpec((1, S, width), lambda b, h: (b, 0, off + h))

        return pl.pallas_call(
            functools.partial(kern, heads_per_block=hb, split=True),
            out_shape=jax.ShapeDtypeStruct((B, S, hidden), qkv.dtype),
            grid=(B, nhb),
            in_specs=[spec(0), spec(nhb), spec(2 * nhb)],
            out_specs=pl.BlockSpec((1, S, width), lambda b, h: (b, 0, h)),
            compiler_params=pltpu.CompilerParams(
                dimension_semantics=("parallel", "parallel"),
                vmem_limit_bytes=_vmem_limit_bytes()),
        )(qkv, qkv, qkv)

    # Small-model fallback (hb*Dh cannot reach a 128-lane multiple): one batch element
    # per grid step, full qkv block, all heads sliced inside the kernel.
    return pl.pallas_call(
        functools.partial(kern, heads_per_block=num_heads, split=False),
        out_shape=jax.ShapeDtypeStruct((B, S, hidden), qkv.dtype),
        grid=(B,),
        in_specs=[pl.BlockSpec((1, S, 3 * hidden), lambda b: (b, 0, 0))],
        out_specs=pl.BlockSpec((1, S, hidden), lambda b: (b, 0, 0)),
        compiler_params=pltpu.CompilerParams(
            dimension_semantics=("parallel",),
            vmem_limit_bytes=_vmem_limit_bytes()),
    )(qkv)


# ----------------------------- parameter init (synthetic) ------------------------- #

def init_params(key, *, channels, patch, hidden, num_heads, num_layers, mlp_dim,
                num_patches, layerscale_value=1.0):
    # TODO(synk): real phikon-v2 loads pretrained HF safetensors; synthetic bf16
    # weights are used here.
    def nrm(k, shape, scale=0.02):
        return (scale * jax.random.normal(k, shape, dtype=jnp.float32)).astype(jnp.bfloat16)

    keys = jax.random.split(key, 4 + 8 * num_layers)
    it = iter(keys)
    params = {
        "patch": patch,
        "num_heads": num_heads,
        # conv weight [D, C, P, P] flattened to a [C*P*P, D] matmul weight
        "patch_w": nrm(next(it), (channels * patch * patch, hidden)),
        "patch_b": nrm(next(it), (hidden,)),
        "cls_token": nrm(next(it), (1, 1, hidden)),
        "pos_emb": nrm(next(it), (1, num_patches + 1, hidden)),
        "lnf_g": jnp.ones((hidden,), jnp.float32),
        "lnf_b": jnp.zeros((hidden,), jnp.float32),
        "layers": [],
    }
    for _ in range(num_layers):
        layer = {
            "ln1_g": jnp.ones((hidden,), jnp.float32),
            "ln1_b": jnp.zeros((hidden,), jnp.float32),
            # fused Q/K/V projection: [D, 3D] (column order = q | k | v)
            "wqkv": nrm(next(it), (hidden, 3 * hidden)),
            "bqkv": nrm(next(it), (3 * hidden,)),
            "wo": nrm(next(it), (hidden, hidden)), "bo": nrm(next(it), (hidden,)),
            "ls1": jnp.full((hidden,), layerscale_value, jnp.float32),
            "ln2_g": jnp.ones((hidden,), jnp.float32),
            "ln2_b": jnp.zeros((hidden,), jnp.float32),
            "w1": nrm(next(it), (hidden, mlp_dim)), "b1": nrm(next(it), (mlp_dim,)),
            "w2": nrm(next(it), (mlp_dim, hidden)), "b2": nrm(next(it), (hidden,)),
            "ls2": jnp.full((hidden,), layerscale_value, jnp.float32),
        }
        params["layers"].append(layer)
    return params


# ----------------------------- forward pass ---------------------------------------- #

def phikon_v2_forward(params, x):
    """x: NCHW float32 [B, C, H, W]. Returns CLS embedding [B, hidden] (float32)."""
    B, C, H, W = x.shape
    P = params["patch"]
    Hp, Wp = H // P, W // P
    Np = Hp * Wp

    # --- patch embedding (conv with kernel=stride=P) as unfold + MXU matmul ---
    patches = x.reshape(B, C, Hp, P, Wp, P)
    patches = patches.transpose(0, 2, 4, 1, 3, 5).reshape(B * Np, C * P * P)
    patches = patches.astype(jnp.bfloat16)
    tok = gemm(patches, params["patch_w"], params["patch_b"])  # [B*Np, D] bf16
    D = tok.shape[-1]
    tok = tok.reshape(B, Np, D)

    # --- prepend CLS, add position embeddings ---
    # TODO(synk): Dinov2 interpolates position embeddings for off-config image sizes;
    # here pos_emb is built for this exact grid so no interpolation is needed.
    cls = jnp.broadcast_to(params["cls_token"], (B, 1, D))
    hs = jnp.concatenate([cls, tok], axis=1) + params["pos_emb"]  # [B, S, D] bf16
    S = Np + 1
    hs = hs.reshape(B * S, D).astype(jnp.bfloat16)

    num_heads = params["num_heads"]
    Dh = D // num_heads
    scale = Dh ** -0.5

    for layer in params["layers"]:
        # --- self-attention block ---
        res = hs
        xn = layernorm(hs, layer["ln1_g"], layer["ln1_b"])
        qkv = gemm(xn, layer["wqkv"], layer["bqkv"]).reshape(B, S, 3 * D)
        ctx = multihead_attention(qkv, num_heads, scale, D)        # [B, S, D]
        # O-projection with fused LayerScale + residual epilogue
        hs = gemm(ctx.reshape(B * S, D), layer["wo"], layer["bo"],
                  ls=layer["ls1"], res=res)

        # --- MLP block ---
        res = hs
        xn = layernorm(hs, layer["ln2_g"], layer["ln2_b"])
        h1 = gemm(xn, layer["w1"], layer["b1"], activation="gelu")
        # MLP-down with fused LayerScale + residual epilogue
        hs = gemm(h1, layer["w2"], layer["b2"], ls=layer["ls2"], res=res)

    # --- final LayerNorm (Dinov2Model.layernorm) then take CLS token ---
    hs = layernorm(hs, params["lnf_g"], params["lnf_b"], out_dtype=jnp.float32)
    hs = hs.reshape(B, S, D)
    return hs[:, 0, :]  # == last_hidden_state[:, 0, :]


# ----------------------------- demo + kernel self-checks --------------------------- #

if __name__ == "__main__":
    key = jax.random.PRNGKey(0)
    k1, k2, k3, k4, k5, k6, kp, kx = jax.random.split(key, 8)
    HI = jax.lax.Precision.HIGHEST

    # (1) GEMM self-check: ragged M (ceil-div grid, partial edge tile), multi-K
    #     accumulation path and fused LayerScale+residual epilogue.
    Mg, Kg, Ng = 514, 1536, 256
    a = jax.random.normal(k1, (Mg, Kg), jnp.float32).astype(jnp.bfloat16)
    w = (0.02 * jax.random.normal(k2, (Kg, Ng), jnp.float32)).astype(jnp.bfloat16)
    bvec = (0.02 * jax.random.normal(k3, (Ng,), jnp.float32)).astype(jnp.bfloat16)
    lsv = jnp.full((Ng,), 0.5, jnp.float32)
    resv = jax.random.normal(k4, (Mg, Ng), jnp.float32).astype(jnp.bfloat16)
    got = gemm(a, w, bvec, ls=lsv, res=resv).astype(jnp.float32)
    ref = resv.astype(jnp.float32) + 0.5 * (
        jnp.dot(a.astype(jnp.float32), w.astype(jnp.float32), precision=HI)
        + bvec.astype(jnp.float32))
    assert jnp.allclose(got, ref, atol=3e-2, rtol=3e-2), "gemm self-check failed"

    # (2) LayerNorm self-check on a ragged row count.
    xl = jax.random.normal(k6, (514, 256), jnp.float32).astype(jnp.bfloat16)
    ln_got = layernorm(xl, jnp.full((256,), 1.3, jnp.float32),
                       jnp.full((256,), 0.1, jnp.float32), out_dtype=jnp.float32)
    xf = xl.astype(jnp.float32)
    mu = xf.mean(-1, keepdims=True)
    var = ((xf - mu) ** 2).mean(-1, keepdims=True)
    ln_ref = (xf - mu) * jax.lax.rsqrt(var + 1e-6) * 1.3 + 0.1
    assert jnp.allclose(ln_got, ln_ref, atol=2e-2, rtol=2e-2), "layernorm self-check failed"

    # (3) Attention self-check exercising the 128-lane head-block (split) path.
    Bq, Sq, Dq, Hq = 2, 32, 256, 4
    dh = Dq // Hq
    qkv = jax.random.normal(k5, (Bq, Sq, 3 * Dq), jnp.float32).astype(jnp.bfloat16)
    att = multihead_attention(qkv, Hq, dh ** -0.5, Dq).astype(jnp.float32)
    qkv_f = qkv.astype(jnp.float32)
    q_, kk_, v_ = qkv_f[..., :Dq], qkv_f[..., Dq:2 * Dq], qkv_f[..., 2 * Dq:]
    to_h = lambda t: t.reshape(Bq, Sq, Hq, dh).transpose(0, 2, 1, 3)
    s_ref = jnp.einsum("bhqd,bhkd->bhqk", to_h(q_), to_h(kk_), precision=HI) * (dh ** -0.5)
    p_ref = jax.nn.softmax(s_ref, axis=-1)
    ctx_ref = jnp.einsum("bhqk,bhkd->bhqd", p_ref, to_h(v_), precision=HI)
    ctx_ref = ctx_ref.transpose(0, 2, 1, 3).reshape(Bq, Sq, Dq)
    assert jnp.allclose(att, ctx_ref, atol=5e-2, rtol=5e-2), "attention self-check failed"

    # (4) End-to-end forward at small, ViT-consistent shapes
    #     (real phikon-v2 is ViT-L/14 @ 224: D=1024, 16 heads, 24 layers, S=257).
    B, C, H, W = 2, 3, 16, 16
    PATCH = 8
    HIDDEN = 32
    HEADS = 4
    LAYERS = 2
    MLP = 4 * HIDDEN
    NUM_PATCHES = (H // PATCH) * (W // PATCH)

    params = init_params(
        kp, channels=C, patch=PATCH, hidden=HIDDEN, num_heads=HEADS,
        num_layers=LAYERS, mlp_dim=MLP, num_patches=NUM_PATCHES)

    # NCHW input, as the PyTorch module would receive after its eval transforms.
    # TODO(synk): the torchvision Resize/CenterCrop/Normalize preprocessing pipeline is
    # outside the model forward and is not reproduced here.
    x = jax.random.normal(kx, (B, C, H, W), dtype=jnp.float32)

    fwd = jax.jit(functools.partial(phikon_v2_forward, params))
    out = fwd(x)
    jax.block_until_ready(out)
    assert out.shape == (B, HIDDEN) and out.dtype == jnp.float32
    print("KERNEL_OK")
</pallas_src>

<mosaic_0001>
module attributes {stable_mosaic.version = 11 : i64} {
  func.func @_gemm_kernel(%arg0: i32, %arg1: i32, %arg2: i32, %arg3: memref<512x512xbf16, #tpu.memory_space<vmem>>, %arg4: memref<512x256xbf16, #tpu.memory_space<vmem>>, %arg5: memref<1x256xbf16, #tpu.memory_space<vmem>>, %arg6: memref<1x256xf32, #tpu.memory_space<vmem>>, %arg7: memref<512x256xbf16, #tpu.memory_space<vmem>>, %arg8: memref<512x256xbf16, #tpu.memory_space<vmem>>, %arg9: memref<512x256xf32, #tpu.memory_space<vmem>>) attributes {dimension_semantics = [#tpu.dimension_semantics<parallel>, #tpu.dimension_semantics<parallel>, #tpu.dimension_semantics<arbitrary>], iteration_bounds = array<i64: 2, 1, 3>, scalar_prefetch = 0 : i64, scratch_operands = 1 : i64, tpu.core_type = #tpu.core_type<tc>, window_params = [{transform_indices = @transform_0, window_bounds = array<i64: 512, 512>}, {transform_indices = @transform_1, window_bounds = array<i64: 512, 256>}, {transform_indices = @transform_2, window_bounds = array<i64: 1, 256>}, {transform_indices = @transform_3, window_bounds = array<i64: 1, 256>}, {transform_indices = @transform_4, window_bounds = array<i64: 512, 256>}, {transform_indices = @transform_5, window_bounds = array<i64: 512, 256>}]} {
    %c0_i32 = arith.constant 0 : i32
    %0 = arith.cmpi eq, %arg2, %c0_i32 : i32
    %1 = arith.extui %0 : i1 to i32
    %c0_i32_0 = arith.constant 0 : i32
    %2 = arith.cmpi ne, %1, %c0_i32_0 : i32
    scf.if %2 {
      %cst_9 = arith.constant 0.000000e+00 : f32
      %12 = vector.broadcast %cst_9 : f32 to vector<512x256xf32>
      %c0_10 = arith.constant 0 : index
      %c0_11 = arith.constant 0 : index
      %13 = vector.load %arg9[%c0_10, %c0_11] : memref<512x256xf32, #tpu.memory_space<vmem>>, vector<512x256xf32>
      tpu.vector_store %arg9[%c0_10, %c0_11], %12 {strides = array<i32>} : memref<512x256xf32, #tpu.memory_space<vmem>>, vector<512x256xf32>,
    } else {
    }
    %c0 = arith.constant 0 : index
    %c0_1 = arith.constant 0 : index
    %3 = vector.load %arg9[%c0, %c0_1] : memref<512x256xf32, #tpu.memory_space<vmem>>, vector<512x256xf32>
    %c0_2 = arith.constant 0 : index
    %c0_3 = arith.constant 0 : index
    %4 = vector.load %arg3[%c0_2, %c0_3] : memref<512x512xbf16, #tpu.memory_space<vmem>>, vector<512x512xbf16>
    %c0_4 = arith.constant 0 : index
    %c0_5 = arith.constant 0 : index
    %5 = vector.load %arg4[%c0_4, %c0_5] : memref<512x256xbf16, #tpu.memory_space<vmem>>, vector<512x256xbf16>
    %cst = arith.constant dense<0.000000e+00> : vector<512x256xf32>
    %6 = tpu.matmul %4, %5, %cst {dimension_numbers = #tpu.dot_dimension_numbers<[1], [0], [0], [1], [0, 0, 1, 1], [], []>} : vector<512x512xbf16>, vector<512x256xbf16>, vector<512x256xf32> -> vector<512x256xf32>
    %7 = arith.addf %3, %6 : vector<512x256xf32>
    %c0_6 = arith.constant 0 : index
    %c0_7 = arith.constant 0 : index
    %8 = vector.load %arg9[%c0_6, %c0_7] : memref<512x256xf32, #tpu.memory_space<vmem>>, vector<512x256xf32>
    tpu.vector_store %arg9[%c0_6, %c0_7], %7 {strides = array<i32>} : memref<512x256xf32, #tpu.memory_space<vmem>>, vector<512x256xf32>,
    %c2_i32 = arith.constant 2 : i32
    %9 = arith.cmpi eq, %arg2, %c2_i32 : i32
    %10 = arith.extui %9 : i1 to i32
    %c0_i32_8 = arith.constant 0 : i32
    %11 = arith.cmpi ne, %10, %c0_i32_8 : i32
    scf.if %11 {
      %c0_9 = arith.constant 0 : index
      %c0_10 = arith.constant 0 : index
      %12 = vector.load %arg9[%c0_9, %c0_10] : memref<512x256xf32, #tpu.memory_space<vmem>>, vector<512x256xf32>
      %c0_11 = arith.constant 0 : index
      %c0_12 = arith.constant 0 : index
      %13 = vector.load %arg5[%c0_11, %c0_12] : memref<1x256xbf16, #tpu.memory_space<vmem>>, vector<1x256xbf16>
      %14 = arith.extf %13 : vector<1x256xbf16> to vector<1x256xf32>
      %15 = vector.broadcast %14 : vector<1x256xf32> to vector<512x256xf32>
      %16 = arith.addf %12, %15 : vector<512x256xf32>
      %c0_13 = arith.constant 0 : index
      %c0_14 = arith.constant 0 : index
      %17 = vector.load %arg7[%c0_13, %c0_14] : memref<512x256xbf16, #tpu.memory_space<vmem>>, vector<512x256xbf16>
      %18 = arith.extf %17 : vector<512x256xbf16> to vector<512x256xf32>
      %c0_15 = arith.constant 0 : index
      %c0_16 = arith.constant 0 : index
      %19 = vector.load %arg6[%c0_15, %c0_16] : memref<1x256xf32, #tpu.memory_space<vmem>>, vector<1x256xf32>
      %20 = vector.broadcast %19 : vector<1x256xf32> to vector<512x256xf32>
      %21 = arith.mulf %16, %20 : vector<512x256xf32>
      %22 = arith.addf %18, %21 : vector<512x256xf32>
      %23 = arith.truncf %22 : vector<512x256xf32> to vector<512x256xbf16>
      %c0_17 = arith.constant 0 : index
      %c0_18 = arith.constant 0 : index
      %24 = vector.load %arg8[%c0_17, %c0_18] : memref<512x256xbf16, #tpu.memory_space<vmem>>, vector<512x256xbf16>
      tpu.vector_store %arg8[%c0_17, %c0_18], %23 {strides = array<i32>} : memref<512x256xbf16, #tpu.memory_space<vmem>>, vector<512x256xbf16>,
    } else {
    }
    return
  }
  func.func @transform_0(%arg0: i32, %arg1: i32, %arg2: i32) -> (i32, i32) {
    %c0_i32 = arith.constant 0 : i32
    return %arg0, %arg2 : i32, i32
  }
  func.func @transform_1(%arg0: i32, %arg1: i32, %arg2: i32) -> (i32, i32) {
    %c0_i32 = arith.constant 0 : i32
    return %arg2, %arg1 : i32, i32
  }
  func.func @transform_2(%arg0: i32, %arg1: i32, %arg2: i32) -> (i32, i32) {
    %c0_i32 = arith.constant 0 : i32
    %c0_i32_0 = arith.constant 0 : i32
    return %c0_i32, %arg1 : i32, i32
  }
  func.func @transform_3(%arg0: i32, %arg1: i32, %arg2: i32) -> (i32, i32) {
    %c0_i32 = arith.constant 0 : i32
    %c0_i32_0 = arith.constant 0 : i32
    return %c0_i32, %arg1 : i32, i32
  }
  func.func @transform_4(%arg0: i32, %arg1: i32, %arg2: i32) -> (i32, i32) {
    %c0_i32 = arith.constant 0 : i32
    return %arg0, %arg1 : i32, i32
  }
  func.func @transform_5(%arg0: i32, %arg1: i32, %arg2: i32) -> (i32, i32) {
    %c0_i32 = arith.constant 0 : i32
    return %arg0, %arg1 : i32, i32
  }
}

</mosaic_0001>

<bundles_post_ra>
// kernel: tpu_custom_call.1
= control target key start
LH: loop header
LB: loop body
LE: loop exit
PB: predicated region body
PF: predicated region fallthrough
CT: control target
= control target key end

     0   :  { %s6725_s0 = inlined_call_operand.hbm [shape: bf16[514,1536], index: 0, kind: input, shape index: {}]   ;;  %s6726_s1 = inlined_call_operand.hbm [shape: bf16[1536,256], index: 1, kind: input, shape index: {}]   ;;  %s6727_s2 = inlined_call_operand.hbm [shape: bf16[1,256], index: 2, kind: input, shape index: {}]   ;;  %s6728_s3 = inlined_call_operand.hbm [shape: f32[1,256], index: 3, kind: input, shape index: {}]   ;;  %s6729_s4 = inlined_call_operand.hbm [shape: bf16[514,256], index: 4, kind: input, shape index: {}]   ;;  %s6730_s5 = inlined_call_operand.hbm [shape: bf16[514,256], index: 5, kind: output, shape index: {}]  }
   0x1   :  { %6750 = sst [smem:[#allocation32_spill]] %s6727_s2 }
   0x2   :  { %6751 = sst [smem:[#allocation33_spill]] %s6730_s5 }
   0x3   :  { %10 = vsyncpa [#allocation4], 0 }
   0x4   :  { %12 = vsyncpa [#allocation4 + $0x1], 0 }
   0x5   :  { %13 = vsyncpa [#allocation7], 0 }
   0x6   :  { %15 = vsyncpa [#allocation7 + $0x1], 0 }
   0x7   :  { %16 = vsyncpa [#allocation10], 0 }
   0x8   :  { %17 = vsyncpa [#allocation5], 0 }
   0x9   :  { %19 = vsyncpa [#allocation5 + $0x1], 0  ;;  %s5486_s18 = smov 0   ;;  %s5488_s19 = smov 0  }
   0xa   :  { %s5490_s20 = smov 0   ;;  %s5492_s21 = smov 0  }
   0xb   :  { %s5494_s22 = smov 0   ;;  %s5496_s23 = smov 0  }
   0xc   :  { %s5498_s24 = smov 0   ;;  %s5500_s25 = smov 0  }
   0xd   :  { %s5502_s26 = smov 0   ;;  %s5504_s27 = smov 0  }
   0xe   :  { %s5506_s28 = smov 0   ;;  %s5508_s29 = smov 0  }
   0xf   :  { %s5510_s30 = smov 0   ;;  %s5512_s6 = smov 0  }
  0x10 LB: > { %6752 = sst [smem:[#allocation19_spill]] %s5386_s18  ;;  %s5555_s7 = sadd.s32 4294967295, %s5438_s6   ;;  %s5438_s6 = sphi %s5512_s6, %s25_s6   ;;  %s5434_s30 = sphi %s5510_s30, %s6820_s30   ;;  %s5430_s29 = sphi %s5508_s29, %s6819_s29   ;;  %s5426_s28 = sphi %s5506_s28, %s6818_s28   ;;  %s5422_s27 = sphi %s5504_s27, %s6817_s27   ;;  %s5418_s26 = sphi %s5502_s26, %s6816_s26   ;;  %s5414_s25 = sphi %s5500_s25, %s6815_s25   ;;  %s5410_s24 = sphi %s5498_s24, %s6814_s24   ;;  %s5406_s23 = sphi %s5496_s23, %s6813_s23   ;;  %s5402_s22 = sphi %s5494_s22, %s6812_s22   ;;  %s5398_s21 = sphi %s5492_s21, %s6811_s21   ;;  %s5394_s20 = sphi %s5490_s20, %s6810_s20   ;;  %s5390_s19 = sphi %s5488_s19, %s6809_s19   ;;  %s5386_s18 = sphi %s5486_s18, %s6803_s18  }
  0x11   : > { %6753 = sst [smem:[#allocation20_spill]] %s5390_s19  ;;  %s37_s9 = sadd.s32 1, %s5430_s29 }
  0x12   : > { %6754 = sst [smem:[#allocation21_spill]] %s5422_s27  ;;  %s44_s10 = sadd.s32 1, %s5434_s30 }
  0x13   : > { %6755 = sst [smem:[#allocation22_spill]] %s5426_s28  ;;  %p38_p0 = scmp.ge.s32.totalorder %s37_s9, 3 }
  0x14   : > { %s53_s11 = sadd.s32 1, %s5418_s26  ;;  %p60_p1 = scmp.ne.s32.totalorder %s5418_s26, %s5414_s25 }
  0x15   : > { %p61_p2 = scmp.eq.s32.totalorder %s5438_s6, 0  ;;  %s6822_s9 = smov (%p38_p0, %s37_s9), 0 }
  0x16   : > { %6756 = sst [smem:[#allocation23_spill]] %s6822_s9  ;;  %s6824_s10 = smov (!%p38_p0, %s44_s10), %s5434_s30 }
  0x17   : > { %s49_s12 = ssub.s32 %s5430_s29, %s6822_s9  ;;  %p5571_p3 = por %p61_p2, %p60_p1 }
  0x18   : > { %p46_p4 = scmp.ge.s32.totalorder %s6824_s10, 2  ;;  %p66_p5 = scmp.ne.s32.totalorder %s5414_s25, %s5410_s24 }
  0x19   : > { %s6757_s13 = scalar_select %p5571_p3, 1, 0 }
  0x1a   : > { %p6735_p6 = scmp.eq.s32.totalorder %s5555_s7, 0  ;;  %p79_p7 = scmp.eq.s32.totalorder %s49_s12, 0 }
  0x1b   : > { %s6826_s10 = smov (%p46_p4, %s6824_s10), 0  ;;  %s81_s15 = sadd.s32 1, %s5406_s23 }
  0x1c   : > { %6758 = sst [smem:[#allocation24_spill]] %s6826_s10  ;;  %p5581_p8 = por %p6735_p6, %p66_p5 }
  0x1d   : > { %s48_s16 = ssub.s32 %s5434_s30, %s6826_s10  ;;  %p88_p9 = scmp.ne.s32.totalorder %s5406_s23, %s5402_s22 }
  0x1e   : > { %s6759_s14 = scalar_select %p5581_p8, 1, 0 }
  0x1f   : > { %s50_s17 = sor.u32 %s49_s12, %s48_s16  ;;  %p94_p10 = scmp.ne.s32.totalorder %s5402_s22, %s5398_s21 }
  0x20   : > { %p51_p11 = scmp.eq.s32.totalorder %s50_s17, 0  ;;  %p5594_p12 = por %p88_p9, %p61_p2 }
  0x21   : > { %s5599_s8 = scalar_select %p79_p7, %s5406_s23, %s81_s15  }
  0x22   : > { %s6760_s24 = scalar_select %p5594_p12, 1, 0 }
  0x23   : > { %6761 = sst [smem:[#allocation25_spill]] %s5599_s8  ;;  %p5606_p13 = por %p94_p10, %p6735_p6 }
  0x24   : > { %s5602_s9 = scalar_select %p51_p11, %s5418_s26, %s53_s11  }
  0x25   : > { %s6763_s10 = scalar_select %p5606_p13, 1, 0 }
  0x26   : > { %6762 = sst [smem:[#allocation26_spill]] %s5602_s9  ;;  %p159_p0 = scmp.eq.s32.totalorder %s48_s16, 0 }
  0x27   : > { %6764 = sst [smem:[#allocation27_spill]] %s6763_s10  ;;  %s161_s12 = sadd.s32 1, %s5394_s20 }
  0x28   : > { %p168_p1 = scmp.ne.s32.totalorder %s5394_s20, %s5390_s19  ;;  %p174_p5 = scmp.ne.s32.totalorder %s5390_s19, %s5386_s18 }
  0x29   : > { %s5614_s21 = scalar_select %p159_p0, %s5394_s20, %s161_s12  }
  0x2a   : > { %p5618_p4 = por %p168_p1, %p61_p2  ;;  %p200_p7 = scmp.eq.s32.totalorder %s5555_s7, 5 }
  0x2b   : > { %6765 = sst [smem:[#allocation28_spill]] %s5614_s21  ;;  %s6767_s11 = sadd.s32 4294967294, %s5438_s6  }
  0x2c   : > { %s6766_s17 = scalar_select %p5618_p4, 1, 0 }
  0x2d   : > { %p206_p9 = scmp.eq.s32.totalorder %s6767_s11, 5  ;;  %p5629_p10 = por %p174_p5, %p6735_p6 }
  0x2e   : > { %p4190_p11 = scmp.ge.s32.totalorder %s5438_s6, 1  ;;  %p5634_p13 = por %p200_p7, %p168_p1 }
  0x2f   : > { %s6768_s15 = scalar_select %p5629_p10, 1, 0 }
  0x30   : > { %s6770_s16 = scalar_select %p5634_p13, 1, 0 }
  0x31   : > { %6769 = sst [smem:[#allocation29_spill]] %s6768_s15  ;;  %p5638_p0 = por %p206_p9, %p174_p5 }
  0x32   : > { %6771 = sst [smem:[#allocation30_spill]] %s6770_s16  ;;  %p213_p2 = scmp.lt.s32.totalorder %s5438_s6, 7 }
  0x33   : > { %s6772_s12 = scalar_select %p5638_p0, 1, 0 }
  0x34   : > { %p5643_p8 = pnand %p4190_p11, %p213_p2  ;;  %s5440_s11 = smov [#allocation8]  }
  0x35   : > { %6773 = sst [smem:[#allocation31_spill]] %s6772_s12  ;;  %s229_s8 = sshll.u32 %s5440_s11, 4  ;;  %s230_s8 = int_to_ptr.vmem [resolvable:$true] %s229_s8 }
  0x36   : > { %s6774_s9 = scalar_select %p5643_p8, 1, 0 }
  0x37   : > { %p4708_p6 = pneg %p5643_p8  ;;  %s5441_s21 = smov [#allocation9]  }
  0x38   : > { %s243_s18 = sshll.u32 %s5441_s21, 4  ;;  %p6775_p1 = scmp.eq.s32.totalorder %s5555_s7, 0  ;;  %s5655_s18 = int_to_ptr.vmem [resolvable:$true] %s243_s18 }
  0x39   : > { %s6777_s2 = sld [smem:[#allocation32_spill]] }
  0x3a   : > { %p5651_p7 = pnand %p4708_p6, %p6775_p1 }
  0x3c   : > { %p5138_p9 = pneg %p5651_p7 }
  0x3f   : > { %s5136_s16 = scalar_lea.hbm %s6777_s2, 32 }
  0x40   : > { %p5137_p5 = scmp.ne.s32.totalorder %s6777_s2, %s5136_s16  ;;  %p5143_p2 = scmp.lt.u32.totalorder %s5136_s16, %s6777_s2 }
  0x42   : > { %p5139_p6 = pnand %p5138_p9, %p5137_p5 }
  0x44   : > { %p5140_p11 = pneg %p5139_p6 }
  0x46   : > { %p5145_p1 = pnand %p5143_p2, %p5140_p11 }
  0x48   : > { %5148 = shalt.err (!%p5145_p1)
}
  0x49   : > { %s5149_s19 = scalar_lea.vmem %s230_s8, 32  ;;  %p5157_p8 = scmp.lt.s32.totalorder %s230_s8, %s230_s8 }
  0x4a   : > { %p5150_p0 = scmp.ne.s32.totalorder %s230_s8, %s5149_s19  ;;  %p5158_p4 = scmp.lt.s32.totalorder %s5149_s19, %s5149_s19 }
  0x4c   : > { %p5152_p13 = pnand %p5150_p0, %p5138_p9  ;;  %p5159_p12 = por %p5158_p4, %p5157_p8 }
  0x4e   : > { %p5153_p10 = pneg %p5152_p13 }
  0x50   : > { %p5160_p3 = pnand %p5159_p12, %p5153_p10 }
  0x52   : > { %5163 = shalt.err (!%p5160_p3)
}
  0x53   : > { %4711 = dma.hbm_to_vmem [thread:$0]  (!%p5651_p7), %s6777_s2, 32, %s230_s8, [#allocation7]  }
  0x54   : > { %s5164_s12 = scalar_lea.hbm %s6728_s3, 32 }
  0x55   : > { %p5165_p13 = scmp.ne.s32.totalorder %s6728_s3, %s5164_s12  ;;  %p5171_p3 = scmp.lt.u32.totalorder %s5164_s12, %s6728_s3 }
  0x57   : > { %p5167_p8 = pnand %p5165_p13, %p5138_p9 }
  0x59   : > { %p5168_p12 = pneg %p5167_p8 }
  0x5b   : > { %p5173_p4 = pnand %p5171_p3, %p5168_p12 }
  0x5d   : > { %5176 = shalt.err (!%p5173_p4)
}
  0x5e   : > { %s5177_s8 = scalar_lea.vmem %s5655_s18, 32  ;;  %p5185_p6 = scmp.lt.s32.totalorder %s5655_s18, %s5655_s18 }
  0x5f   : > { %p5178_p10 = scmp.ne.s32.totalorder %s5655_s18, %s5177_s8  ;;  %p5186_p11 = scmp.lt.s32.totalorder %s5177_s8, %s5177_s8 }
  0x61   : > { %p5180_p0 = pnand %p5178_p10, %p5138_p9  ;;  %p5187_p2 = por %p5186_p11, %p5185_p6 }
  0x63   : > { %p5181_p5 = pneg %p5180_p0 }
  0x65   : > { %p5188_p1 = pnand %p5187_p2, %p5181_p5 }
  0x67   : > { %5191 = shalt.err (!%p5188_p1)
}
  0x68   : > { %4714 = dma.hbm_to_vmem [thread:$0]  (!%p5651_p7), %s6728_s3, 32, %s5655_s18, [#allocation10]  }
  0x69   : > { %p4193_p13 = scmp.ge.s32.totalorder %s5438_s6, 6 }
  0x6a   : > { %p6778_p8 = scmp.ne.s32.totalorder (!%p4193_p13), %s6757_s13, 0 }
  0x6b   : > { %250 = sbr.rel (%p4193_p13) target bundleno = 216 (0xd8), region = 24 }
  0x72   : > { %253 = sbr.rel (!%p6778_p8) target bundleno = 152 (0x98), region = 28  ;;  %s254_s28 = sand.u32 (%p6778_p8), 1, %s5438_s6  }
  0x73   : > { %s256_s15 = sand.u32 (%p6778_p8), 1, %s5418_s26   ;;  %s4195_s12 = sshll.u32 (%p6778_p8), %s5434_s30, 6 }
  0x74   : > { %s4194_s16 = sshll.u32 (%p6778_p8), %s256_s15, 10  ;;  %s4196_s5 = sshll.u32 (%p6778_p8), %s5430_s29, 2 }
  0x75   : > { %s261_s11 = ssub.s32 (%p6778_p8), 65, %s4195_s12  ;;  %s5714_s19 = scalar_lea.sflag (%p6778_p8), [#allocation4], %s254_s28 }
  0x76   : > { %p262_p9 = scmp.lt.s32.totalorder (%p6778_p8), %s261_s11, 64  ;;  %s258_s13 = scalar_lea.vmem (%p6778_p8), [#allocation3], %s4194_s16 }
  0x79   : > { %s6828_s11 = smov (!%p262_p9, %s261_s11), 64 }
  0x7a   : > { %s5711_s21 = sshll.u32 %s6828_s11, 8 }
  0x7b   : > { %s267_s18 = ssub.s32 16384, %s5711_s21 }
  0x7c   : > { %268 = vsyncadd %s5714_s19, %s267_s18  ;;  %p4199_p7 = scmp.ne.s32.totalorder %s5711_s21, 0  ;;  %s4694_s8 = smul.u32 768, %s5434_s30 }
  0x7d   : > { %s275_s10 = sshll.u32 %s258_s13, 4  ;;  %s5719_s10 = int_to_ptr.vmem [resolvable:$true] %s275_s10 }
  0x7e   : > { %s271_s27 = sadd.s32 %s4694_s8, %s4196_s5  ;;  %s5196_s5 = scalar_lea.hbm %s6725_s0, 49920 }
  0x7f   : > { %s4201_s15 = sshll.u32 %s271_s27, 6 }
  0x80   : > { %s5724_s2 = scalar_lea.hbm %s6725_s0, %s4201_s15 }
  0x81   : > { %s5192_s28 = scalar_lea.hbm %s5724_s2, %s5711_s21  ;;  %p5197_p10 = scmp.lt.u32.totalorder %s5724_s2, %s6725_s0 }
  0x82   : > { %p5193_p12 = scmp.ne.s32.totalorder %s5724_s2, %s5192_s28  ;;  %p5198_p0 = scmp.lt.u32.totalorder %s5196_s5, %s5192_s28 }
  0x83   : > { %p5200_p6 = scmp.lt.u32.totalorder %s5192_s28, %s5724_s2 }
  0x84   : > { %p5194_p3 = pnand %p5193_p12, %p4199_p7  ;;  %p5199_p5 = por %p5198_p0, %p5197_p10 }
  0x86   : > { %p5195_p4 = pneg %p5194_p3  ;;  %p5201_p11 = por %p5200_p6, %p5199_p5 }
  0x88   : > { %p5202_p2 = pnand %p5201_p11, %p5195_p4 }
  0x8a   : > { %5205 = shalt.err (!%p5202_p2)
}
  0x8b   : > { %s5206_s27 = scalar_lea.vmem %s5719_s10, %s5711_s21  ;;  %s5442_s15 = smov [#allocation3]  }
  0x8c   : > { %p5207_p1 = scmp.ne.s32.totalorder %s5719_s10, %s5206_s27  ;;  %s5210_s12 = sshll.u32 %s5442_s15, 4  ;;  %s5211_s12 = int_to_ptr.vmem [resolvable:$false] %s5210_s12 }
  0x8d   : > { %s5212_s11 = scalar_lea.vmem %s5211_s12, 32768  ;;  %p5213_p9 = scmp.lt.s32.totalorder %s5719_s10, %s5211_s12 }
  0x8e   : > { %p5208_p13 = pnand %p5207_p1, %p4199_p7  ;;  %p5214_p12 = scmp.lt.s32.totalorder %s5212_s11, %s5206_s27 }
  0x90   : > { %p5209_p8 = pneg %p5208_p13  ;;  %p5215_p3 = por %p5214_p12, %p5213_p9 }
  0x92   : > { %p5216_p10 = pnand %p5215_p3, %p5209_p8 }
  0x94   : > { %5219 = shalt.err (!%p5216_p10)
}
  0x95   : > { %s5443_s28 = smov 768   ;;  %s5444_s16 = smov 256  }
  0x96   : > { %s5445_s18 = smov 16  }
  0x97   : > { %281 = dma.hbm_to_vmem [thread:$0]  (%p4199_p7), %s5724_s2, %s5711_s21, %s5719_s10, %s5714_s19, %s5443_s28, %s5444_s16, %s5445_s18  }
  0x98 PF: > { %s285_s5 = sand.u32 1, %s5438_s6   ;;  %s287_s13 = sand.u32 1, %s5406_s23  }
  0x99   : > { %s4204_s8 = sshll.u32 %s287_s13, 9  ;;  %s4495_s27 = sshll.u32 %s5430_s29, 13 }
  0x9a   : > { %s5757_s11 = scalar_lea.hbm %s6726_s1, %s4495_s27  ;;  %s289_s2 = scalar_lea.vmem [#allocation6], %s4204_s8 }
  0x9b   : > { %s299_s21 = sshll.u32 %s289_s2, 4  ;;  %s5763_s19 = scalar_lea.sflag [#allocation7], %s285_s5  ;;  %s5759_s21 = int_to_ptr.vmem [resolvable:$true] %s299_s21 }
  0x9c   : > { %s5220_s10 = scalar_lea.hbm %s5757_s11, 8192  ;;  %p6779_p4 = scmp.ne.s32.totalorder %s6760_s24, 0 }
  0x9d   : > { %p5221_p7 = scmp.ne.s32.totalorder %s5757_s11, %s5220_s10  ;;  %s5224_s18 = scalar_lea.hbm %s6726_s1, 24576 }
  0x9e   : > { %p5225_p6 = scmp.lt.u32.totalorder %s5757_s11, %s6726_s1  ;;  %p5226_p11 = scmp.lt.u32.totalorder %s5224_s18, %s5220_s10 }
  0x9f   : > { %p5222_p0 = pnand %p5221_p7, %p6779_p4  ;;  %p5228_p1 = scmp.lt.u32.totalorder %s5220_s10, %s5757_s11 }
  0xa0   : > { %p5227_p2 = por %p5226_p11, %p5225_p6 }
  0xa1   : > { %p5223_p5 = pneg %p5222_p0 }
  0xa2   : > { %p5229_p13 = por %p5228_p1, %p5227_p2 }
  0xa4   : > { %p5230_p8 = pnand %p5229_p13, %p5223_p5 }
  0xa6   : > { %5233 = shalt.err (!%p5230_p8)
}
  0xa7   : > { %s5234_s8 = scalar_lea.vmem %s5759_s21, 8192  ;;  %s5446_s15 = smov [#allocation6]  }
  0xa8   : > { %p5235_p9 = scmp.ne.s32.totalorder %s5759_s21, %s5234_s8  ;;  %s5238_s12 = sshll.u32 %s5446_s15, 4  ;;  %s5239_s12 = int_to_ptr.vmem [resolvable:$false] %s5238_s12 }
  0xa9   : > { %s5240_s2 = scalar_lea.vmem %s5239_s12, 16384  ;;  %p5241_p10 = scmp.lt.s32.totalorder %s5759_s21, %s5239_s12 }
  0xaa   : > { %p5236_p12 = pnand %p5235_p9, %p6779_p4  ;;  %p5242_p7 = scmp.lt.s32.totalorder %s5240_s2, %s5234_s8 }
  0xac   : > { %p5237_p3 = pneg %p5236_p12  ;;  %p5243_p0 = por %p5242_p7, %p5241_p10 }
  0xae   : > { %p5244_p6 = pnand %p5243_p0, %p5237_p3 }
  0xb0   : > { %5247 = shalt.err (!%p5244_p6)
}
  0xb1   : > { %s5447_s10 = smov 128   ;;  %s5448_s28 = smov 8  }
  0xb2   : > { %4699 = dma.hbm_to_vmem [thread:$0]  (%p6779_p4), %s5757_s11, 8192, %s5759_s21, %s5763_s19, %s5447_s10, %s5447_s10, %s5448_s28  }
  0xb3   : > { %p6780_p5 = scmp.ne.s32.totalorder %s6766_s17, 0 }
  0xb4   : > { %s311_s16 = sand.u32 (%p6780_p5), 1, %s5394_s20   ;;  %s4209_s13 = sshll.u32 (%p6780_p5), %s5434_s30, 6 }
  0xb5   : > { %308 = sbr.rel (!%p6780_p5) target bundleno = 216 (0xd8), region = 36  ;;  %s4208_s18 = sshll.u32 (%p6780_p5), %s311_s16, 9 }
  0xb6   : > { %s316_s27 = ssub.s32 (%p6780_p5), 65, %s4209_s13  ;;  %s5796_s12 = scalar_lea.sflag (%p6780_p5), [#allocation4], %s285_s5 }
  0xb7   : > { %p317_p11 = scmp.lt.s32.totalorder (%p6780_p5), %s316_s27, 64  ;;  %s313_s24 = scalar_lea.vmem (%p6780_p5), [#allocation11], %s4208_s18 }
  0xbc   : > { %s6830_s27 = smov (!%p317_p11, %s316_s27), 64 }
  0xbd   : > { %s5791_s8 = sshll.u32 %s6830_s27, 7 }
  0xbe   : > { %s322_s15 = ssub.s32 8192, %s5791_s8 }
  0xbf   : > { %323 = vsyncadd %s5796_s12, %s322_s15  ;;  %p4212_p4 = scmp.ne.s32.totalorder %s5791_s8, 0  ;;  %s4498_s17 = sshll.u32 %s5434_s30, 13 }
  0xc0   : > { %s5804_s19 = scalar_lea.hbm %s6729_s4, %s4498_s17  ;;  %s330_s5 = sshll.u32 %s313_s24, 4  ;;  %s5806_s5 = int_to_ptr.vmem [resolvable:$true] %s330_s5 }
  0xc1   : > { %s5248_s2 = scalar_lea.hbm %s5804_s19, %s5791_s8  ;;  %s5252_s16 = scalar_lea.hbm %s6729_s4, 8320 }
  0xc2   : > { %p5249_p2 = scmp.ne.s32.totalorder %s5804_s19, %s5248_s2  ;;  %p5253_p8 = scmp.lt.u32.totalorder %s5804_s19, %s6729_s4 }
  0xc3   : > { %p5254_p9 = scmp.lt.u32.totalorder %s5252_s16, %s5248_s2  ;;  %p5256_p3 = scmp.lt.u32.totalorder %s5248_s2, %s5804_s19 }
  0xc4   : > { %p5250_p1 = pnand %p5249_p2, %p4212_p4 }
  0xc5   : > { %p5255_p12 = por %p5254_p9, %p5253_p8 }
  0xc6   : > { %p5251_p13 = pneg %p5250_p1 }
  0xc7   : > { %p5257_p10 = por %p5256_p3, %p5255_p12 }
  0xc9   : > { %p5258_p7 = pnand %p5257_p10, %p5251_p13 }
  0xcb   : > { %5261 = shalt.err (!%p5258_p7)
}
  0xcc   : > { %s5262_s27 = scalar_lea.vmem %s5806_s5, %s5791_s8  ;;  %s5449_s15 = smov [#allocation11]  }
  0xcd   : > { %p5263_p0 = scmp.ne.s32.totalorder %s5806_s5, %s5262_s27  ;;  %s5266_s24 = sshll.u32 %s5449_s15, 4  ;;  %s5267_s24 = int_to_ptr.vmem [resolvable:$false] %s5266_s24 }
  0xce   : > { %s5268_s17 = scalar_lea.vmem %s5267_s24, 16384  ;;  %p5269_p11 = scmp.lt.s32.totalorder %s5806_s5, %s5267_s24 }
  0xcf   : > { %p5264_p6 = pnand %p5263_p0, %p4212_p4  ;;  %p5270_p2 = scmp.lt.s32.totalorder %s5268_s17, %s5262_s27 }
  0xd1   : > { %p5265_p5 = pneg %p5264_p6  ;;  %p5271_p1 = por %p5270_p2, %p5269_p11 }
  0xd3   : > { %p5272_p8 = pnand %p5271_p1, %p5265_p5 }
  0xd5   : > { %5275 = shalt.err (!%p5272_p8)
}
  0xd6   : > { %s5450_s11 = smov 128   ;;  %s5451_s21 = smov 8  }
  0xd7   : > { %336 = dma.hbm_to_vmem [thread:$0]  (%p4212_p4), %s5804_s19, %s5791_s8, %s5806_s5, %s5796_s12, %s5450_s11, %s5450_s11, %s5451_s21  }
  0xd8 PF: > { %p6781_p13 = scmp.ne.s32.totalorder %s6774_s9, 0 }
  0xd9   : > { %s344_s2 = sand.u32 (!%p6781_p13), 1, %s5555_s7   ;;  %s346_s10 = sand.u32 (!%p6781_p13), 1, %s5414_s25  }
  0xda   : > { %342 = sbr.rel (%p6781_p13) target bundleno = 1045 (0x415), region = 40  ;;  %s4218_s28 = sshll.u32 (!%p6781_p13), %s346_s10, 10 }
  0xdb   : > { %s345_s16 = scalar_lea.sflag (!%p6781_p13), [#allocation4], %s344_s2  ;;  %s5837_s18 = scalar_lea.vmem (!%p6781_p13), [#allocation3], %s4218_s28 }
  0xdc   : > { %p6782_p9 = scmp.ne.s32.totalorder (!%p6781_p13), %s6759_s14, 0 }
  0xe1   : > { %5361 = dma.done.wait (%p6782_p9), %s345_s16, 16384  }
  0xe2   : > { %5363 = vsyncadd (%p6782_p9), %s345_s16, 4294950912  ;;  %s6783_s8 = sld [smem:[#allocation27_spill]]  ;;  %s355_s12 = sand.u32 1, %s5402_s22  }
  0xe3   : > { %s4219_s19 = sshll.u32 %s355_s12, 9  ;;  %s354_s9 = scalar_lea.sflag [#allocation7], %s344_s2 }
  0xe4   : > { %s5844_s5 = scalar_lea.vmem [#allocation6], %s4219_s19 }
  0xe8   : > { %p6784_p4 = scmp.ne.s32.totalorder %s6783_s8, 0 }
  0xea   : > { %5365 = dma.done.wait (%p6784_p4), %s354_s9, 8192  }
  0xeb   : > { %5367 = vsyncadd (%p6784_p4), %s354_s9, 4294959104  ;;  %p6785_p12 = scmp.eq.s32.totalorder %s5555_s7, 0 }
  0xed   : > { %5369 = dma.done.wait (%p6785_p12), [#allocation7], 32   ;;  %p6786_p3 = pmov %p6785_p12 }
  0xef   : > { %5371 = vsyncadd (%p6786_p3), [#allocation7], 4294967264  ;;  %p6787_p10 = pmov %p6786_p3 }
  0xf0   : > { %p6788_p7 = pmov %p6786_p3 }
  0xf1   : > { %5373 = dma.done.wait (%p6787_p10), [#allocation10], 32  }
  0xf2   : > { %5375 = vsyncadd (%p6788_p7), [#allocation10], 4294967264  ;;  %s6789_s14 = sld [smem:[#allocation20_spill]]  ;;  %s6790_s13 = sld [smem:[#allocation29_spill]] }
  0xf8   : > { %s372_s27 = sand.u32 1, %s6789_s14   ;;  %p6791_p0 = scmp.ne.s32.totalorder %s6790_s13, 0 }
  0xf9   : > { %s4222_s15 = sshll.u32 %s372_s27, 9 }
  0xfa   : > { %s5861_s24 = scalar_lea.vmem [#allocation11], %s4222_s15 }
  0xfb   : > { %5377 = dma.done.wait (%p6791_p0), %s345_s16, 8192  }
  0xfc   : > { %5379 = vsyncadd (%p6791_p0), %s345_s16, 4294959104  ;;  %s5867_s17 = scalar_lea.vmem [#allocation12], %s4222_s15  ;;  %s6792_s11 = sld [smem:[#allocation21_spill]] }
 0x102   : > { %p4224_p6 = scmp.ne.s32.totalorder %s6792_s11, 0 }
 0x103   : > { %v5452_v0 = vmov (!%p4224_p6), 0.0  }
 0x104   : > { %439 = sbr.rel (%p4224_p6) target bundleno = 324 (0x144), region = 64  ;;  %440 = vst [vmem:[#allocation2] sm:$0xff] (!%p4224_p6), %v5452_v0  ;;  %441 = vst [vmem:[#allocation2 + $0x8] sm:$0xff] (!%p4224_p6), %v5452_v0 }
 0x105   : > { %442 = vst [vmem:[#allocation2 + $0x10] sm:$0xff] (!%p4224_p6), %v5452_v0  ;;  %443 = vst [vmem:[#allocation2 + $0x18] sm:$0xff] (!%p4224_p6), %v5452_v0 }
 0x106   : > { %444 = vst [vmem:[#allocation2 + $0x20] sm:$0xff] (!%p4224_p6), %v5452_v0  ;;  %445 = vst [vmem:[#allocation2 + $0x28] sm:$0xff] (!%p4224_p6), %v5452_v0 }
 0x107   : > { %446 = vst [vmem:[#allocation2 + $0x30] sm:$0xff] (!%p4224_p6), %v5452_v0  ;;  %447 = vst [vmem:[#allocation2 + $0x38] sm:$0xff] (!%p4224_p6), %v5452_v0 }
 0x108   : > { %448 = vst [vmem:[#allocation2 + $0x40] sm:$0xff] (!%p4224_p6), %v5452_v0  ;;  %449 = vst [vmem:[#allocation2 + $0x48] sm:$0xff] (!%p4224_p6), %v5452_v0 }
 0x109   : > { %450 = vst [vmem:[#allocation2 + $0x50] sm:$0xff] (!%p4224_p6), %v5452_v0  ;;  %451 = vst [vmem:[#allocation2 + $0x58] sm:$0xff] (!%p4224_p6), %v5452_v0 }
 0x10a   : > { %452 = vst [vmem:[#allocation2 + $0x60] sm:$0xff] (!%p4224_p6), %v5452_v0  ;;  %453 = vst [vmem:[#allocation2 + $0x68] sm:$0xff] (!%p4224_p6), %v5452_v0 }
 0x10b   : > { %454 = vst [vmem:[#allocation2 + $0x70] sm:$0xff] %v5452_v0  ;;  %455 = vst [vmem:[#allocation2 + $0x78] sm:$0xff] %v5452_v0 }
 0x10c   : > { %456 = vst [vmem:[#allocation2 + $0x80] sm:$0xff] %v5452_v0  ;;  %457 = vst [vmem:[#allocation2 + $0x88] sm:$0xff] %v5452_v0 }
 0x10d   : > { %458 = vst [vmem:[#allocation2 + $0x90] sm:$0xff] %v5452_v0  ;;  %459 = vst [vmem:[#allocation2 + $0x98] sm:$0xff] %v5452_v0 }
 0x10e   : > { %460 = vst [vmem:[#allocation2 + $0xa0] sm:$0xff] %v5452_v0  ;;  %461 = vst [vmem:[#allocation2 + $0xa8] sm:$0xff] %v5452_v0 }
 0x10f   : > { %462 = vst [vmem:[#allocation2 + $0xb0] sm:$0xff] %v5452_v0  ;;  %463 = vst [vmem:[#allocation2 + $0xb8] sm:$0xff] %v5452_v0 }
 0x110   : > { %464 = vst [vmem:[#allocation2 + $0xc0] sm:$0xff] %v5452_v0  ;;  %465 = vst [vmem:[#allocation2 + $0xc8] sm:$0xff] %v5452_v0 }
 0x111   : > { %466 = vst [vmem:[#allocation2 + $0xd0] sm:$0xff] %v5452_v0  ;;  %467 = vst [vmem:[#allocation2 + $0xd8] sm:$0xff] %v5452_v0 }
 0x112   : > { %468 = vst [vmem:[#allocation2 + $0xe0] sm:$0xff] %v5452_v0  ;;  %469 = vst [vmem:[#allocation2 + $0xe8] sm:$0xff] %v5452_v0 }
 0x113   : > { %470 = vst [vmem:[#allocation2 + $0xf0] sm:$0xff] %v5452_v0  ;;  %471 = vst [vmem:[#allocation2 + $0xf8] sm:$0xff] %v5452_v0 }
 0x114   : > { %472 = vst [vmem:[#allocation2 + $0x100] sm:$0xff] %v5452_v0  ;;  %473 = vst [vmem:[#allocation2 + $0x108] sm:$0xff] %v5452_v0 }
 0x115   : > { %474 = vst [vmem:[#allocation2 + $0x110] sm:$0xff] %v5452_v0  ;;  %475 = vst [vmem:[#allocation2 + $0x118] sm:$0xff] %v5452_v0 }
 0x116   : > { %476 = vst [vmem:[#allocation2 + $0x120] sm:$0xff] %v5452_v0  ;;  %477 = vst [vmem:[#allocation2 + $0x128] sm:$0xff] %v5452_v0 }
 0x117   : > { %478 = vst [vmem:[#allocation2 + $0x130] sm:$0xff] %v5452_v0  ;;  %479 = vst [vmem:[#allocation2 + $0x138] sm:$0xff] %v5452_v0 }
 0x118   : > { %480 = vst [vmem:[#allocation2 + $0x140] sm:$0xff] %v5452_v0  ;;  %481 = vst [vmem:[#allocation2 + $0x148] sm:$0xff] %v5452_v0 }
 0x119   : > { %482 = vst [vmem:[#allocation2 + $0x150] sm:$0xff] %v5452_v0  ;;  %483 = vst [vmem:[#allocation2 + $0x158] sm:$0xff] %v5452_v0 }
 0x11a   : > { %484 = vst [vmem:[#allocation2 + $0x160] sm:$0xff] %v5452_v0  ;;  %485 = vst [vmem:[#allocation2 + $0x168] sm:$0xff] %v5452_v0 }
 0x11b   : > { %486 = vst [vmem:[#allocation2 + $0x170] sm:$0xff] %v5452_v0  ;;  %487 = vst [vmem:[#allocation2 + $0x178] sm:$0xff] %v5452_v0 }
 0x11c   : > { %488 = vst [vmem:[#allocation2 + $0x180] sm:$0xff] %v5452_v0  ;;  %489 = vst [vmem:[#allocation2 + $0x188] sm:$0xff] %v5452_v0 }
 0x11d   : > { %490 = vst [vmem:[#allocation2 + $0x190] sm:$0xff] %v5452_v0  ;;  %491 = vst [vmem:[#allocation2 + $0x198] sm:$0xff] %v5452_v0 }
 0x11e   : > { %492 = vst [vmem:[#allocation2 + $0x1a0] sm:$0xff] %v5452_v0  ;;  %493 = vst [vmem:[#allocation2 + $0x1a8] sm:$0xff] %v5452_v0 }
 0x11f   : > { %494 = vst [vmem:[#allocation2 + $0x1b0] sm:$0xff] %v5452_v0  ;;  %495 = vst [vmem:[#allocation2 + $0x1b8] sm:$0xff] %v5452_v0 }
 0x120   : > { %496 = vst [vmem:[#allocation2 + $0x1c0] sm:$0xff] %v5452_v0  ;;  %497 = vst [vmem:[#allocation2 + $0x1c8] sm:$0xff] %v5452_v0 }
 0x121   : > { %498 = vst [vmem:[#allocation2 + $0x1d0] sm:$0xff] %v5452_v0  ;;  %499 = vst [vmem:[#allocation2 + $0x1d8] sm:$0xff] %v5452_v0 }
 0x122   : > { %500 = vst [vmem:[#allocation2 + $0x1e0] sm:$0xff] %v5452_v0  ;;  %501 = vst [vmem:[#allocation2 + $0x1e8] sm:$0xff] %v5452_v0 }
 0x123   : > { %502 = vst [vmem:[#allocation2 + $0x1f0] sm:$0xff] %v5452_v0  ;;  %503 = vst [vmem:[#allocation2 + $0x1f8] sm:$0xff] %v5452_v0 }
 0x124   : > { %504 = vst [vmem:[#allocation2 + $0x200] sm:$0xff] %v5452_v0  ;;  %505 = vst [vmem:[#allocation2 + $0x208] sm:$0xff] %v5452_v0 }
 0x125   : > { %506 = vst [vmem:[#allocation2 + $0x210] sm:$0xff] %v5452_v0  ;;  %507 = vst [vmem:[#allocation2 + $0x218] sm:$0xff] %v5452_v0 }
 0x126   : > { %508 = vst [vmem:[#allocation2 + $0x220] sm:$0xff] %v5452_v0  ;;  %509 = vst [vmem:[#allocation2 + $0x228] sm:$0xff] %v5452_v0 }
 0x127   : > { %510 = vst [vmem:[#allocation2 + $0x230] sm:$0xff] %v5452_v0  ;;  %511 = vst [vmem:[#allocation2 + $0x238] sm:$0xff] %v5452_v0 }
 0x128   : > { %512 = vst [vmem:[#allocation2 + $0x240] sm:$0xff] %v5452_v0  ;;  %513 = vst [vmem:[#allocation2 + $0x248] sm:$0xff] %v5452_v0 }
 0x129   : > { %514 = vst [vmem:[#allocation2 + $0x250] sm:$0xff] %v5452_v0  ;;  %515 = vst [vmem:[#allocation2 + $0x258] sm:$0xff] %v5452_v0 }
 0x12a   : > { %516 = vst [vmem:[#allocation2 + $0x260] sm:$0xff] %v5452_v0  ;;  %517 = vst [vmem:[#allocation2 + $0x268] sm:$0xff] %v5452_v0 }
 0x12b   : > { %518 = vst [vmem:[#allocation2 + $0x270] sm:$0xff] %v5452_v0  ;;  %519 = vst [vmem:[#allocation2 + $0x278] sm:$0xff] %v5452_v0 }
 0x12c   : > { %520 = vst [vmem:[#allocation2 + $0x280] sm:$0xff] %v5452_v0  ;;  %521 = vst [vmem:[#allocation2 + $0x288] sm:$0xff] %v5452_v0 }
 0x12d   : > { %522 = vst [vmem:[#allocation2 + $0x290] sm:$0xff] %v5452_v0  ;;  %523 = vst [vmem:[#allocation2 + $0x298] sm:$0xff] %v5452_v0 }
 0x12e   : > { %524 = vst [vmem:[#allocation2 + $0x2a0] sm:$0xff] %v5452_v0  ;;  %525 = vst [vmem:[#allocation2 + $0x2a8] sm:$0xff] %v5452_v0 }
 0x12f   : > { %526 = vst [vmem:[#allocation2 + $0x2b0] sm:$0xff] %v5452_v0  ;;  %527 = vst [vmem:[#allocation2 + $0x2b8] sm:$0xff] %v5452_v0 }
 0x130   : > { %528 = vst [vmem:[#allocation2 + $0x2c0] sm:$0xff] %v5452_v0  ;;  %529 = vst [vmem:[#allocation2 + $0x2c8] sm:$0xff] %v5452_v0 }
 0x131   : > { %530 = vst [vmem:[#allocation2 + $0x2d0] sm:$0xff] %v5452_v0  ;;  %531 = vst [vmem:[#allocation2 + $0x2d8] sm:$0xff] %v5452_v0 }
 0x132   : > { %532 = vst [vmem:[#allocation2 + $0x2e0] sm:$0xff] %v5452_v0  ;;  %533 = vst [vmem:[#allocation2 + $0x2e8] sm:$0xff] %v5452_v0 }
 0x133   : > { %534 = vst [vmem:[#allocation2 + $0x2f0] sm:$0xff] %v5452_v0  ;;  %535 = vst [vmem:[#allocation2 + $0x2f8] sm:$0xff] %v5452_v0 }
 0x134   : > { %536 = vst [vmem:[#allocation2 + $0x300] sm:$0xff] %v5452_v0  ;;  %537 = vst [vmem:[#allocation2 + $0x308] sm:$0xff] %v5452_v0 }
 0x135   : > { %538 = vst [vmem:[#allocation2 + $0x310] sm:$0xff] %v5452_v0  ;;  %539 = vst [vmem:[#allocation2 + $0x318] sm:$0xff] %v5452_v0 }
 0x136   : > { %540 = vst [vmem:[#allocation2 + $0x320] sm:$0xff] %v5452_v0  ;;  %541 = vst [vmem:[#allocation2 + $0x328] sm:$0xff] %v5452_v0 }
 0x137   : > { %542 = vst [vmem:[#allocation2 + $0x330] sm:$0xff] %v5452_v0  ;;  %543 = vst [vmem:[#allocation2 + $0x338] sm:$0xff] %v5452_v0 }
 0x138   : > { %544 = vst [vmem:[#allocation2 + $0x340] sm:$0xff] %v5452_v0  ;;  %545 = vst [vmem:[#allocation2 + $0x348] sm:$0xff] %v5452_v0 }
 0x139   : > { %546 = vst [vmem:[#allocation2 + $0x350] sm:$0xff] %v5452_v0  ;;  %547 = vst [vmem:[#allocation2 + $0x358] sm:$0xff] %v5452_v0 }
 0x13a   : > { %548 = vst [vmem:[#allocation2 + $0x360] sm:$0xff] %v5452_v0  ;;  %549 = vst [vmem:[#allocation2 + $0x368] sm:$0xff] %v5452_v0 }
 0x13b   : > { %550 = vst [vmem:[#allocation2 + $0x370] sm:$0xff] %v5452_v0  ;;  %551 = vst [vmem:[#allocation2 + $0x378] sm:$0xff] %v5452_v0 }
 0x13c   : > { %552 = vst [vmem:[#allocation2 + $0x380] sm:$0xff] %v5452_v0  ;;  %553 = vst [vmem:[#allocation2 + $0x388] sm:$0xff] %v5452_v0 }
 0x13d   : > { %554 = vst [vmem:[#allocation2 + $0x390] sm:$0xff] %v5452_v0  ;;  %555 = vst [vmem:[#allocation2 + $0x398] sm:$0xff] %v5452_v0 }
 0x13e   : > { %556 = vst [vmem:[#allocation2 + $0x3a0] sm:$0xff] %v5452_v0  ;;  %557 = vst [vmem:[#allocation2 + $0x3a8] sm:$0xff] %v5452_v0 }
 0x13f   : > { %558 = vst [vmem:[#allocation2 + $0x3b0] sm:$0xff] %v5452_v0  ;;  %559 = vst [vmem:[#allocation2 + $0x3b8] sm:$0xff] %v5452_v0 }
 0x140   : > { %560 = vst [vmem:[#allocation2 + $0x3c0] sm:$0xff] %v5452_v0  ;;  %561 = vst [vmem:[#allocation2 + $0x3c8] sm:$0xff] %v5452_v0 }
 0x141   : > { %562 = vst [vmem:[#allocation2 + $0x3d0] sm:$0xff] %v5452_v0  ;;  %563 = vst [vmem:[#allocation2 + $0x3d8] sm:$0xff] %v5452_v0 }
 0x142   : > { %564 = vst [vmem:[#allocation2 + $0x3e0] sm:$0xff] %v5452_v0  ;;  %565 = vst [vmem:[#allocation2 + $0x3e8] sm:$0xff] %v5452_v0 }
 0x143   : > { %566 = vst [vmem:[#allocation2 + $0x3f0] sm:$0xff] %v5452_v0  ;;  %567 = vst [vmem:[#allocation2 + $0x3f8] sm:$0xff] %v5452_v0 }
 0x144 PF: > { %v4848_v1 = vld [vmem:[%s5844_s5 + $0x4] ss:$8 sps:$4 sm:$0xff]   ;;  %v4852_v3 = vld [vmem:[%s5844_s5] ss:$8 sps:$4 sm:$0xff]   ;;  %v4854_v5 = vld [vmem:[%s5844_s5 + $0x14] ss:$8 sps:$4 sm:$0xff]  }
 0x145   : > { %v4850_v2 = vld [vmem:[%s5844_s5 + $0x104] ss:$8 sps:$4 sm:$0xff]   ;;  %1848 = vmatprep.subr.bf16.mxu1 %v4848_v1  ;;  %v4853_v4 = vld [vmem:[%s5844_s5 + $0x100] ss:$8 sps:$4 sm:$0xff]   ;;  %v4856_v6 = vld [vmem:[%s5844_s5 + $0x114] ss:$8 sps:$4 sm:$0xff]  }
 0x146   : > { %2201 = vmatprep.subr.bf16.mxu0 %v4850_v2  ;;  %1849 = vmatpush1.bf16.msra.mxu1 %v4852_v3  ;;  %v4858_v7 = vld [vmem:[%s5844_s5 + $0x10] ss:$8 sps:$4 sm:$0xff]   ;;  %v4860_v9 = vld [vmem:[%s5844_s5 + $0x24] ss:$8 sps:$4 sm:$0xff]   ;;  %v4864_v11 = vld [vmem:[%s5844_s5 + $0x20] ss:$8 sps:$4 sm:$0xff]  }
 0x147   : > { %2202 = vmatpush1.bf16.msra.mxu0 %v4853_v4  ;;  %1850 = vmatprep.subr.bf16.mxu1 %v4854_v5  ;;  %v4859_v8 = vld [vmem:[%s5844_s5 + $0x110] ss:$8 sps:$4 sm:$0xff]   ;;  %v4862_v10 = vld [vmem:[%s5844_s5 + $0x124] ss:$8 sps:$4 sm:$0xff]   ;;  %v4865_v12 = vld [vmem:[%s5844_s5 + $0x120] ss:$8 sps:$4 sm:$0xff]  }
 0x148   : > { %2203 = vmatprep.subr.bf16.mxu0 %v4856_v6  ;;  %v4866_v13 = vld [vmem:[%s5844_s5 + $0x34] ss:$8 sps:$4 sm:$0xff]   ;;  %v4870_v15 = vld [vmem:[%s5844_s5 + $0x30] ss:$8 sps:$4 sm:$0xff]   ;;  %v4872_v17 = vld [vmem:[%s5844_s5 + $0x44] ss:$8 sps:$4 sm:$0xff]  }
 0x149   : > { %v4868_v14 = vld [vmem:[%s5844_s5 + $0x134] ss:$8 sps:$4 sm:$0xff]   ;;  %v4871_v16 = vld [vmem:[%s5844_s5 + $0x130] ss:$8 sps:$4 sm:$0xff]   ;;  %v4874_v18 = vld [vmem:[%s5844_s5 + $0x144] ss:$8 sps:$4 sm:$0xff]  }
 0x14a   : > { %1851 = vmatpush1.bf16.msra.mxu1 %v4858_v7  ;;  %v4876_v19 = vld [vmem:[%s5844_s5 + $0x40] ss:$8 sps:$4 sm:$0xff]   ;;  %v4878_v21 = vld [vmem:[%s5844_s5 + $0x54] ss:$8 sps:$4 sm:$0xff]   ;;  %v4882_v23 = vld [vmem:[%s5844_s5 + $0x50] ss:$8 sps:$4 sm:$0xff]  }
 0x14b   : > { %2204 = vmatpush1.bf16.msra.mxu0 %v4859_v8  ;;  %1852 = vmatprep.subr.bf16.mxu1 %v4860_v9  ;;  %v4877_v20 = vld [vmem:[%s5844_s5 + $0x140] ss:$8 sps:$4 sm:$0xff]   ;;  %v4880_v22 = vld [vmem:[%s5844_s5 + $0x154] ss:$8 sps:$4 sm:$0xff]   ;;  %v4883_v24 = vld [vmem:[%s5844_s5 + $0x150] ss:$8 sps:$4 sm:$0xff]  }
 0x14c   : > { %2205 = vmatprep.subr.bf16.mxu0 %v4862_v10  ;;  %v4884_v25 = vld [vmem:[%s5844_s5 + $0x64] ss:$8 sps:$4 sm:$0xff]   ;;  %v4888_v27 = vld [vmem:[%s5844_s5 + $0x60] ss:$8 sps:$4 sm:$0xff]   ;;  %v4890_v29 = vld [vmem:[%s5844_s5 + $0x74] ss:$8 sps:$4 sm:$0xff]  }
 0x14d   : > { %v4886_v26 = vld [vmem:[%s5844_s5 + $0x164] ss:$8 sps:$4 sm:$0xff]   ;;  %v4889_v28 = vld [vmem:[%s5844_s5 + $0x160] ss:$8 sps:$4 sm:$0xff]   ;;  %v4892_v30 = vld [vmem:[%s5844_s5 + $0x174] ss:$8 sps:$4 sm:$0xff]  }
 0x14e   : > { %1853 = vmatpush1.bf16.msra.mxu1 %v4864_v11  ;;  %v4894_v31 = vld [vmem:[%s5844_s5 + $0x70] ss:$8 sps:$4 sm:$0xff]   ;;  %v4896_v33 = vld [vmem:[%s5844_s5 + $0x84] ss:$8 sps:$4 sm:$0xff]   ;;  %v4900_v35 = vld [vmem:[%s5844_s5 + $0x80] ss:$8 sps:$4 sm:$0xff]  }
 0x14f   : > { %2206 = vmatpush1.bf16.msra.mxu0 %v4865_v12  ;;  %1854 = vmatprep.subr.bf16.mxu1 %v4866_v13  ;;  %v4895_v32 = vld [vmem:[%s5844_s5 + $0x170] ss:$8 sps:$4 sm:$0xff]   ;;  %v4898_v34 = vld [vmem:[%s5844_s5 + $0x184] ss:$8 sps:$4 sm:$0xff]   ;;  %v4901_v36 = vld [vmem:[%s5844_s5 + $0x180] ss:$8 sps:$4 sm:$0xff]  }
 0x150   : > { %2207 = vmatprep.subr.bf16.mxu0 %v4868_v14  ;;  %v4902_v37 = vld [vmem:[%s5844_s5 + $0x94] ss:$8 sps:$4 sm:$0xff]   ;;  %v4906_v39 = vld [vmem:[%s5844_s5 + $0x90] ss:$8 sps:$4 sm:$0xff]   ;;  %v4908_v41 = vld [vmem:[%s5844_s5 + $0xa4] ss:$8 sps:$4 sm:$0xff]  }
 0x151   : > { %v4904_v38 = vld [vmem:[%s5844_s5 + $0x194] ss:$8 sps:$4 sm:$0xff]   ;;  %v4907_v40 = vld [vmem:[%s5844_s5 + $0x190] ss:$8 sps:$4 sm:$0xff]   ;;  %v4910_v42 = vld [vmem:[%s5844_s5 + $0x1a4] ss:$8 sps:$4 sm:$0xff]  }
 0x152   : > { %1855 = vmatpush1.bf16.msra.mxu1 %v4870_v15  ;;  %v4912_v43 = vld [vmem:[%s5844_s5 + $0xa0] ss:$8 sps:$4 sm:$0xff]   ;;  %v4914_v45 = vld [vmem:[%s5844_s5 + $0xb4] ss:$8 sps:$4 sm:$0xff]   ;;  %v4918_v47 = vld [vmem:[%s5844_s5 + $0xb0] ss:$8 sps:$4 sm:$0xff]  }
 0x153   : > { %2208 = vmatpush1.bf16.msra.mxu0 %v4871_v16  ;;  %1856 = vmatprep.subr.bf16.mxu1 %v4872_v17  ;;  %v4913_v44 = vld [vmem:[%s5844_s5 + $0x1a0] ss:$8 sps:$4 sm:$0xff]   ;;  %v4916_v46 = vld [vmem:[%s5844_s5 + $0x1b4] ss:$8 sps:$4 sm:$0xff]   ;;  %v4919_v48 = vld [vmem:[%s5844_s5 + $0x1b0] ss:$8 sps:$4 sm:$0xff]  }
 0x154   : > { %2209 = vmatprep.subr.bf16.mxu0 %v4874_v18  ;;  %v4920_v49 = vld [vmem:[%s5844_s5 + $0xc4] ss:$8 sps:$4 sm:$0xff]   ;;  %v4924_v53 = vld [vmem:[%s5844_s5 + $0xc0] ss:$8 sps:$4 sm:$0xff]   ;;  %v4926_v55 = vld [vmem:[%s5844_s5 + $0xd4] ss:$8 sps:$4 sm:$0xff]  }
 0x155   : > { %v4946_v50 = vld [vmem:[%s5837_s18 + $0x4] ss:$16 sps:$4 sm:$0xff]   ;;  %v4949_v52 = vld [vmem:[%s5837_s18 + $0xc] ss:$16 sps:$4 sm:$0xff]   ;;  %v4925_v54 = vld [vmem:[%s5844_s5 + $0x1c0] ss:$8 sps:$4 sm:$0xff]  }
 0x156   : > { %1857 = vmatpush1.bf16.msra.mxu1 %v4876_v19  ;;  %v4922_v51 = vld [vmem:[%s5844_s5 + $0x1c4] ss:$8 sps:$4 sm:$0xff]   ;;  %1880 = vmatprep.mubr.bf16.mxu1 %v4946_v50  ;;  %v4928_v56 = vld [vmem:[%s5844_s5 + $0x1d4] ss:$8 sps:$4 sm:$0xff]   ;;  %v4930_v57 = vld [vmem:[%s5844_s5 + $0xd0] ss:$8 sps:$4 sm:$0xff]  }
 0x157   : > { %2210 = vmatpush1.bf16.msra.mxu0 %v4877_v20  ;;  %1858 = vmatprep.subr.bf16.mxu1 %v4878_v21  ;;  %v4931_v58 = vld [vmem:[%s5844_s5 + $0x1d0] ss:$8 sps:$4 sm:$0xff]   ;;  %v4932_v59 = vld [vmem:[%s5844_s5 + $0xe4] ss:$8 sps:$4 sm:$0xff]   ;;  %v4936_v61 = vld [vmem:[%s5844_s5 + $0xe0] ss:$8 sps:$4 sm:$0xff]  }
 0x158   : > { %2211 = vmatprep.subr.bf16.mxu0 %v4880_v22  ;;  %2233 = vmatprep.mubr.bf16.mxu0 %v4949_v52  ;;  %v4934_v60 = vld [vmem:[%s5844_s5 + $0x1e4] ss:$8 sps:$4 sm:$0xff]   ;;  %v4937_v62 = vld [vmem:[%s5844_s5 + $0x1e0] ss:$8 sps:$4 sm:$0xff]   ;;  %v4938_v63 = vld [vmem:[%s5844_s5 + $0xf4] ss:$8 sps:$4 sm:$0xff]  }
 0x159   : > { %v4940_v0 = vld [vmem:[%s5844_s5 + $0x1f4] ss:$8 sps:$4 sm:$0xff]   ;;  %v4942_v1 = vld [vmem:[%s5844_s5 + $0xf0] ss:$8 sps:$4 sm:$0xff]   ;;  %s6793_s7 = sld [smem:[#allocation21_spill]] }
 0x15a   : > { %1859 = vmatpush1.bf16.msra.mxu1 %v4882_v23  ;;  %v4943_v2 = vld [vmem:[%s5844_s5 + $0x1f0] ss:$8 sps:$4 sm:$0xff]   ;;  %v4950_v5 = vld [vmem:[%s5837_s18 + $0x24] ss:$16 sps:$4 sm:$0xff]   ;;  %v4952_v6 = vld [vmem:[%s5837_s18 + $0x2c] ss:$16 sps:$4 sm:$0xff]  }
 0x15b   : > { %2212 = vmatpush1.bf16.msra.mxu0 %v4883_v24  ;;  %1860 = vmatprep.subr.bf16.mxu1 %v4884_v25  ;;  %v4944_v3 = vld [vmem:[%s5837_s18] ss:$16 sps:$4 sm:$0xff]   ;;  %v4947_v4 = vld [vmem:[%s5837_s18 + $0x8] ss:$16 sps:$4 sm:$0xff]   ;;  %v4956_v9 = vld [vmem:[%s5837_s18 + $0x44] ss:$16 sps:$4 sm:$0xff]  }
 0x15c   : > { %2213 = vmatprep.subr.bf16.mxu0 %v4886_v26  ;;  %v4954_v7 = vld [vmem:[%s5837_s18 + $0x20] ss:$16 sps:$4 sm:$0xff]   ;;  %v4955_v8 = vld [vmem:[%s5837_s18 + $0x28] ss:$16 sps:$4 sm:$0xff]   ;;  %v4958_v10 = vld [vmem:[%s5837_s18 + $0x4c] ss:$16 sps:$4 sm:$0xff]  }
 0x15d   : > { %v4960_v11 = vld [vmem:[%s5837_s18 + $0x40] ss:$16 sps:$4 sm:$0xff]   ;;  %v4961_v12 = vld [vmem:[%s5837_s18 + $0x48] ss:$16 sps:$4 sm:$0xff]   ;;  %v4962_v13 = vld [vmem:[%s5837_s18 + $0x64] ss:$16 sps:$4 sm:$0xff]  }
 0x15e   : > { %1861 = vmatpush1.bf16.msra.mxu1 %v4888_v27  ;;  %v4964_v14 = vld [vmem:[%s5837_s18 + $0x6c] ss:$16 sps:$4 sm:$0xff]   ;;  %v4966_v15 = vld [vmem:[%s5837_s18 + $0x60] ss:$16 sps:$4 sm:$0xff]   ;;  %v4967_v16 = vld [vmem:[%s5837_s18 + $0x68] ss:$16 sps:$4 sm:$0xff]  }
 0x15f   : > { %2214 = vmatpush1.bf16.msra.mxu0 %v4889_v28  ;;  %1862 = vmatprep.subr.bf16.mxu1 %v4890_v29  ;;  %v4968_v17 = vld [vmem:[%s5837_s18 + $0x84] ss:$16 sps:$4 sm:$0xff]   ;;  %v4970_v18 = vld [vmem:[%s5837_s18 + $0x8c] ss:$16 sps:$4 sm:$0xff]   ;;  %v4972_v19 = vld [vmem:[%s5837_s18 + $0x80] ss:$16 sps:$4 sm:$0xff]  }
 0x160   : > { %2215 = vmatprep.subr.bf16.mxu0 %v4892_v30  ;;  %v4973_v20 = vld [vmem:[%s5837_s18 + $0x88] ss:$16 sps:$4 sm:$0xff]   ;;  %v4974_v21 = vld [vmem:[%s5837_s18 + $0xa4] ss:$16 sps:$4 sm:$0xff]   ;;  %v4976_v22 = vld [vmem:[%s5837_s18 + $0xac] ss:$16 sps:$4 sm:$0xff]  }
 0x161   : > { %v4978_v23 = vld [vmem:[%s5837_s18 + $0xa0] ss:$16 sps:$4 sm:$0xff]   ;;  %v4979_v24 = vld [vmem:[%s5837_s18 + $0xa8] ss:$16 sps:$4 sm:$0xff]   ;;  %v4980_v25 = vld [vmem:[%s5837_s18 + $0xc4] ss:$16 sps:$4 sm:$0xff]  }
 0x162   : > { %1863 = vmatpush1.bf16.msra.mxu1 %v4894_v31  ;;  %v4982_v26 = vld [vmem:[%s5837_s18 + $0xcc] ss:$16 sps:$4 sm:$0xff]   ;;  %v4984_v27 = vld [vmem:[%s5837_s18 + $0xc0] ss:$16 sps:$4 sm:$0xff]   ;;  %v4985_v28 = vld [vmem:[%s5837_s18 + $0xc8] ss:$16 sps:$4 sm:$0xff]  }
 0x163   : > { %2216 = vmatpush1.bf16.msra.mxu0 %v4895_v32  ;;  %1864 = vmatprep.subr.bf16.mxu1 %v4896_v33  ;;  %v4986_v29 = vld [vmem:[%s5837_s18 + $0xe4] ss:$16 sps:$4 sm:$0xff]   ;;  %v4988_v30 = vld [vmem:[%s5837_s18 + $0xec] ss:$16 sps:$4 sm:$0xff]   ;;  %v4990_v31 = vld [vmem:[%s5837_s18 + $0xe0] ss:$16 sps:$4 sm:$0xff]  }
 0x164   : > { %2217 = vmatprep.subr.bf16.mxu0 %v4898_v34  ;;  %v4991_v32 = vld [vmem:[%s5837_s18 + $0xe8] ss:$16 sps:$4 sm:$0xff]   ;;  %v4992_v33 = vld [vmem:[%s5837_s18 + $0x104] ss:$16 sps:$4 sm:$0xff]   ;;  %v4994_v34 = vld [vmem:[%s5837_s18 + $0x10c] ss:$16 sps:$4 sm:$0xff]  }
 0x165   : > { %v5018_v50 = vld [vmem:[%s5837_s18 + $0x18c] ss:$16 sps:$4 sm:$0xff]   ;;  %v5021_v52 = vld [vmem:[%s5837_s18 + $0x188] ss:$16 sps:$4 sm:$0xff]   ;;  %p4417_p5 = scmp.ne.s32.totalorder %s6793_s7, 2 }
 0x166   : > { %1865 = vmatpush1.bf16.msra.mxu1 %v4900_v35  ;;  %v4996_v35 = vld [vmem:[%s5837_s18 + $0x100] ss:$16 sps:$4 sm:$0xff]  }
 0x167   : > { %2218 = vmatpush1.bf16.msra.mxu0 %v4901_v36  ;;  %1866 = vmatprep.subr.bf16.mxu1 %v4902_v37  ;;  %v4997_v36 = vld [vmem:[%s5837_s18 + $0x108] ss:$16 sps:$4 sm:$0xff]   ;;  %v4998_v37 = vld [vmem:[%s5837_s18 + $0x124] ss:$16 sps:$4 sm:$0xff]  }
 0x168   : > { %2219 = vmatprep.subr.bf16.mxu0 %v4904_v38  ;;  %v5000_v38 = vld [vmem:[%s5837_s18 + $0x12c] ss:$16 sps:$4 sm:$0xff]  }
 0x16a   : > { %1867 = vmatpush1.bf16.msra.mxu1 %v4906_v39  ;;  %v5002_v39 = vld [vmem:[%s5837_s18 + $0x120] ss:$16 sps:$4 sm:$0xff]  }
 0x16b   : > { %2220 = vmatpush1.bf16.msra.mxu0 %v4907_v40  ;;  %1868 = vmatprep.subr.bf16.mxu1 %v4908_v41  ;;  %v5003_v40 = vld [vmem:[%s5837_s18 + $0x128] ss:$16 sps:$4 sm:$0xff]   ;;  %v5004_v41 = vld [vmem:[%s5837_s18 + $0x144] ss:$16 sps:$4 sm:$0xff]  }
 0x16c   : > { %2221 = vmatprep.subr.bf16.mxu0 %v4910_v42  ;;  %v5006_v42 = vld [vmem:[%s5837_s18 + $0x14c] ss:$16 sps:$4 sm:$0xff]  }
 0x16e   : > { %1869 = vmatpush1.bf16.msra.mxu1 %v4912_v43  ;;  %v5008_v43 = vld [vmem:[%s5837_s18 + $0x140] ss:$16 sps:$4 sm:$0xff]  }
 0x16f   : > { %2222 = vmatpush1.bf16.msra.mxu0 %v4913_v44  ;;  %1870 = vmatprep.subr.bf16.mxu1 %v4914_v45  ;;  %v5009_v44 = vld [vmem:[%s5837_s18 + $0x148] ss:$16 sps:$4 sm:$0xff]   ;;  %v5010_v45 = vld [vmem:[%s5837_s18 + $0x164] ss:$16 sps:$4 sm:$0xff]  }
 0x170   : > { %2223 = vmatprep.subr.bf16.mxu0 %v4916_v46  ;;  %v5012_v46 = vld [vmem:[%s5837_s18 + $0x16c] ss:$16 sps:$4 sm:$0xff]  }
 0x172   : > { %1871 = vmatpush1.bf16.msra.mxu1 %v4918_v47  ;;  %v5014_v47 = vld [vmem:[%s5837_s18 + $0x160] ss:$16 sps:$4 sm:$0xff]  }
 0x173   : > { %2224 = vmatpush1.bf16.msra.mxu0 %v4919_v48  ;;  %1872 = vmatprep.subr.bf16.mxu1 %v4920_v49  ;;  %v5015_v48 = vld [vmem:[%s5837_s18 + $0x168] ss:$16 sps:$4 sm:$0xff]   ;;  %v5016_v49 = vld [vmem:[%s5837_s18 + $0x184] ss:$16 sps:$4 sm:$0xff]  }
 0x174   : > { %2225 = vmatprep.subr.bf16.mxu0 %v4922_v51  ;;  %v5020_v51 = vld [vmem:[%s5837_s18 + $0x180] ss:$16 sps:$4 sm:$0xff]  }
 0x176   : > { %1873 = vmatpush1.bf16.msra.mxu1 %v4924_v53  ;;  %v5022_v53 = vld [vmem:[%s5837_s18 + $0x1a4] ss:$16 sps:$4 sm:$0xff]  }
 0x177   : > { %2226 = vmatpush1.bf16.msra.mxu0 %v4925_v54  ;;  %1874 = vmatprep.subr.bf16.mxu1 %v4926_v55  ;;  %v5024_v54 = vld [vmem:[%s5837_s18 + $0x1ac] ss:$16 sps:$4 sm:$0xff]   ;;  %v5026_v55 = vld [vmem:[%s5837_s18 + $0x1a0] ss:$16 sps:$4 sm:$0xff]  }
 0x178   : > { %2227 = vmatprep.subr.bf16.mxu0 %v4928_v56  ;;  %v5027_v56 = vld [vmem:[%s5837_s18 + $0x1a8] ss:$16 sps:$4 sm:$0xff]  }
 0x17a   : > { %1875 = vmatpush1.bf16.msra.mxu1 %v4930_v57  ;;  %v5028_v57 = vld [vmem:[%s5837_s18 + $0x1c4] ss:$16 sps:$4 sm:$0xff]  }
 0x17b   : > { %2228 = vmatpush1.bf16.msra.mxu0 %v4931_v58  ;;  %1876 = vmatprep.subr.bf16.mxu1 %v4932_v59  ;;  %v5030_v58 = vld [vmem:[%s5837_s18 + $0x1cc] ss:$16 sps:$4 sm:$0xff]   ;;  %v5032_v59 = vld [vmem:[%s5837_s18 + $0x1c0] ss:$16 sps:$4 sm:$0xff]  }
 0x17c   : > { %2229 = vmatprep.subr.bf16.mxu0 %v4934_v60  ;;  %v5033_v60 = vld [vmem:[%s5837_s18 + $0x1c8] ss:$16 sps:$4 sm:$0xff]  }
 0x17e   : > { %1877 = vmatpush1.bf16.msra.mxu1 %v4936_v61  ;;  %v5034_v61 = vld [vmem:[%s5837_s18 + $0x1e4] ss:$16 sps:$4 sm:$0xff]  }
 0x17f   : > { %2230 = vmatpush1.bf16.msra.mxu0 %v4937_v62  ;;  %1878 = vmatprep.subr.bf16.mxu1 %v4938_v63  ;;  %v5036_v62 = vld [vmem:[%s5837_s18 + $0x1ec] ss:$16 sps:$4 sm:$0xff]   ;;  %v5038_v63 = vld [vmem:[%s5837_s18 + $0x1e0] ss:$16 sps:$4 sm:$0xff]  }
 0x180   : > { %2231 = vmatprep.subr.bf16.mxu0 %v4940_v0  ;;  %v5039_v0 = vld [vmem:[%s5837_s18 + $0x1e8] ss:$16 sps:$4 sm:$0xff]  }
 0x182   : > { %1879 = vmatpush1.bf16.msra.mxu1 %v4942_v1  ;;  %v5040_v1 = vld [vmem:[%s5837_s18 + $0x204] ss:$16 sps:$4 sm:$0xff]  }
 0x183   : > { %2232 = vmatpush1.bf16.msra.mxu0 %v4943_v2  ;;  %v5042_v2 = vld [vmem:[%s5837_s18 + $0x20c] ss:$16 sps:$4 sm:$0xff]  }
 0x185   : > { %1881 = vmatmul.mubr.bf16.vlgmr.msra.gmra.mrb[0].mxu1 %v4944_v3  ;;  %v5044_v3 = vld [vmem:[%s5837_s18 + $0x200] ss:$16 sps:$4 sm:$0xff]  }
 0x186   : > { %2234 = vmatmul.mubr.bf16.vlgmr.msra.gmra.mrb[0].mxu0 %v4947_v4  ;;  %1890 = vmatprep.mubr.bf16.mxu1 %v4950_v5  ;;  %v5045_v4 = vld [vmem:[%s5837_s18 + $0x208] ss:$16 sps:$4 sm:$0xff]   ;;  %v5046_v5 = vld [vmem:[%s5837_s18 + $0x224] ss:$16 sps:$4 sm:$0xff]  }
 0x187   : > { %2243 = vmatprep.mubr.bf16.mxu0 %v4952_v6  ;;  %v5048_v6 = vld [vmem:[%s5837_s18 + $0x22c] ss:$16 sps:$4 sm:$0xff]  }
 0x18d   : > { %1891 = vmatmul.mubr.bf16.gmra.mrb[4].mxu1 %v4954_v7  ;;  %v5050_v7 = vld [vmem:[%s5837_s18 + $0x220] ss:$16 sps:$4 sm:$0xff]  }
 0x18e   : > { %2244 = vmatmul.mubr.bf16.gmra.mrb[4].mxu0 %v4955_v8  ;;  %1900 = vmatprep.mubr.bf16.mxu1 %v4956_v9  ;;  %v5051_v8 = vld [vmem:[%s5837_s18 + $0x228] ss:$16 sps:$4 sm:$0xff]   ;;  %v5052_v9 = vld [vmem:[%s5837_s18 + $0x244] ss:$16 sps:$4 sm:$0xff]  }
 0x18f   : > { %2253 = vmatprep.mubr.bf16.mxu0 %v4958_v10  ;;  %v5054_v10 = vld [vmem:[%s5837_s18 + $0x24c] ss:$16 sps:$4 sm:$0xff]  }
 0x195   : > { %1901 = vmatmul.mubr.bf16.gmra.mrb[8].mxu1 %v4960_v11  ;;  %v5056_v11 = vld [vmem:[%s5837_s18 + $0x240] ss:$16 sps:$4 sm:$0xff]  }
 0x196   : > { %2254 = vmatmul.mubr.bf16.gmra.mrb[8].mxu0 %v4961_v12  ;;  %1910 = vmatprep.mubr.bf16.mxu1 %v4962_v13  ;;  %v5057_v12 = vld [vmem:[%s5837_s18 + $0x248] ss:$16 sps:$4 sm:$0xff]   ;;  %v5058_v13 = vld [vmem:[%s5837_s18 + $0x264] ss:$16 sps:$4 sm:$0xff]  }
 0x197   : > { %2263 = vmatprep.mubr.bf16.mxu0 %v4964_v14  ;;  %v5060_v14 = vld [vmem:[%s5837_s18 + $0x26c] ss:$16 sps:$4 sm:$0xff]  }
 0x19d   : > { %1911 = vmatmul.mubr.bf16.gmra.mrb[12].mxu1 %v4966_v15  ;;  %v5062_v15 = vld [vmem:[%s5837_s18 + $0x260] ss:$16 sps:$4 sm:$0xff]  }
 0x19e   : > { %2264 = vmatmul.mubr.bf16.gmra.mrb[12].mxu0 %v4967_v16  ;;  %1920 = vmatprep.mubr.bf16.mxu1 %v4968_v17  ;;  %v5063_v16 = vld [vmem:[%s5837_s18 + $0x268] ss:$16 sps:$4 sm:$0xff]   ;;  %v5064_v17 = vld [vmem:[%s5837_s18 + $0x284] ss:$16 sps:$4 sm:$0xff]  }
 0x19f   : > { %2273 = vmatprep.mubr.bf16.mxu0 %v4970_v18  ;;  %v5066_v18 = vld [vmem:[%s5837_s18 + $0x28c] ss:$16 sps:$4 sm:$0xff]  }
 0x1a5   : > { %1921 = vmatmul.mubr.bf16.gmra.mrb[16].mxu1 %v4972_v19  ;;  %v5068_v19 = vld [vmem:[%s5837_s18 + $0x280] ss:$16 sps:$4 sm:$0xff]  }
 0x1a6   : > { %2274 = vmatmul.mubr.bf16.gmra.mrb[16].mxu0 %v4973_v20  ;;  %1930 = vmatprep.mubr.bf16.mxu1 %v4974_v21  ;;  %v5069_v20 = vld [vmem:[%s5837_s18 + $0x288] ss:$16 sps:$4 sm:$0xff]   ;;  %v5070_v21 = vld [vmem:[%s5837_s18 + $0x2a4] ss:$16 sps:$4 sm:$0xff]  }
 0x1a7   : > { %2283 = vmatprep.mubr.bf16.mxu0 %v4976_v22  ;;  %v5072_v22 = vld [vmem:[%s5837_s18 + $0x2ac] ss:$16 sps:$4 sm:$0xff]  }
 0x1ad   : > { %1931 = vmatmul.mubr.bf16.gmra.mrb[20].mxu1 %v4978_v23  ;;  %v5074_v23 = vld [vmem:[%s5837_s18 + $0x2a0] ss:$16 sps:$4 sm:$0xff]  }
 0x1ae   : > { %2284 = vmatmul.mubr.bf16.gmra.mrb[20].mxu0 %v4979_v24  ;;  %1940 = vmatprep.mubr.bf16.mxu1 %v4980_v25  ;;  %v5075_v24 = vld [vmem:[%s5837_s18 + $0x2a8] ss:$16 sps:$4 sm:$0xff]   ;;  %v5076_v25 = vld [vmem:[%s5837_s18 + $0x2c4] ss:$16 sps:$4 sm:$0xff]  }
 0x1af   : > { %2293 = vmatprep.mubr.bf16.mxu0 %v4982_v26  ;;  %v5078_v26 = vld [vmem:[%s5837_s18 + $0x2cc] ss:$16 sps:$4 sm:$0xff]  }
 0x1b5   : > { %1941 = vmatmul.mubr.bf16.gmra.mrb[24].mxu1 %v4984_v27  ;;  %v5080_v27 = vld [vmem:[%s5837_s18 + $0x2c0] ss:$16 sps:$4 sm:$0xff]  }
 0x1b6   : > { %2294 = vmatmul.mubr.bf16.gmra.mrb[24].mxu0 %v4985_v28  ;;  %1950 = vmatprep.mubr.bf16.mxu1 %v4986_v29  ;;  %v5081_v28 = vld [vmem:[%s5837_s18 + $0x2c8] ss:$16 sps:$4 sm:$0xff]   ;;  %v5082_v29 = vld [vmem:[%s5837_s18 + $0x2e4] ss:$16 sps:$4 sm:$0xff]  }
 0x1b7   : > { %2303 = vmatprep.mubr.bf16.mxu0 %v4988_v30  ;;  %v5084_v30 = vld [vmem:[%s5837_s18 + $0x2ec] ss:$16 sps:$4 sm:$0xff]  }
 0x1bd   : > { %1951 = vmatmul.mubr.bf16.gmra.mrb[28].mxu1 %v4990_v31  ;;  %v5086_v31 = vld [vmem:[%s5837_s18 + $0x2e0] ss:$16 sps:$4 sm:$0xff]  }
 0x1be   : > { %2304 = vmatmul.mubr.bf16.gmra.mrb[28].mxu0 %v4991_v32  ;;  %1960 = vmatprep.mubr.bf16.mxu1 %v4992_v33  ;;  %v5087_v32 = vld [vmem:[%s5837_s18 + $0x2e8] ss:$16 sps:$4 sm:$0xff]   ;;  %v5088_v33 = vld [vmem:[%s5837_s18 + $0x304] ss:$16 sps:$4 sm:$0xff]  }
 0x1bf   : > { %2313 = vmatprep.mubr.bf16.mxu0 %v4994_v34  ;;  %v5090_v34 = vld [vmem:[%s5837_s18 + $0x30c] ss:$16 sps:$4 sm:$0xff]  }
 0x1c5   : > { %1961 = vmatmul.mubr.bf16.gmra.mrb[32].mxu1 %v4996_v35  ;;  %v5092_v35 = vld [vmem:[%s5837_s18 + $0x300] ss:$16 sps:$4 sm:$0xff]  }
 0x1c6   : > { %2314 = vmatmul.mubr.bf16.gmra.mrb[32].mxu0 %v4997_v36  ;;  %1970 = vmatprep.mubr.bf16.mxu1 %v4998_v37  ;;  %v5093_v36 = vld [vmem:[%s5837_s18 + $0x308] ss:$16 sps:$4 sm:$0xff]   ;;  %v5094_v37 = vld [vmem:[%s5837_s18 + $0x324] ss:$16 sps:$4 sm:$0xff]  }
 0x1c7   : > { %2323 = vmatprep.mubr.bf16.mxu0 %v5000_v38  ;;  %v5096_v38 = vld [vmem:[%s5837_s18 + $0x32c] ss:$16 sps:$4 sm:$0xff]  }
 0x1cd   : > { %1971 = vmatmul.mubr.bf16.gmra.mrb[36].mxu1 %v5002_v39  ;;  %v5098_v39 = vld [vmem:[%s5837_s18 + $0x320] ss:$16 sps:$4 sm:$0xff]  }
 0x1ce   : > { %2324 = vmatmul.mubr.bf16.gmra.mrb[36].mxu0 %v5003_v40  ;;  %1980 = vmatprep.mubr.bf16.mxu1 %v5004_v41  ;;  %v5099_v40 = vld [vmem:[%s5837_s18 + $0x328] ss:$16 sps:$4 sm:$0xff]   ;;  %v5100_v41 = vld [vmem:[%s5837_s18 + $0x344] ss:$16 sps:$4 sm:$0xff]  }
 0x1cf   : > { %2333 = vmatprep.mubr.bf16.mxu0 %v5006_v42  ;;  %v5102_v42 = vld [vmem:[%s5837_s18 + $0x34c] ss:$16 sps:$4 sm:$0xff]  }
 0x1d5   : > { %1981 = vmatmul.mubr.bf16.gmra.mrb[40].mxu1 %v5008_v43  ;;  %v5104_v43 = vld [vmem:[%s5837_s18 + $0x340] ss:$16 sps:$4 sm:$0xff]  }
 0x1d6   : > { %2334 = vmatmul.mubr.bf16.gmra.mrb[40].mxu0 %v5009_v44  ;;  %1990 = vmatprep.mubr.bf16.mxu1 %v5010_v45  ;;  %v5105_v44 = vld [vmem:[%s5837_s18 + $0x348] ss:$16 sps:$4 sm:$0xff]   ;;  %v5106_v45 = vld [vmem:[%s5837_s18 + $0x364] ss:$16 sps:$4 sm:$0xff]  }
 0x1d7   : > { %2343 = vmatprep.mubr.bf16.mxu0 %v5012_v46  ;;  %v5108_v46 = vld [vmem:[%s5837_s18 + $0x36c] ss:$16 sps:$4 sm:$0xff]  }
 0x1dd   : > { %1991 = vmatmul.mubr.bf16.gmra.mrb[44].mxu1 %v5014_v47 }
 0x1de   : > { %2344 = vmatmul.mubr.bf16.gmra.mrb[44].mxu0 %v5015_v48  ;;  %2000 = vmatprep.mubr.bf16.mxu1 %v5016_v49  ;;  %v568_v48 = vld [vmem:[#allocation2] sm:$0xff] }
 0x1df   : > { %2353 = vmatprep.mubr.bf16.mxu0 %v5018_v50  ;;  %v5110_v50 = vld [vmem:[%s5837_s18 + $0x360] ss:$16 sps:$4 sm:$0xff]  }
 0x1e5   : > { %2001 = vmatmul.mubr.bf16.gmra.mrb[48].mxu1 %v5020_v51 }
 0x1e6   : > { %2354 = vmatmul.mubr.bf16.gmra.mrb[48].mxu0 %v5021_v52  ;;  %2010 = vmatprep.mubr.bf16.mxu1 %v5022_v53  ;;  %v569_v53 = vld [vmem:[#allocation2 + $0x8] sm:$0xff] }
 0x1e7   : > { %2363 = vmatprep.mubr.bf16.mxu0 %v5024_v54 }
 0x1ed   : > { %2011 = vmatmul.mubr.bf16.gmra.mrb[52].mxu1 %v5026_v55  ;;  %v570_v55 = vld [vmem:[#allocation2 + $0x10] sm:$0xff] }
 0x1ee   : > { %2364 = vmatmul.mubr.bf16.gmra.mrb[52].mxu0 %v5027_v56  ;;  %2020 = vmatprep.mubr.bf16.mxu1 %v5028_v57  ;;  %v5111_v56 = vld [vmem:[%s5837_s18 + $0x368] ss:$16 sps:$4 sm:$0xff]  }
 0x1ef   : > { %2373 = vmatprep.mubr.bf16.mxu0 %v5030_v58 }
 0x1f5   : > { %2021 = vmatmul.mubr.bf16.gmra.mrb[56].mxu1 %v5032_v59 }
 0x1f6   : > { %2374 = vmatmul.mubr.bf16.gmra.mrb[56].mxu0 %v5033_v60  ;;  %2030 = vmatprep.mubr.bf16.mxu1 %v5034_v61  ;;  %v5112_v60 = vld [vmem:[%s5837_s18 + $0x384] ss:$16 sps:$4 sm:$0xff]   ;;  %v5114_v61 = vld [vmem:[%s5837_s18 + $0x38c] ss:$16 sps:$4 sm:$0xff]  }
 0x1f7   : > { %2383 = vmatprep.mubr.bf16.mxu0 %v5036_v62 }
 0x1fd   : > { %2031 = vmatmul.mubr.bf16.gmra.mrb[60].mxu1 %v5038_v63 }
 0x1fe   : > { %2384 = vmatmul.mubr.bf16.gmra.mrb[60].mxu0 %v5039_v0  ;;  %2040 = vmatprep.mubr.bf16.mxu1 %v5040_v1  ;;  %v571_v1 = vld [vmem:[#allocation2 + $0x18] sm:$0xff] }
 0x1ff   : > { %2393 = vmatprep.mubr.bf16.mxu0 %v5042_v2 }
 0x205   : > { %2041 = vmatmul.mubr.bf16.gmra.mrb[64].mxu1 %v5044_v3 }
 0x206   : > { %2394 = vmatmul.mubr.bf16.gmra.mrb[64].mxu0 %v5045_v4  ;;  %2050 = vmatprep.mubr.bf16.mxu1 %v5046_v5 }
 0x207   : > { %2403 = vmatprep.mubr.bf16.mxu0 %v5048_v6 }
 0x20d   : > { %2051 = vmatmul.mubr.bf16.gmra.mrb[68].mxu1 %v5050_v7 }
 0x20e   : > { %2404 = vmatmul.mubr.bf16.gmra.mrb[68].mxu0 %v5051_v8  ;;  %2060 = vmatprep.mubr.bf16.mxu1 %v5052_v9  ;;  %v572_v8 = vld [vmem:[#allocation2 + $0x20] sm:$0xff] }
 0x20f   : > { %2413 = vmatprep.mubr.bf16.mxu0 %v5054_v10  ;;  %v5116_v10 = vld [vmem:[%s5837_s18 + $0x380] ss:$16 sps:$4 sm:$0xff]  }
 0x215   : > { %2061 = vmatmul.mubr.bf16.gmra.mrb[72].mxu1 %v5056_v11 }
 0x216   : > { %2414 = vmatmul.mubr.bf16.gmra.mrb[72].mxu0 %v5057_v12  ;;  %2070 = vmatprep.mubr.bf16.mxu1 %v5058_v13  ;;  %v573_v13 = vld [vmem:[#allocation2 + $0x28] sm:$0xff] }
 0x217   : > { %2423 = vmatprep.mubr.bf16.mxu0 %v5060_v14 }
 0x21d   : > { %2071 = vmatmul.mubr.bf16.gmra.mrb[76].mxu1 %v5062_v15  ;;  %v574_v15 = vld [vmem:[#allocation2 + $0x30] sm:$0xff] }
 0x21e   : > { %2424 = vmatmul.mubr.bf16.gmra.mrb[76].mxu0 %v5063_v16  ;;  %2080 = vmatprep.mubr.bf16.mxu1 %v5064_v17  ;;  %v5117_v16 = vld [vmem:[%s5837_s18 + $0x388] ss:$16 sps:$4 sm:$0xff]  }
 0x21f   : > { %2433 = vmatprep.mubr.bf16.mxu0 %v5066_v18 }
 0x225   : > { %2081 = vmatmul.mubr.bf16.gmra.mrb[80].mxu1 %v5068_v19 }
 0x226   : > { %2434 = vmatmul.mubr.bf16.gmra.mrb[80].mxu0 %v5069_v20  ;;  %2090 = vmatprep.mubr.bf16.mxu1 %v5070_v21  ;;  %v5118_v20 = vld [vmem:[%s5837_s18 + $0x3a4] ss:$16 sps:$4 sm:$0xff]   ;;  %v5120_v21 = vld [vmem:[%s5837_s18 + $0x3ac] ss:$16 sps:$4 sm:$0xff]  }
 0x227   : > { %2443 = vmatprep.mubr.bf16.mxu0 %v5072_v22 }
 0x22d   : > { %2091 = vmatmul.mubr.bf16.gmra.mrb[84].mxu1 %v5074_v23 }
 0x22e   : > { %2444 = vmatmul.mubr.bf16.gmra.mrb[84].mxu0 %v5075_v24  ;;  %2100 = vmatprep.mubr.bf16.mxu1 %v5076_v25  ;;  %v575_v25 = vld [vmem:[#allocation2 + $0x38] sm:$0xff] }
 0x22f   : > { %2453 = vmatprep.mubr.bf16.mxu0 %v5078_v26 }
 0x235   : > { %2101 = vmatmul.mubr.bf16.gmra.mrb[88].mxu1 %v5080_v27 }
 0x236   : > { %2454 = vmatmul.mubr.bf16.gmra.mrb[88].mxu0 %v5081_v28  ;;  %2110 = vmatprep.mubr.bf16.mxu1 %v5082_v29 }
 0x237   : > { %2463 = vmatprep.mubr.bf16.mxu0 %v5084_v30 }
 0x23d   : > { %2111 = vmatmul.mubr.bf16.gmra.mrb[92].mxu1 %v5086_v31 }
 0x23e   : > { %2464 = vmatmul.mubr.bf16.gmra.mrb[92].mxu0 %v5087_v32  ;;  %2120 = vmatprep.mubr.bf16.mxu1 %v5088_v33  ;;  %v576_v32 = vld [vmem:[#allocation2 + $0x40] sm:$0xff] }
 0x23f   : > { %2473 = vmatprep.mubr.bf16.mxu0 %v5090_v34  ;;  %v5122_v34 = vld [vmem:[%s5837_s18 + $0x3a0] ss:$16 sps:$4 sm:$0xff]  }
 0x245   : > { %2121 = vmatmul.mubr.bf16.gmra.mrb[96].mxu1 %v5092_v35 }
 0x246   : > { %2474 = vmatmul.mubr.bf16.gmra.mrb[96].mxu0 %v5093_v36  ;;  %2130 = vmatprep.mubr.bf16.mxu1 %v5094_v37  ;;  %v577_v37 = vld [vmem:[#allocation2 + $0x48] sm:$0xff] }
 0x247   : > { %2483 = vmatprep.mubr.bf16.mxu0 %v5096_v38 }
 0x24d   : > { %2131 = vmatmul.mubr.bf16.gmra.mrb[100].mxu1 %v5098_v39  ;;  %v578_v39 = vld [vmem:[#allocation2 + $0x50] sm:$0xff] }
 0x24e   : > { %2484 = vmatmul.mubr.bf16.gmra.mrb[100].mxu0 %v5099_v40  ;;  %2140 = vmatprep.mubr.bf16.mxu1 %v5100_v41  ;;  %v5123_v40 = vld [vmem:[%s5837_s18 + $0x3a8] ss:$16 sps:$4 sm:$0xff]  }
 0x24f   : > { %2493 = vmatprep.mubr.bf16.mxu0 %v5102_v42 }
 0x255   : > { %2141 = vmatmul.mubr.bf16.gmra.mrb[104].mxu1 %v5104_v43 }
 0x256   : > { %2494 = vmatmul.mubr.bf16.gmra.mrb[104].mxu0 %v5105_v44  ;;  %2150 = vmatprep.mubr.bf16.mxu1 %v5106_v45  ;;  %v5124_v44 = vld [vmem:[%s5837_s18 + $0x3c4] ss:$16 sps:$4 sm:$0xff]   ;;  %v5126_v45 = vld [vmem:[%s5837_s18 + $0x3cc] ss:$16 sps:$4 sm:$0xff]  }
 0x257   : > { %2503 = vmatprep.mubr.bf16.mxu0 %v5108_v46 }
 0x258   : > { %v1882_v47 = vpop.f32.mrb[0].mxu1 }
 0x259   : > { %v2235_v49 = vpop.f32.mrb[0].mxu0  ;;  %v1884_v52 = vpop.f32.mrb[1].mxu1 }
 0x25a   : > { %v2236_v51 = vadd.f32 %v2235_v49, %v1882_v47  ;;  %v2237_v54 = vpop.f32.mrb[1].mxu0  ;;  %v1886_v58 = vpop.f32.mrb[2].mxu1  ;;  %v579_v49 = vld [vmem:[#allocation2 + $0x58] sm:$0xff] }
 0x25b   : > { %v2238_v57 = vadd.f32 %v2237_v54, %v1884_v52  ;;  %v2239_v59 = vpop.f32.mrb[2].mxu0  ;;  %v1888_v0 = vpop.f32.mrb[3].mxu1 }
 0x25c   : > { %v2554_v62 = vadd.f32 %v2236_v51, %v568_v48  ;;  %v2240_v63 = vadd.f32 %v2239_v59, %v1886_v58  ;;  %v2241_v2 = vpop.f32.mrb[3].mxu0  ;;  %v5128_v58 = vld [vmem:[%s5837_s18 + $0x3c0] ss:$16 sps:$4 sm:$0xff]  }
 0x25d   : > { %v2555_v3 = vadd.f32 %v2238_v57, %v569_v53  ;;  %v2242_v4 = vadd.f32 %v2241_v2, %v1888_v0  ;;  %2151 = vmatmul.mubr.bf16.gmra.mrb[108].mxu1 %v5110_v50  ;;  %v5129_v0 = vld [vmem:[%s5837_s18 + $0x3c8] ss:$16 sps:$4 sm:$0xff]  }
 0x25e   : > { %2682 = vst [vmem:[#allocation2] sm:$0xff] %v2554_v62  ;;  %v2556_v5 = vadd.f32 %v2240_v63, %v570_v55  ;;  %2504 = vmatmul.mubr.bf16.gmra.mrb[108].mxu0 %v5111_v56  ;;  %2160 = vmatprep.mubr.bf16.mxu1 %v5112_v60  ;;  %v580_v56 = vld [vmem:[#allocation2 + $0x60] sm:$0xff]  ;;  %v582_v63 = vld [vmem:[#allocation2 + $0x70] sm:$0xff] }
 0x25f   : > { %2683 = vst [vmem:[#allocation2 + $0x8] sm:$0xff] %v2555_v3  ;;  %v2557_v6 = vadd.f32 %v2242_v4, %v571_v1  ;;  %2513 = vmatprep.mubr.bf16.mxu0 %v5114_v61  ;;  %v581_v61 = vld [vmem:[#allocation2 + $0x68] sm:$0xff]  ;;  %v5130_v4 = vld [vmem:[%s5837_s18 + $0x3e4] ss:$16 sps:$4 sm:$0xff]  }
 0x260   : > { %2684 = vst [vmem:[#allocation2 + $0x10] sm:$0xff] %v2556_v5  ;;  %v1892_v7 = vpop.f32.mrb[4].mxu1  ;;  %v5132_v5 = vld [vmem:[%s5837_s18 + $0x3ec] ss:$16 sps:$4 sm:$0xff]  }
 0x261   : > { %2685 = vst [vmem:[#allocation2 + $0x18] sm:$0xff] %v2557_v6  ;;  %v2245_v9 = vpop.f32.mrb[4].mxu0  ;;  %v1894_v12 = vpop.f32.mrb[5].mxu1 }
 0x262   : > { %v2246_v11 = vadd.f32 %v2245_v9, %v1892_v7  ;;  %v2247_v14 = vpop.f32.mrb[5].mxu0  ;;  %v1896_v18 = vpop.f32.mrb[6].mxu1  ;;  %v583_v9 = vld [vmem:[#allocation2 + $0x78] sm:$0xff] }
 0x263   : > { %v2248_v17 = vadd.f32 %v2247_v14, %v1894_v12  ;;  %v2249_v19 = vpop.f32.mrb[6].mxu0  ;;  %v1898_v24 = vpop.f32.mrb[7].mxu1 }
 0x264   : > { %v2558_v22 = vadd.f32 %v2246_v11, %v572_v8  ;;  %v2250_v23 = vadd.f32 %v2249_v19, %v1896_v18  ;;  %v2251_v26 = vpop.f32.mrb[7].mxu0  ;;  %v585_v18 = vld [vmem:[#allocation2 + $0x88] sm:$0xff] }
 0x265   : > { %v2559_v27 = vadd.f32 %v2248_v17, %v573_v13  ;;  %v2252_v28 = vadd.f32 %v2251_v26, %v1898_v24  ;;  %2161 = vmatmul.mubr.bf16.gmra.mrb[112].mxu1 %v5116_v10  ;;  %v586_v26 = vld [vmem:[#allocation2 + $0x90] sm:$0xff] }
 0x266   : > { %2686 = vst [vmem:[#allocation2 + $0x20] sm:$0xff] %v2558_v22  ;;  %v2560_v29 = vadd.f32 %v2250_v23, %v574_v15  ;;  %2514 = vmatmul.mubr.bf16.gmra.mrb[112].mxu0 %v5117_v16  ;;  %2170 = vmatprep.mubr.bf16.mxu1 %v5118_v20  ;;  %v584_v16 = vld [vmem:[#allocation2 + $0x80] sm:$0xff]  ;;  %v5135_v23 = vld [vmem:[%s5837_s18 + $0x3e8] ss:$16 sps:$4 sm:$0xff]  }
 0x267   : > { %2687 = vst [vmem:[#allocation2 + $0x28] sm:$0xff] %v2559_v27  ;;  %v2561_v30 = vadd.f32 %v2252_v28, %v575_v25  ;;  %2523 = vmatprep.mubr.bf16.mxu0 %v5120_v21  ;;  %v5134_v22 = vld [vmem:[%s5837_s18 + $0x3e0] ss:$16 sps:$4 sm:$0xff]  }
 0x268   : > { %2688 = vst [vmem:[#allocation2 + $0x30] sm:$0xff] %v2560_v29  ;;  %v1902_v31 = vpop.f32.mrb[8].mxu1 }
 0x269   : > { %2689 = vst [vmem:[#allocation2 + $0x38] sm:$0xff] %v2561_v30  ;;  %v2255_v33 = vpop.f32.mrb[8].mxu0  ;;  %v1904_v36 = vpop.f32.mrb[9].mxu1 }
 0x26a   : > { %v2256_v35 = vadd.f32 %v2255_v33, %v1902_v31  ;;  %v2257_v38 = vpop.f32.mrb[9].mxu0  ;;  %v1906_v42 = vpop.f32.mrb[10].mxu1  ;;  %v587_v31 = vld [vmem:[#allocation2 + $0x98] sm:$0xff] }
 0x26b   : > { %v2258_v41 = vadd.f32 %v2257_v38, %v1904_v36  ;;  %v2259_v43 = vpop.f32.mrb[10].mxu0  ;;  %v1908_v48 = vpop.f32.mrb[11].mxu1  ;;  %v588_v38 = vld [vmem:[#allocation2 + $0xa0] sm:$0xff] }
 0x26c   : > { %v2562_v46 = vadd.f32 %v2256_v35, %v576_v32  ;;  %v2260_v47 = vadd.f32 %v2259_v43, %v1906_v42  ;;  %v2261_v50 = vpop.f32.mrb[11].mxu0  ;;  %v589_v42 = vld [vmem:[#allocation2 + $0xa8] sm:$0xff] }
 0x26d   : > { %v2563_v51 = vadd.f32 %v2258_v41, %v577_v37  ;;  %v2262_v52 = vadd.f32 %v2261_v50, %v1908_v48  ;;  %2171 = vmatmul.mubr.bf16.gmra.mrb[116].mxu1 %v5122_v34 }
 0x26e   : > { %2690 = vst [vmem:[#allocation2 + $0x40] sm:$0xff] %v2562_v46  ;;  %v2564_v53 = vadd.f32 %v2260_v47, %v578_v39  ;;  %2524 = vmatmul.mubr.bf16.gmra.mrb[116].mxu0 %v5123_v40  ;;  %2180 = vmatprep.mubr.bf16.mxu1 %v5124_v44  ;;  %v590_v46 = vld [vmem:[#allocation2 + $0xb0] sm:$0xff] }
 0x26f   : > { %2691 = vst [vmem:[#allocation2 + $0x48] sm:$0xff] %v2563_v51  ;;  %v2565_v54 = vadd.f32 %v2262_v52, %v579_v49  ;;  %2533 = vmatprep.mubr.bf16.mxu0 %v5126_v45  ;;  %v591_v51 = vld [vmem:[#allocation2 + $0xb8] sm:$0xff] }
 0x270   : > { %2692 = vst [vmem:[#allocation2 + $0x50] sm:$0xff] %v2564_v53  ;;  %v1912_v55 = vpop.f32.mrb[12].mxu1 }
 0x271   : > { %2693 = vst [vmem:[#allocation2 + $0x58] sm:$0xff] %v2565_v54  ;;  %v2265_v57 = vpop.f32.mrb[12].mxu0  ;;  %v1914_v60 = vpop.f32.mrb[13].mxu1 }
 0x272   : > { %v2266_v59 = vadd.f32 %v2265_v57, %v1912_v55  ;;  %v2267_v62 = vpop.f32.mrb[13].mxu0  ;;  %v1916_v2 = vpop.f32.mrb[14].mxu1 }
 0x273   : > { %v2268_v1 = vadd.f32 %v2267_v62, %v1914_v60  ;;  %v2269_v3 = vpop.f32.mrb[14].mxu0  ;;  %v1918_v8 = vpop.f32.mrb[15].mxu1  ;;  %v593_v62 = vld [vmem:[#allocation2 + $0xc8] sm:$0xff] }
 0x274   : > { %v2566_v6 = vadd.f32 %v2266_v59, %v580_v56  ;;  %v2270_v7 = vadd.f32 %v2269_v3, %v1916_v2  ;;  %v2271_v10 = vpop.f32.mrb[15].mxu0  ;;  %v594_v2 = vld [vmem:[#allocation2 + $0xd0] sm:$0xff] }
 0x275   : > { %v2567_v11 = vadd.f32 %v2268_v1, %v581_v61  ;;  %v2272_v12 = vadd.f32 %v2271_v10, %v1918_v8  ;;  %2181 = vmatmul.mubr.bf16.gmra.mrb[120].mxu1 %v5128_v58  ;;  %v592_v58 = vld [vmem:[#allocation2 + $0xc0] sm:$0xff] }
 0x276   : > { %2694 = vst [vmem:[#allocation2 + $0x60] sm:$0xff] %v2566_v6  ;;  %v2568_v13 = vadd.f32 %v2270_v7, %v582_v63  ;;  %2534 = vmatmul.mubr.bf16.gmra.mrb[120].mxu0 %v5129_v0  ;;  %2190 = vmatprep.mubr.bf16.mxu1 %v5130_v4  ;;  %v595_v7 = vld [vmem:[#allocation2 + $0xd8] sm:$0xff] }
 0x277   : > { %2695 = vst [vmem:[#allocation2 + $0x68] sm:$0xff] %v2567_v11  ;;  %v2569_v14 = vadd.f32 %v2272_v12, %v583_v9  ;;  %2543 = vmatprep.mubr.bf16.mxu0 %v5132_v5 }
 0x278   : > { %2696 = vst [vmem:[#allocation2 + $0x70] sm:$0xff] %v2568_v13  ;;  %v1922_v15 = vpop.f32.mrb[16].mxu1 }
 0x279   : > { %2697 = vst [vmem:[#allocation2 + $0x78] sm:$0xff] %v2569_v14  ;;  %v2275_v17 = vpop.f32.mrb[16].mxu0  ;;  %v1924_v20 = vpop.f32.mrb[17].mxu1  ;;  %v596_v14 = vld [vmem:[#allocation2 + $0xe0] sm:$0xff] }
 0x27a   : > { %v2276_v19 = vadd.f32 %v2275_v17, %v1922_v15  ;;  %v2277_v21 = vpop.f32.mrb[17].mxu0  ;;  %v1926_v25 = vpop.f32.mrb[18].mxu1 }
 0x27b   : > { %v2278_v24 = vadd.f32 %v2277_v21, %v1924_v20  ;;  %v2279_v27 = vpop.f32.mrb[18].mxu0  ;;  %v1928_v30 = vpop.f32.mrb[19].mxu1 }
 0x27c   : > { %v2570_v28 = vadd.f32 %v2276_v19, %v584_v16  ;;  %v2280_v29 = vadd.f32 %v2279_v27, %v1926_v25  ;;  %v2281_v32 = vpop.f32.mrb[19].mxu0  ;;  %v599_v27 = vld [vmem:[#allocation2 + $0xf8] sm:$0xff] }
 0x27d   : > { %v2571_v33 = vadd.f32 %v2278_v24, %v585_v18  ;;  %v2282_v34 = vadd.f32 %v2281_v32, %v1928_v30  ;;  %2191 = vmatmul.mubr.bf16.gmra.mrb[124].mxu1 %v5134_v22  ;;  %v597_v18 = vld [vmem:[#allocation2 + $0xe8] sm:$0xff]  ;;  %v598_v22 = vld [vmem:[#allocation2 + $0xf0] sm:$0xff] }
 0x27e   : > { %2698 = vst [vmem:[#allocation2 + $0x80] sm:$0xff] %v2570_v28  ;;  %v2572_v35 = vadd.f32 %v2280_v29, %v586_v26  ;;  %2544 = vmatmul.mubr.bf16.gmra.mrb[124].mxu0 %v5135_v23 }
 0x27f   : > { %2699 = vst [vmem:[#allocation2 + $0x88] sm:$0xff] %v2571_v33  ;;  %v2573_v36 = vadd.f32 %v2282_v34, %v587_v31  ;;  %v600_v34 = vld [vmem:[#allocation2 + $0x100] sm:$0xff] }
 0x280   : > { %2700 = vst [vmem:[#allocation2 + $0x90] sm:$0xff] %v2572_v35  ;;  %v1932_v37 = vpop.f32.mrb[20].mxu1 }
 0x281   : > { %2701 = vst [vmem:[#allocation2 + $0x98] sm:$0xff] %v2573_v36  ;;  %v2285_v39 = vpop.f32.mrb[20].mxu0  ;;  %v1934_v41 = vpop.f32.mrb[21].mxu1 }
 0x282   : > { %v2286_v40 = vadd.f32 %v2285_v39, %v1932_v37  ;;  %v2287_v43 = vpop.f32.mrb[21].mxu0  ;;  %v1936_v45 = vpop.f32.mrb[22].mxu1 }
 0x283   : > { %v2288_v44 = vadd.f32 %v2287_v43, %v1934_v41  ;;  %v2289_v47 = vpop.f32.mrb[22].mxu0  ;;  %v1938_v50 = vpop.f32.mrb[23].mxu1 }
 0x284   : > { %v2574_v48 = vadd.f32 %v2286_v40, %v588_v38  ;;  %v2290_v49 = vadd.f32 %v2289_v47, %v1936_v45  ;;  %v2291_v52 = vpop.f32.mrb[23].mxu0  ;;  %v601_v38 = vld [vmem:[#allocation2 + $0x108] sm:$0xff]  ;;  %v603_v47 = vld [vmem:[#allocation2 + $0x118] sm:$0xff] }
 0x285   : > { %v2575_v53 = vadd.f32 %v2288_v44, %v589_v42  ;;  %v2292_v54 = vadd.f32 %v2291_v52, %v1938_v50  ;;  %v602_v42 = vld [vmem:[#allocation2 + $0x110] sm:$0xff] }
 0x286   : > { %2702 = vst [vmem:[#allocation2 + $0xa0] sm:$0xff] %v2574_v48  ;;  %v2576_v55 = vadd.f32 %v2290_v49, %v590_v46 }
 0x287   : > { %2703 = vst [vmem:[#allocation2 + $0xa8] sm:$0xff] %v2575_v53  ;;  %v2577_v56 = vadd.f32 %v2292_v54, %v591_v51  ;;  %v604_v54 = vld [vmem:[#allocation2 + $0x120] sm:$0xff] }
 0x288   : > { %2704 = vst [vmem:[#allocation2 + $0xb0] sm:$0xff] %v2576_v55  ;;  %v1942_v57 = vpop.f32.mrb[24].mxu1 }
 0x289   : > { %2705 = vst [vmem:[#allocation2 + $0xb8] sm:$0xff] %v2577_v56  ;;  %v2295_v59 = vpop.f32.mrb[24].mxu0  ;;  %v1944_v61 = vpop.f32.mrb[25].mxu1 }
 0x28a   : > { %v2296_v60 = vadd.f32 %v2295_v59, %v1942_v57  ;;  %v2297_v63 = vpop.f32.mrb[25].mxu0  ;;  %v1946_v1 = vpop.f32.mrb[26].mxu1 }
 0x28b   : > { %v2298_v0 = vadd.f32 %v2297_v63, %v1944_v61  ;;  %v2299_v3 = vpop.f32.mrb[26].mxu0  ;;  %v1948_v6 = vpop.f32.mrb[27].mxu1 }
 0x28c   : > { %v2578_v4 = vadd.f32 %v2296_v60, %v592_v58  ;;  %v2300_v5 = vadd.f32 %v2299_v3, %v1946_v1  ;;  %v2301_v8 = vpop.f32.mrb[27].mxu0  ;;  %v605_v58 = vld [vmem:[#allocation2 + $0x128] sm:$0xff]  ;;  %v607_v3 = vld [vmem:[#allocation2 + $0x138] sm:$0xff] }
 0x28d   : > { %v2579_v9 = vadd.f32 %v2298_v0, %v593_v62  ;;  %v2302_v10 = vadd.f32 %v2301_v8, %v1948_v6  ;;  %v606_v62 = vld [vmem:[#allocation2 + $0x130] sm:$0xff] }
 0x28e   : > { %2706 = vst [vmem:[#allocation2 + $0xc0] sm:$0xff] %v2578_v4  ;;  %v2580_v11 = vadd.f32 %v2300_v5, %v594_v2 }
 0x28f   : > { %2707 = vst [vmem:[#allocation2 + $0xc8] sm:$0xff] %v2579_v9  ;;  %v2581_v12 = vadd.f32 %v2302_v10, %v595_v7  ;;  %v608_v10 = vld [vmem:[#allocation2 + $0x140] sm:$0xff] }
 0x290   : > { %2708 = vst [vmem:[#allocation2 + $0xd0] sm:$0xff] %v2580_v11  ;;  %v1952_v13 = vpop.f32.mrb[28].mxu1 }
 0x291   : > { %2709 = vst [vmem:[#allocation2 + $0xd8] sm:$0xff] %v2581_v12  ;;  %v2305_v15 = vpop.f32.mrb[28].mxu0  ;;  %v1954_v17 = vpop.f32.mrb[29].mxu1 }
 0x292   : > { %v2306_v16 = vadd.f32 %v2305_v15, %v1952_v13  ;;  %v2307_v19 = vpop.f32.mrb[29].mxu0  ;;  %v1956_v21 = vpop.f32.mrb[30].mxu1 }
 0x293   : > { %v2308_v20 = vadd.f32 %v2307_v19, %v1954_v17  ;;  %v2309_v23 = vpop.f32.mrb[30].mxu0  ;;  %v1958_v26 = vpop.f32.mrb[31].mxu1 }
 0x294   : > { %v2582_v24 = vadd.f32 %v2306_v16, %v596_v14  ;;  %v2310_v25 = vadd.f32 %v2309_v23, %v1956_v21  ;;  %v2311_v28 = vpop.f32.mrb[31].mxu0  ;;  %v609_v14 = vld [vmem:[#allocation2 + $0x148] sm:$0xff]  ;;  %v611_v23 = vld [vmem:[#allocation2 + $0x158] sm:$0xff] }
 0x295   : > { %v2583_v29 = vadd.f32 %v2308_v20, %v597_v18  ;;  %v2312_v30 = vadd.f32 %v2311_v28, %v1958_v26  ;;  %v610_v18 = vld [vmem:[#allocation2 + $0x150] sm:$0xff] }
 0x296   : > { %2710 = vst [vmem:[#allocation2 + $0xe0] sm:$0xff] %v2582_v24  ;;  %v2584_v31 = vadd.f32 %v2310_v25, %v598_v22 }
 0x297   : > { %2711 = vst [vmem:[#allocation2 + $0xe8] sm:$0xff] %v2583_v29  ;;  %v2585_v32 = vadd.f32 %v2312_v30, %v599_v27  ;;  %v612_v30 = vld [vmem:[#allocation2 + $0x160] sm:$0xff] }
 0x298   : > { %2712 = vst [vmem:[#allocation2 + $0xf0] sm:$0xff] %v2584_v31  ;;  %v1962_v33 = vpop.f32.mrb[32].mxu1 }
 0x299   : > { %2713 = vst [vmem:[#allocation2 + $0xf8] sm:$0xff] %v2585_v32  ;;  %v2315_v35 = vpop.f32.mrb[32].mxu0  ;;  %v1964_v37 = vpop.f32.mrb[33].mxu1 }
 0x29a   : > { %v2316_v36 = vadd.f32 %v2315_v35, %v1962_v33  ;;  %v2317_v39 = vpop.f32.mrb[33].mxu0  ;;  %v1966_v41 = vpop.f32.mrb[34].mxu1 }
 0x29b   : > { %v2318_v40 = vadd.f32 %v2317_v39, %v1964_v37  ;;  %v2319_v43 = vpop.f32.mrb[34].mxu0  ;;  %v1968_v46 = vpop.f32.mrb[35].mxu1 }
 0x29c   : > { %v2586_v44 = vadd.f32 %v2316_v36, %v600_v34  ;;  %v2320_v45 = vadd.f32 %v2319_v43, %v1966_v41  ;;  %v2321_v48 = vpop.f32.mrb[35].mxu0  ;;  %v613_v34 = vld [vmem:[#allocation2 + $0x168] sm:$0xff]  ;;  %v615_v43 = vld [vmem:[#allocation2 + $0x178] sm:$0xff] }
 0x29d   : > { %v2587_v49 = vadd.f32 %v2318_v40, %v601_v38  ;;  %v2322_v50 = vadd.f32 %v2321_v48, %v1968_v46  ;;  %v614_v38 = vld [vmem:[#allocation2 + $0x170] sm:$0xff] }
 0x29e   : > { %2714 = vst [vmem:[#allocation2 + $0x100] sm:$0xff] %v2586_v44  ;;  %v2588_v51 = vadd.f32 %v2320_v45, %v602_v42 }
 0x29f   : > { %2715 = vst [vmem:[#allocation2 + $0x108] sm:$0xff] %v2587_v49  ;;  %v2589_v52 = vadd.f32 %v2322_v50, %v603_v47  ;;  %v616_v50 = vld [vmem:[#allocation2 + $0x180] sm:$0xff] }
 0x2a0   : > { %2716 = vst [vmem:[#allocation2 + $0x110] sm:$0xff] %v2588_v51  ;;  %v1972_v53 = vpop.f32.mrb[36].mxu1 }
 0x2a1   : > { %2717 = vst [vmem:[#allocation2 + $0x118] sm:$0xff] %v2589_v52  ;;  %v2325_v55 = vpop.f32.mrb[36].mxu0  ;;  %v1974_v57 = vpop.f32.mrb[37].mxu1 }
 0x2a2   : > { %v2326_v56 = vadd.f32 %v2325_v55, %v1972_v53  ;;  %v2327_v59 = vpop.f32.mrb[37].mxu0  ;;  %v1976_v61 = vpop.f32.mrb[38].mxu1 }
 0x2a3   : > { %v2328_v60 = vadd.f32 %v2327_v59, %v1974_v57  ;;  %v2329_v63 = vpop.f32.mrb[38].mxu0  ;;  %v1978_v2 = vpop.f32.mrb[39].mxu1 }
 0x2a4   : > { %v2590_v0 = vadd.f32 %v2326_v56, %v604_v54  ;;  %v2330_v1 = vadd.f32 %v2329_v63, %v1976_v61  ;;  %v2331_v4 = vpop.f32.mrb[39].mxu0  ;;  %v617_v54 = vld [vmem:[#allocation2 + $0x188] sm:$0xff]  ;;  %v619_v63 = vld [vmem:[#allocation2 + $0x198] sm:$0xff] }
 0x2a5   : > { %v2591_v5 = vadd.f32 %v2328_v60, %v605_v58  ;;  %v2332_v6 = vadd.f32 %v2331_v4, %v1978_v2  ;;  %v618_v58 = vld [vmem:[#allocation2 + $0x190] sm:$0xff] }
 0x2a6   : > { %2718 = vst [vmem:[#allocation2 + $0x120] sm:$0xff] %v2590_v0  ;;  %v2592_v7 = vadd.f32 %v2330_v1, %v606_v62 }
 0x2a7   : > { %2719 = vst [vmem:[#allocation2 + $0x128] sm:$0xff] %v2591_v5  ;;  %v2593_v8 = vadd.f32 %v2332_v6, %v607_v3  ;;  %v620_v6 = vld [vmem:[#allocation2 + $0x1a0] sm:$0xff] }
 0x2a8   : > { %2720 = vst [vmem:[#allocation2 + $0x130] sm:$0xff] %v2592_v7  ;;  %v1982_v9 = vpop.f32.mrb[40].mxu1 }
 0x2a9   : > { %2721 = vst [vmem:[#allocation2 + $0x138] sm:$0xff] %v2593_v8  ;;  %v2335_v11 = vpop.f32.mrb[40].mxu0  ;;  %v1984_v13 = vpop.f32.mrb[41].mxu1 }
 0x2aa   : > { %v2336_v12 = vadd.f32 %v2335_v11, %v1982_v9  ;;  %v2337_v15 = vpop.f32.mrb[41].mxu0  ;;  %v1986_v17 = vpop.f32.mrb[42].mxu1 }
 0x2ab   : > { %v2338_v16 = vadd.f32 %v2337_v15, %v1984_v13  ;;  %v2339_v19 = vpop.f32.mrb[42].mxu0  ;;  %v1988_v22 = vpop.f32.mrb[43].mxu1 }
 0x2ac   : > { %v2594_v20 = vadd.f32 %v2336_v12, %v608_v10  ;;  %v2340_v21 = vadd.f32 %v2339_v19, %v1986_v17  ;;  %v2341_v24 = vpop.f32.mrb[43].mxu0  ;;  %v621_v10 = vld [vmem:[#allocation2 + $0x1a8] sm:$0xff]  ;;  %v623_v19 = vld [vmem:[#allocation2 + $0x1b8] sm:$0xff] }
 0x2ad   : > { %v2595_v25 = vadd.f32 %v2338_v16, %v609_v14  ;;  %v2342_v26 = vadd.f32 %v2341_v24, %v1988_v22  ;;  %v622_v14 = vld [vmem:[#allocation2 + $0x1b0] sm:$0xff] }
 0x2ae   : > { %2722 = vst [vmem:[#allocation2 + $0x140] sm:$0xff] %v2594_v20  ;;  %v2596_v27 = vadd.f32 %v2340_v21, %v610_v18 }
 0x2af   : > { %2723 = vst [vmem:[#allocation2 + $0x148] sm:$0xff] %v2595_v25  ;;  %v2597_v28 = vadd.f32 %v2342_v26, %v611_v23  ;;  %v624_v26 = vld [vmem:[#allocation2 + $0x1c0] sm:$0xff] }
 0x2b0   : > { %2724 = vst [vmem:[#allocation2 + $0x150] sm:$0xff] %v2596_v27  ;;  %v1992_v29 = vpop.f32.mrb[44].mxu1 }
 0x2b1   : > { %2725 = vst [vmem:[#allocation2 + $0x158] sm:$0xff] %v2597_v28  ;;  %v2345_v31 = vpop.f32.mrb[44].mxu0  ;;  %v1994_v33 = vpop.f32.mrb[45].mxu1 }
 0x2b2   : > { %v2346_v32 = vadd.f32 %v2345_v31, %v1992_v29  ;;  %v2347_v35 = vpop.f32.mrb[45].mxu0  ;;  %v1996_v37 = vpop.f32.mrb[46].mxu1 }
 0x2b3   : > { %v2348_v36 = vadd.f32 %v2347_v35, %v1994_v33  ;;  %v2349_v39 = vpop.f32.mrb[46].mxu0  ;;  %v1998_v42 = vpop.f32.mrb[47].mxu1 }
 0x2b4   : > { %v2598_v40 = vadd.f32 %v2346_v32, %v612_v30  ;;  %v2350_v41 = vadd.f32 %v2349_v39, %v1996_v37  ;;  %v2351_v44 = vpop.f32.mrb[47].mxu0  ;;  %v625_v30 = vld [vmem:[#allocation2 + $0x1c8] sm:$0xff]  ;;  %v627_v39 = vld [vmem:[#allocation2 + $0x1d8] sm:$0xff] }
 0x2b5   : > { %v2599_v45 = vadd.f32 %v2348_v36, %v613_v34  ;;  %v2352_v46 = vadd.f32 %v2351_v44, %v1998_v42  ;;  %v626_v34 = vld [vmem:[#allocation2 + $0x1d0] sm:$0xff] }
 0x2b6   : > { %2726 = vst [vmem:[#allocation2 + $0x160] sm:$0xff] %v2598_v40  ;;  %v2600_v47 = vadd.f32 %v2350_v41, %v614_v38 }
 0x2b7   : > { %2727 = vst [vmem:[#allocation2 + $0x168] sm:$0xff] %v2599_v45  ;;  %v2601_v48 = vadd.f32 %v2352_v46, %v615_v43  ;;  %v628_v46 = vld [vmem:[#allocation2 + $0x1e0] sm:$0xff] }
 0x2b8   : > { %2728 = vst [vmem:[#allocation2 + $0x170] sm:$0xff] %v2600_v47  ;;  %v2002_v49 = vpop.f32.mrb[48].mxu1 }
 0x2b9   : > { %2729 = vst [vmem:[#allocation2 + $0x178] sm:$0xff] %v2601_v48  ;;  %v2355_v51 = vpop.f32.mrb[48].mxu0  ;;  %v2004_v53 = vpop.f32.mrb[49].mxu1 }
 0x2ba   : > { %v2356_v52 = vadd.f32 %v2355_v51, %v2002_v49  ;;  %v2357_v55 = vpop.f32.mrb[49].mxu0  ;;  %v2006_v57 = vpop.f32.mrb[50].mxu1 }
 0x2bb   : > { %v2358_v56 = vadd.f32 %v2357_v55, %v2004_v53  ;;  %v2359_v59 = vpop.f32.mrb[50].mxu0  ;;  %v2008_v62 = vpop.f32.mrb[51].mxu1 }
 0x2bc   : > { %v2602_v60 = vadd.f32 %v2356_v52, %v616_v50  ;;  %v2360_v61 = vadd.f32 %v2359_v59, %v2006_v57  ;;  %v2361_v0 = vpop.f32.mrb[51].mxu0  ;;  %v629_v50 = vld [vmem:[#allocation2 + $0x1e8] sm:$0xff]  ;;  %v631_v59 = vld [vmem:[#allocation2 + $0x1f8] sm:$0xff] }
 0x2bd   : > { %v2603_v1 = vadd.f32 %v2358_v56, %v617_v54  ;;  %v2362_v2 = vadd.f32 %v2361_v0, %v2008_v62  ;;  %v630_v54 = vld [vmem:[#allocation2 + $0x1f0] sm:$0xff] }
 0x2be   : > { %2730 = vst [vmem:[#allocation2 + $0x180] sm:$0xff] %v2602_v60  ;;  %v2604_v3 = vadd.f32 %v2360_v61, %v618_v58 }
 0x2bf   : > { %2731 = vst [vmem:[#allocation2 + $0x188] sm:$0xff] %v2603_v1  ;;  %v2605_v4 = vadd.f32 %v2362_v2, %v619_v63  ;;  %v632_v2 = vld [vmem:[#allocation2 + $0x200] sm:$0xff] }
 0x2c0   : > { %2732 = vst [vmem:[#allocation2 + $0x190] sm:$0xff] %v2604_v3  ;;  %v2012_v5 = vpop.f32.mrb[52].mxu1 }
 0x2c1   : > { %2733 = vst [vmem:[#allocation2 + $0x198] sm:$0xff] %v2605_v4  ;;  %v2365_v7 = vpop.f32.mrb[52].mxu0  ;;  %v2014_v9 = vpop.f32.mrb[53].mxu1 }
 0x2c2   : > { %v2366_v8 = vadd.f32 %v2365_v7, %v2012_v5  ;;  %v2367_v11 = vpop.f32.mrb[53].mxu0  ;;  %v2016_v13 = vpop.f32.mrb[54].mxu1 }
 0x2c3   : > { %v2368_v12 = vadd.f32 %v2367_v11, %v2014_v9  ;;  %v2369_v15 = vpop.f32.mrb[54].mxu0  ;;  %v2018_v18 = vpop.f32.mrb[55].mxu1 }
 0x2c4   : > { %v2606_v16 = vadd.f32 %v2366_v8, %v620_v6  ;;  %v2370_v17 = vadd.f32 %v2369_v15, %v2016_v13  ;;  %v2371_v20 = vpop.f32.mrb[55].mxu0  ;;  %v633_v6 = vld [vmem:[#allocation2 + $0x208] sm:$0xff]  ;;  %v635_v15 = vld [vmem:[#allocation2 + $0x218] sm:$0xff] }
 0x2c5   : > { %v2607_v21 = vadd.f32 %v2368_v12, %v621_v10  ;;  %v2372_v22 = vadd.f32 %v2371_v20, %v2018_v18  ;;  %v634_v10 = vld [vmem:[#allocation2 + $0x210] sm:$0xff] }
 0x2c6   : > { %2734 = vst [vmem:[#allocation2 + $0x1a0] sm:$0xff] %v2606_v16  ;;  %v2608_v23 = vadd.f32 %v2370_v17, %v622_v14 }
 0x2c7   : > { %2735 = vst [vmem:[#allocation2 + $0x1a8] sm:$0xff] %v2607_v21  ;;  %v2609_v24 = vadd.f32 %v2372_v22, %v623_v19  ;;  %v636_v22 = vld [vmem:[#allocation2 + $0x220] sm:$0xff] }
 0x2c8   : > { %2736 = vst [vmem:[#allocation2 + $0x1b0] sm:$0xff] %v2608_v23  ;;  %v2022_v25 = vpop.f32.mrb[56].mxu1 }
 0x2c9   : > { %2737 = vst [vmem:[#allocation2 + $0x1b8] sm:$0xff] %v2609_v24  ;;  %v2375_v27 = vpop.f32.mrb[56].mxu0  ;;  %v2024_v29 = vpop.f32.mrb[57].mxu1 }
 0x2ca   : > { %v2376_v28 = vadd.f32 %v2375_v27, %v2022_v25  ;;  %v2377_v31 = vpop.f32.mrb[57].mxu0  ;;  %v2026_v33 = vpop.f32.mrb[58].mxu1 }
 0x2cb   : > { %v2378_v32 = vadd.f32 %v2377_v31, %v2024_v29  ;;  %v2379_v35 = vpop.f32.mrb[58].mxu0  ;;  %v2028_v38 = vpop.f32.mrb[59].mxu1 }
 0x2cc   : > { %v2610_v36 = vadd.f32 %v2376_v28, %v624_v26  ;;  %v2380_v37 = vadd.f32 %v2379_v35, %v2026_v33  ;;  %v2381_v40 = vpop.f32.mrb[59].mxu0  ;;  %v637_v26 = vld [vmem:[#allocation2 + $0x228] sm:$0xff]  ;;  %v639_v35 = vld [vmem:[#allocation2 + $0x238] sm:$0xff] }
 0x2cd   : > { %v2611_v41 = vadd.f32 %v2378_v32, %v625_v30  ;;  %v2382_v42 = vadd.f32 %v2381_v40, %v2028_v38  ;;  %v638_v30 = vld [vmem:[#allocation2 + $0x230] sm:$0xff] }
 0x2ce   : > { %2738 = vst [vmem:[#allocation2 + $0x1c0] sm:$0xff] %v2610_v36  ;;  %v2612_v43 = vadd.f32 %v2380_v37, %v626_v34 }
 0x2cf   : > { %2739 = vst [vmem:[#allocation2 + $0x1c8] sm:$0xff] %v2611_v41  ;;  %v2613_v44 = vadd.f32 %v2382_v42, %v627_v39  ;;  %v640_v42 = vld [vmem:[#allocation2 + $0x240] sm:$0xff] }
 0x2d0   : > { %2740 = vst [vmem:[#allocation2 + $0x1d0] sm:$0xff] %v2612_v43  ;;  %v2032_v45 = vpop.f32.mrb[60].mxu1 }
 0x2d1   : > { %2741 = vst [vmem:[#allocation2 + $0x1d8] sm:$0xff] %v2613_v44  ;;  %v2385_v47 = vpop.f32.mrb[60].mxu0  ;;  %v2034_v49 = vpop.f32.mrb[61].mxu1 }
 0x2d2   : > { %v2386_v48 = vadd.f32 %v2385_v47, %v2032_v45  ;;  %v2387_v51 = vpop.f32.mrb[61].mxu0  ;;  %v2036_v53 = vpop.f32.mrb[62].mxu1 }
 0x2d3   : > { %v2388_v52 = vadd.f32 %v2387_v51, %v2034_v49  ;;  %v2389_v55 = vpop.f32.mrb[62].mxu0  ;;  %v2038_v58 = vpop.f32.mrb[63].mxu1 }
 0x2d4   : > { %v2614_v56 = vadd.f32 %v2386_v48, %v628_v46  ;;  %v2390_v57 = vadd.f32 %v2389_v55, %v2036_v53  ;;  %v2391_v60 = vpop.f32.mrb[63].mxu0  ;;  %v641_v46 = vld [vmem:[#allocation2 + $0x248] sm:$0xff]  ;;  %v643_v55 = vld [vmem:[#allocation2 + $0x258] sm:$0xff] }
 0x2d5   : > { %v2615_v61 = vadd.f32 %v2388_v52, %v629_v50  ;;  %v2392_v62 = vadd.f32 %v2391_v60, %v2038_v58  ;;  %v642_v50 = vld [vmem:[#allocation2 + $0x250] sm:$0xff] }
 0x2d6   : > { %2742 = vst [vmem:[#allocation2 + $0x1e0] sm:$0xff] %v2614_v56  ;;  %v2616_v63 = vadd.f32 %v2390_v57, %v630_v54 }
 0x2d7   : > { %2743 = vst [vmem:[#allocation2 + $0x1e8] sm:$0xff] %v2615_v61  ;;  %v2617_v0 = vadd.f32 %v2392_v62, %v631_v59  ;;  %v644_v62 = vld [vmem:[#allocation2 + $0x260] sm:$0xff] }
 0x2d8   : > { %2744 = vst [vmem:[#allocation2 + $0x1f0] sm:$0xff] %v2616_v63  ;;  %v2042_v1 = vpop.f32.mrb[64].mxu1 }
 0x2d9   : > { %2745 = vst [vmem:[#allocation2 + $0x1f8] sm:$0xff] %v2617_v0  ;;  %v2395_v3 = vpop.f32.mrb[64].mxu0  ;;  %v2044_v5 = vpop.f32.mrb[65].mxu1 }
 0x2da   : > { %v2396_v4 = vadd.f32 %v2395_v3, %v2042_v1  ;;  %v2397_v7 = vpop.f32.mrb[65].mxu0  ;;  %v2046_v9 = vpop.f32.mrb[66].mxu1 }
 0x2db   : > { %v2398_v8 = vadd.f32 %v2397_v7, %v2044_v5  ;;  %v2399_v11 = vpop.f32.mrb[66].mxu0  ;;  %v2048_v14 = vpop.f32.mrb[67].mxu1 }
 0x2dc   : > { %v2618_v12 = vadd.f32 %v2396_v4, %v632_v2  ;;  %v2400_v13 = vadd.f32 %v2399_v11, %v2046_v9  ;;  %v2401_v16 = vpop.f32.mrb[67].mxu0  ;;  %v645_v2 = vld [vmem:[#allocation2 + $0x268] sm:$0xff]  ;;  %v647_v11 = vld [vmem:[#allocation2 + $0x278] sm:$0xff] }
 0x2dd   : > { %v2619_v17 = vadd.f32 %v2398_v8, %v633_v6  ;;  %v2402_v18 = vadd.f32 %v2401_v16, %v2048_v14  ;;  %v646_v6 = vld [vmem:[#allocation2 + $0x270] sm:$0xff] }
 0x2de   : > { %2746 = vst [vmem:[#allocation2 + $0x200] sm:$0xff] %v2618_v12  ;;  %v2620_v19 = vadd.f32 %v2400_v13, %v634_v10 }
 0x2df   : > { %2747 = vst [vmem:[#allocation2 + $0x208] sm:$0xff] %v2619_v17  ;;  %v2621_v20 = vadd.f32 %v2402_v18, %v635_v15  ;;  %v648_v18 = vld [vmem:[#allocation2 + $0x280] sm:$0xff] }
 0x2e0   : > { %2748 = vst [vmem:[#allocation2 + $0x210] sm:$0xff] %v2620_v19  ;;  %v2052_v21 = vpop.f32.mrb[68].mxu1 }
 0x2e1   : > { %2749 = vst [vmem:[#allocation2 + $0x218] sm:$0xff] %v2621_v20  ;;  %v2405_v23 = vpop.f32.mrb[68].mxu0  ;;  %v2054_v25 = vpop.f32.mrb[69].mxu1 }
 0x2e2   : > { %v2406_v24 = vadd.f32 %v2405_v23, %v2052_v21  ;;  %v2407_v27 = vpop.f32.mrb[69].mxu0  ;;  %v2056_v29 = vpop.f32.mrb[70].mxu1 }
 0x2e3   : > { %v2408_v28 = vadd.f32 %v2407_v27, %v2054_v25  ;;  %v2409_v31 = vpop.f32.mrb[70].mxu0  ;;  %v2058_v34 = vpop.f32.mrb[71].mxu1 }
 0x2e4   : > { %v2622_v32 = vadd.f32 %v2406_v24, %v636_v22  ;;  %v2410_v33 = vadd.f32 %v2409_v31, %v2056_v29  ;;  %v2411_v36 = vpop.f32.mrb[71].mxu0  ;;  %v649_v22 = vld [vmem:[#allocation2 + $0x288] sm:$0xff]  ;;  %v651_v31 = vld [vmem:[#allocation2 + $0x298] sm:$0xff] }
 0x2e5   : > { %v2623_v37 = vadd.f32 %v2408_v28, %v637_v26  ;;  %v2412_v38 = vadd.f32 %v2411_v36, %v2058_v34  ;;  %v650_v26 = vld [vmem:[#allocation2 + $0x290] sm:$0xff] }
 0x2e6   : > { %2750 = vst [vmem:[#allocation2 + $0x220] sm:$0xff] %v2622_v32  ;;  %v2624_v39 = vadd.f32 %v2410_v33, %v638_v30 }
 0x2e7   : > { %2751 = vst [vmem:[#allocation2 + $0x228] sm:$0xff] %v2623_v37  ;;  %v2625_v40 = vadd.f32 %v2412_v38, %v639_v35  ;;  %v652_v38 = vld [vmem:[#allocation2 + $0x2a0] sm:$0xff] }
 0x2e8   : > { %2752 = vst [vmem:[#allocation2 + $0x230] sm:$0xff] %v2624_v39  ;;  %v2062_v41 = vpop.f32.mrb[72].mxu1 }
 0x2e9   : > { %2753 = vst [vmem:[#allocation2 + $0x238] sm:$0xff] %v2625_v40  ;;  %v2415_v43 = vpop.f32.mrb[72].mxu0  ;;  %v2064_v45 = vpop.f32.mrb[73].mxu1 }
 0x2ea   : > { %v2416_v44 = vadd.f32 %v2415_v43, %v2062_v41  ;;  %v2417_v47 = vpop.f32.mrb[73].mxu0  ;;  %v2066_v49 = vpop.f32.mrb[74].mxu1 }
 0x2eb   : > { %v2418_v48 = vadd.f32 %v2417_v47, %v2064_v45  ;;  %v2419_v51 = vpop.f32.mrb[74].mxu0  ;;  %v2068_v54 = vpop.f32.mrb[75].mxu1 }
 0x2ec   : > { %v2626_v52 = vadd.f32 %v2416_v44, %v640_v42  ;;  %v2420_v53 = vadd.f32 %v2419_v51, %v2066_v49  ;;  %v2421_v56 = vpop.f32.mrb[75].mxu0  ;;  %v653_v42 = vld [vmem:[#allocation2 + $0x2a8] sm:$0xff]  ;;  %v655_v51 = vld [vmem:[#allocation2 + $0x2b8] sm:$0xff] }
 0x2ed   : > { %v2627_v57 = vadd.f32 %v2418_v48, %v641_v46  ;;  %v2422_v58 = vadd.f32 %v2421_v56, %v2068_v54  ;;  %v654_v46 = vld [vmem:[#allocation2 + $0x2b0] sm:$0xff] }
 0x2ee   : > { %2754 = vst [vmem:[#allocation2 + $0x240] sm:$0xff] %v2626_v52  ;;  %v2628_v59 = vadd.f32 %v2420_v53, %v642_v50 }
 0x2ef   : > { %2755 = vst [vmem:[#allocation2 + $0x248] sm:$0xff] %v2627_v57  ;;  %v2629_v60 = vadd.f32 %v2422_v58, %v643_v55  ;;  %v656_v58 = vld [vmem:[#allocation2 + $0x2c0] sm:$0xff] }
 0x2f0   : > { %2756 = vst [vmem:[#allocation2 + $0x250] sm:$0xff] %v2628_v59  ;;  %v2072_v61 = vpop.f32.mrb[76].mxu1 }
 0x2f1   : > { %2757 = vst [vmem:[#allocation2 + $0x258] sm:$0xff] %v2629_v60  ;;  %v2425_v63 = vpop.f32.mrb[76].mxu0  ;;  %v2074_v1 = vpop.f32.mrb[77].mxu1 }
 0x2f2   : > { %v2426_v0 = vadd.f32 %v2425_v63, %v2072_v61  ;;  %v2427_v3 = vpop.f32.mrb[77].mxu0  ;;  %v2076_v5 = vpop.f32.mrb[78].mxu1 }
 0x2f3   : > { %v2428_v4 = vadd.f32 %v2427_v3, %v2074_v1  ;;  %v2429_v7 = vpop.f32.mrb[78].mxu0  ;;  %v2078_v10 = vpop.f32.mrb[79].mxu1 }
 0x2f4   : > { %v2630_v8 = vadd.f32 %v2426_v0, %v644_v62  ;;  %v2430_v9 = vadd.f32 %v2429_v7, %v2076_v5  ;;  %v2431_v12 = vpop.f32.mrb[79].mxu0  ;;  %v657_v62 = vld [vmem:[#allocation2 + $0x2c8] sm:$0xff]  ;;  %v659_v7 = vld [vmem:[#allocation2 + $0x2d8] sm:$0xff] }
 0x2f5   : > { %v2631_v13 = vadd.f32 %v2428_v4, %v645_v2  ;;  %v2432_v14 = vadd.f32 %v2431_v12, %v2078_v10  ;;  %v658_v2 = vld [vmem:[#allocation2 + $0x2d0] sm:$0xff] }
 0x2f6   : > { %2758 = vst [vmem:[#allocation2 + $0x260] sm:$0xff] %v2630_v8  ;;  %v2632_v15 = vadd.f32 %v2430_v9, %v646_v6 }
 0x2f7   : > { %2759 = vst [vmem:[#allocation2 + $0x268] sm:$0xff] %v2631_v13  ;;  %v2633_v16 = vadd.f32 %v2432_v14, %v647_v11  ;;  %v660_v14 = vld [vmem:[#allocation2 + $0x2e0] sm:$0xff] }
 0x2f8   : > { %2760 = vst [vmem:[#allocation2 + $0x270] sm:$0xff] %v2632_v15  ;;  %v2082_v17 = vpop.f32.mrb[80].mxu1 }
 0x2f9   : > { %2761 = vst [vmem:[#allocation2 + $0x278] sm:$0xff] %v2633_v16  ;;  %v2435_v19 = vpop.f32.mrb[80].mxu0  ;;  %v2084_v21 = vpop.f32.mrb[81].mxu1 }
 0x2fa   : > { %v2436_v20 = vadd.f32 %v2435_v19, %v2082_v17  ;;  %v2437_v23 = vpop.f32.mrb[81].mxu0  ;;  %v2086_v25 = vpop.f32.mrb[82].mxu1 }
 0x2fb   : > { %v2438_v24 = vadd.f32 %v2437_v23, %v2084_v21  ;;  %v2439_v27 = vpop.f32.mrb[82].mxu0  ;;  %v2088_v30 = vpop.f32.mrb[83].mxu1 }
 0x2fc   : > { %v2634_v28 = vadd.f32 %v2436_v20, %v648_v18  ;;  %v2440_v29 = vadd.f32 %v2439_v27, %v2086_v25  ;;  %v2441_v32 = vpop.f32.mrb[83].mxu0  ;;  %v661_v18 = vld [vmem:[#allocation2 + $0x2e8] sm:$0xff]  ;;  %v663_v27 = vld [vmem:[#allocation2 + $0x2f8] sm:$0xff] }
 0x2fd   : > { %v2635_v33 = vadd.f32 %v2438_v24, %v649_v22  ;;  %v2442_v34 = vadd.f32 %v2441_v32, %v2088_v30  ;;  %v662_v22 = vld [vmem:[#allocation2 + $0x2f0] sm:$0xff] }
 0x2fe   : > { %2762 = vst [vmem:[#allocation2 + $0x280] sm:$0xff] %v2634_v28  ;;  %v2636_v35 = vadd.f32 %v2440_v29, %v650_v26 }
 0x2ff   : > { %2763 = vst [vmem:[#allocation2 + $0x288] sm:$0xff] %v2635_v33  ;;  %v2637_v36 = vadd.f32 %v2442_v34, %v651_v31  ;;  %v664_v34 = vld [vmem:[#allocation2 + $0x300] sm:$0xff] }
 0x300   : > { %2764 = vst [vmem:[#allocation2 + $0x290] sm:$0xff] %v2636_v35  ;;  %v2092_v37 = vpop.f32.mrb[84].mxu1 }
 0x301   : > { %2765 = vst [vmem:[#allocation2 + $0x298] sm:$0xff] %v2637_v36  ;;  %v2445_v39 = vpop.f32.mrb[84].mxu0  ;;  %v2094_v41 = vpop.f32.mrb[85].mxu1 }
 0x302   : > { %v2446_v40 = vadd.f32 %v2445_v39, %v2092_v37  ;;  %v2447_v43 = vpop.f32.mrb[85].mxu0  ;;  %v2096_v45 = vpop.f32.mrb[86].mxu1 }
 0x303   : > { %v2448_v44 = vadd.f32 %v2447_v43, %v2094_v41  ;;  %v2449_v47 = vpop.f32.mrb[86].mxu0  ;;  %v2098_v50 = vpop.f32.mrb[87].mxu1 }
 0x304   : > { %v2638_v48 = vadd.f32 %v2446_v40, %v652_v38  ;;  %v2450_v49 = vadd.f32 %v2449_v47, %v2096_v45  ;;  %v2451_v52 = vpop.f32.mrb[87].mxu0  ;;  %v665_v38 = vld [vmem:[#allocation2 + $0x308] sm:$0xff]  ;;  %v667_v47 = vld [vmem:[#allocation2 + $0x318] sm:$0xff] }
 0x305   : > { %v2639_v53 = vadd.f32 %v2448_v44, %v653_v42  ;;  %v2452_v54 = vadd.f32 %v2451_v52, %v2098_v50  ;;  %v666_v42 = vld [vmem:[#allocation2 + $0x310] sm:$0xff] }
 0x306   : > { %2766 = vst [vmem:[#allocation2 + $0x2a0] sm:$0xff] %v2638_v48  ;;  %v2640_v55 = vadd.f32 %v2450_v49, %v654_v46 }
 0x307   : > { %2767 = vst [vmem:[#allocation2 + $0x2a8] sm:$0xff] %v2639_v53  ;;  %v2641_v56 = vadd.f32 %v2452_v54, %v655_v51  ;;  %v668_v54 = vld [vmem:[#allocation2 + $0x320] sm:$0xff] }
 0x308   : > { %2768 = vst [vmem:[#allocation2 + $0x2b0] sm:$0xff] %v2640_v55  ;;  %v2102_v57 = vpop.f32.mrb[88].mxu1 }
 0x309   : > { %2769 = vst [vmem:[#allocation2 + $0x2b8] sm:$0xff] %v2641_v56  ;;  %v2455_v59 = vpop.f32.mrb[88].mxu0  ;;  %v2104_v61 = vpop.f32.mrb[89].mxu1 }
 0x30a   : > { %v2456_v60 = vadd.f32 %v2455_v59, %v2102_v57  ;;  %v2457_v63 = vpop.f32.mrb[89].mxu0  ;;  %v2106_v1 = vpop.f32.mrb[90].mxu1 }
 0x30b   : > { %v2458_v0 = vadd.f32 %v2457_v63, %v2104_v61  ;;  %v2459_v3 = vpop.f32.mrb[90].mxu0  ;;  %v2108_v6 = vpop.f32.mrb[91].mxu1 }
 0x30c   : > { %v2642_v4 = vadd.f32 %v2456_v60, %v656_v58  ;;  %v2460_v5 = vadd.f32 %v2459_v3, %v2106_v1  ;;  %v2461_v8 = vpop.f32.mrb[91].mxu0  ;;  %v669_v58 = vld [vmem:[#allocation2 + $0x328] sm:$0xff]  ;;  %v671_v3 = vld [vmem:[#allocation2 + $0x338] sm:$0xff] }
 0x30d   : > { %v2643_v9 = vadd.f32 %v2458_v0, %v657_v62  ;;  %v2462_v10 = vadd.f32 %v2461_v8, %v2108_v6  ;;  %v670_v62 = vld [vmem:[#allocation2 + $0x330] sm:$0xff] }
 0x30e   : > { %2770 = vst [vmem:[#allocation2 + $0x2c0] sm:$0xff] %v2642_v4  ;;  %v2644_v11 = vadd.f32 %v2460_v5, %v658_v2 }
 0x30f   : > { %2771 = vst [vmem:[#allocation2 + $0x2c8] sm:$0xff] %v2643_v9  ;;  %v2645_v12 = vadd.f32 %v2462_v10, %v659_v7  ;;  %v672_v10 = vld [vmem:[#allocation2 + $0x340] sm:$0xff] }
 0x310   : > { %2772 = vst [vmem:[#allocation2 + $0x2d0] sm:$0xff] %v2644_v11  ;;  %v2112_v13 = vpop.f32.mrb[92].mxu1 }
 0x311   : > { %2773 = vst [vmem:[#allocation2 + $0x2d8] sm:$0xff] %v2645_v12  ;;  %v2465_v15 = vpop.f32.mrb[92].mxu0  ;;  %v2114_v17 = vpop.f32.mrb[93].mxu1 }
 0x312   : > { %v2466_v16 = vadd.f32 %v2465_v15, %v2112_v13  ;;  %v2467_v19 = vpop.f32.mrb[93].mxu0  ;;  %v2116_v21 = vpop.f32.mrb[94].mxu1 }
 0x313   : > { %v2468_v20 = vadd.f32 %v2467_v19, %v2114_v17  ;;  %v2469_v23 = vpop.f32.mrb[94].mxu0  ;;  %v2118_v26 = vpop.f32.mrb[95].mxu1 }
 0x314   : > { %v2646_v24 = vadd.f32 %v2466_v16, %v660_v14  ;;  %v2470_v25 = vadd.f32 %v2469_v23, %v2116_v21  ;;  %v2471_v28 = vpop.f32.mrb[95].mxu0  ;;  %v673_v14 = vld [vmem:[#allocation2 + $0x348] sm:$0xff]  ;;  %v675_v23 = vld [vmem:[#allocation2 + $0x358] sm:$0xff] }
 0x315   : > { %v2647_v29 = vadd.f32 %v2468_v20, %v661_v18  ;;  %v2472_v30 = vadd.f32 %v2471_v28, %v2118_v26  ;;  %v674_v18 = vld [vmem:[#allocation2 + $0x350] sm:$0xff] }
 0x316   : > { %2774 = vst [vmem:[#allocation2 + $0x2e0] sm:$0xff] %v2646_v24  ;;  %v2648_v31 = vadd.f32 %v2470_v25, %v662_v22 }
 0x317   : > { %2775 = vst [vmem:[#allocation2 + $0x2e8] sm:$0xff] %v2647_v29  ;;  %v2649_v32 = vadd.f32 %v2472_v30, %v663_v27  ;;  %v676_v30 = vld [vmem:[#allocation2 + $0x360] sm:$0xff] }
 0x318   : > { %2776 = vst [vmem:[#allocation2 + $0x2f0] sm:$0xff] %v2648_v31  ;;  %v2122_v33 = vpop.f32.mrb[96].mxu1 }
 0x319   : > { %2777 = vst [vmem:[#allocation2 + $0x2f8] sm:$0xff] %v2649_v32  ;;  %v2475_v35 = vpop.f32.mrb[96].mxu0  ;;  %v2124_v37 = vpop.f32.mrb[97].mxu1 }
 0x31a   : > { %v2476_v36 = vadd.f32 %v2475_v35, %v2122_v33  ;;  %v2477_v39 = vpop.f32.mrb[97].mxu0  ;;  %v2126_v41 = vpop.f32.mrb[98].mxu1 }
 0x31b   : > { %v2478_v40 = vadd.f32 %v2477_v39, %v2124_v37  ;;  %v2479_v43 = vpop.f32.mrb[98].mxu0  ;;  %v2128_v46 = vpop.f32.mrb[99].mxu1 }
 0x31c   : > { %v2650_v44 = vadd.f32 %v2476_v36, %v664_v34  ;;  %v2480_v45 = vadd.f32 %v2479_v43, %v2126_v41  ;;  %v2481_v48 = vpop.f32.mrb[99].mxu0  ;;  %v677_v34 = vld [vmem:[#allocation2 + $0x368] sm:$0xff]  ;;  %v679_v43 = vld [vmem:[#allocation2 + $0x378] sm:$0xff] }
 0x31d   : > { %v2651_v49 = vadd.f32 %v2478_v40, %v665_v38  ;;  %v2482_v50 = vadd.f32 %v2481_v48, %v2128_v46  ;;  %v678_v38 = vld [vmem:[#allocation2 + $0x370] sm:$0xff] }
 0x31e   : > { %2778 = vst [vmem:[#allocation2 + $0x300] sm:$0xff] %v2650_v44  ;;  %v2652_v51 = vadd.f32 %v2480_v45, %v666_v42 }
 0x31f   : > { %2779 = vst [vmem:[#allocation2 + $0x308] sm:$0xff] %v2651_v49  ;;  %v2653_v52 = vadd.f32 %v2482_v50, %v667_v47  ;;  %v680_v50 = vld [vmem:[#allocation2 + $0x380] sm:$0xff] }
 0x320   : > { %2780 = vst [vmem:[#allocation2 + $0x310] sm:$0xff] %v2652_v51  ;;  %v2132_v53 = vpop.f32.mrb[100].mxu1 }
 0x321   : > { %2781 = vst [vmem:[#allocation2 + $0x318] sm:$0xff] %v2653_v52  ;;  %v2485_v55 = vpop.f32.mrb[100].mxu0  ;;  %v2134_v57 = vpop.f32.mrb[101].mxu1 }
 0x322   : > { %v2486_v56 = vadd.f32 %v2485_v55, %v2132_v53  ;;  %v2487_v59 = vpop.f32.mrb[101].mxu0  ;;  %v2136_v61 = vpop.f32.mrb[102].mxu1 }
 0x323   : > { %v2488_v60 = vadd.f32 %v2487_v59, %v2134_v57  ;;  %v2489_v63 = vpop.f32.mrb[102].mxu0  ;;  %v2138_v2 = vpop.f32.mrb[103].mxu1 }
 0x324   : > { %v2654_v0 = vadd.f32 %v2486_v56, %v668_v54  ;;  %v2490_v1 = vadd.f32 %v2489_v63, %v2136_v61  ;;  %v2491_v4 = vpop.f32.mrb[103].mxu0  ;;  %v681_v54 = vld [vmem:[#allocation2 + $0x388] sm:$0xff]  ;;  %v683_v63 = vld [vmem:[#allocation2 + $0x398] sm:$0xff] }
 0x325   : > { %v2655_v5 = vadd.f32 %v2488_v60, %v669_v58  ;;  %v2492_v6 = vadd.f32 %v2491_v4, %v2138_v2  ;;  %v682_v58 = vld [vmem:[#allocation2 + $0x390] sm:$0xff] }
 0x326   : > { %2782 = vst [vmem:[#allocation2 + $0x320] sm:$0xff] %v2654_v0  ;;  %v2656_v7 = vadd.f32 %v2490_v1, %v670_v62 }
 0x327   : > { %2783 = vst [vmem:[#allocation2 + $0x328] sm:$0xff] %v2655_v5  ;;  %v2657_v8 = vadd.f32 %v2492_v6, %v671_v3  ;;  %v684_v6 = vld [vmem:[#allocation2 + $0x3a0] sm:$0xff] }
 0x328   : > { %2784 = vst [vmem:[#allocation2 + $0x330] sm:$0xff] %v2656_v7  ;;  %v2142_v9 = vpop.f32.mrb[104].mxu1 }
 0x329   : > { %2785 = vst [vmem:[#allocation2 + $0x338] sm:$0xff] %v2657_v8  ;;  %v2495_v11 = vpop.f32.mrb[104].mxu0  ;;  %v2144_v13 = vpop.f32.mrb[105].mxu1 }
 0x32a   : > { %v2496_v12 = vadd.f32 %v2495_v11, %v2142_v9  ;;  %v2497_v15 = vpop.f32.mrb[105].mxu0  ;;  %v2146_v17 = vpop.f32.mrb[106].mxu1 }
 0x32b   : > { %v2498_v16 = vadd.f32 %v2497_v15, %v2144_v13  ;;  %v2499_v19 = vpop.f32.mrb[106].mxu0  ;;  %v2148_v22 = vpop.f32.mrb[107].mxu1 }
 0x32c   : > { %v2658_v20 = vadd.f32 %v2496_v12, %v672_v10  ;;  %v2500_v21 = vadd.f32 %v2499_v19, %v2146_v17  ;;  %v2501_v24 = vpop.f32.mrb[107].mxu0  ;;  %v685_v10 = vld [vmem:[#allocation2 + $0x3a8] sm:$0xff]  ;;  %v687_v19 = vld [vmem:[#allocation2 + $0x3b8] sm:$0xff] }
 0x32d   : > { %v2659_v25 = vadd.f32 %v2498_v16, %v673_v14  ;;  %v2502_v26 = vadd.f32 %v2501_v24, %v2148_v22  ;;  %v686_v14 = vld [vmem:[#allocation2 + $0x3b0] sm:$0xff] }
 0x32e   : > { %2786 = vst [vmem:[#allocation2 + $0x340] sm:$0xff] %v2658_v20  ;;  %v2660_v27 = vadd.f32 %v2500_v21, %v674_v18 }
 0x32f   : > { %2787 = vst [vmem:[#allocation2 + $0x348] sm:$0xff] %v2659_v25  ;;  %v2661_v28 = vadd.f32 %v2502_v26, %v675_v23  ;;  %v688_v26 = vld [vmem:[#allocation2 + $0x3c0] sm:$0xff] }
 0x330   : > { %2788 = vst [vmem:[#allocation2 + $0x350] sm:$0xff] %v2660_v27  ;;  %v2152_v29 = vpop.f32.mrb[108].mxu1 }
 0x331   : > { %2789 = vst [vmem:[#allocation2 + $0x358] sm:$0xff] %v2661_v28  ;;  %v2505_v31 = vpop.f32.mrb[108].mxu0  ;;  %v2154_v33 = vpop.f32.mrb[109].mxu1 }
 0x332   : > { %v2506_v32 = vadd.f32 %v2505_v31, %v2152_v29  ;;  %v2507_v35 = vpop.f32.mrb[109].mxu0  ;;  %v2156_v37 = vpop.f32.mrb[110].mxu1 }
 0x333   : > { %v2508_v36 = vadd.f32 %v2507_v35, %v2154_v33  ;;  %v2509_v39 = vpop.f32.mrb[110].mxu0  ;;  %v2158_v42 = vpop.f32.mrb[111].mxu1 }
 0x334   : > { %v2662_v40 = vadd.f32 %v2506_v32, %v676_v30  ;;  %v2510_v41 = vadd.f32 %v2509_v39, %v2156_v37  ;;  %v2511_v44 = vpop.f32.mrb[111].mxu0  ;;  %v689_v30 = vld [vmem:[#allocation2 + $0x3c8] sm:$0xff]  ;;  %v691_v39 = vld [vmem:[#allocation2 + $0x3d8] sm:$0xff] }
 0x335   : > { %v2663_v45 = vadd.f32 %v2508_v36, %v677_v34  ;;  %v2512_v46 = vadd.f32 %v2511_v44, %v2158_v42  ;;  %v690_v34 = vld [vmem:[#allocation2 + $0x3d0] sm:$0xff] }
 0x336   : > { %2790 = vst [vmem:[#allocation2 + $0x360] sm:$0xff] %v2662_v40  ;;  %v2664_v47 = vadd.f32 %v2510_v41, %v678_v38 }
 0x337   : > { %2791 = vst [vmem:[#allocation2 + $0x368] sm:$0xff] %v2663_v45  ;;  %v2665_v48 = vadd.f32 %v2512_v46, %v679_v43  ;;  %v692_v46 = vld [vmem:[#allocation2 + $0x3e0] sm:$0xff] }
 0x338   : > { %2792 = vst [vmem:[#allocation2 + $0x370] sm:$0xff] %v2664_v47  ;;  %v2162_v49 = vpop.f32.mrb[112].mxu1 }
 0x339   : > { %2793 = vst [vmem:[#allocation2 + $0x378] sm:$0xff] %v2665_v48  ;;  %v2515_v51 = vpop.f32.mrb[112].mxu0  ;;  %v2164_v53 = vpop.f32.mrb[113].mxu1 }
 0x33a   : > { %v2516_v52 = vadd.f32 %v2515_v51, %v2162_v49  ;;  %v2517_v55 = vpop.f32.mrb[113].mxu0  ;;  %v2166_v57 = vpop.f32.mrb[114].mxu1 }
 0x33b   : > { %v2518_v56 = vadd.f32 %v2517_v55, %v2164_v53  ;;  %v2519_v59 = vpop.f32.mrb[114].mxu0  ;;  %v2168_v62 = vpop.f32.mrb[115].mxu1 }
 0x33c   : > { %v2666_v60 = vadd.f32 %v2516_v52, %v680_v50  ;;  %v2520_v61 = vadd.f32 %v2519_v59, %v2166_v57  ;;  %v2521_v0 = vpop.f32.mrb[115].mxu0  ;;  %v693_v50 = vld [vmem:[#allocation2 + $0x3e8] sm:$0xff]  ;;  %v695_v59 = vld [vmem:[#allocation2 + $0x3f8] sm:$0xff] }
 0x33d   : > { %v2667_v1 = vadd.f32 %v2518_v56, %v681_v54  ;;  %v2522_v2 = vadd.f32 %v2521_v0, %v2168_v62  ;;  %v694_v54 = vld [vmem:[#allocation2 + $0x3f0] sm:$0xff] }
 0x33e   : > { %2794 = vst [vmem:[#allocation2 + $0x380] sm:$0xff] %v2666_v60  ;;  %v2668_v3 = vadd.f32 %v2520_v61, %v682_v58 }
 0x33f   : > { %2795 = vst [vmem:[#allocation2 + $0x388] sm:$0xff] %v2667_v1  ;;  %v2669_v4 = vadd.f32 %v2522_v2, %v683_v63  ;;  %v2942_v1 = vld [vmem:[#allocation8] sm:$0x3] (!%p4417_p5)  ;;  %v2945_v2 = vlaneseq (!%p4417_p5) }
 0x340   : > { %2796 = vst [vmem:[#allocation2 + $0x390] sm:$0xff] %v2668_v3  ;;  %v2172_v5 = vpop.f32.mrb[116].mxu1  ;;  %v6192_v3 = vld [vmem:[%s5861_s24] sm:$0xff] (!%p4417_p5) }
 0x341   : > { %2797 = vst [vmem:[#allocation2 + $0x398] sm:$0xff] %v2669_v4  ;;  %v2525_v7 = vpop.f32.mrb[116].mxu0  ;;  %v2174_v9 = vpop.f32.mrb[117].mxu1  ;;  %v2943_v4 = vunpack.c.l.bf16 (!%p4417_p5), %v2942_v1 }
 0x342   : > { %v2526_v8 = vadd.f32 %v2525_v7, %v2172_v5  ;;  %v2527_v11 = vpop.f32.mrb[117].mxu0  ;;  %v2176_v13 = vpop.f32.mrb[118].mxu1  ;;  %v2946_v5 = vshrl.u32 (!%p4417_p5), %v2945_v2, 7  ;;  %v3155_v7 = vunpack.c.l.bf16 (!%p4417_p5), %v6192_v3 }
 0x343   : > { %v2528_v12 = vadd.f32 %v2527_v11, %v2174_v9  ;;  %v2529_v15 = vpop.f32.mrb[118].mxu0  ;;  %v2178_v18 = vpop.f32.mrb[119].mxu1  ;;  %v3156_v11 = vunpack.c.h.bf16 (!%p4417_p5), %v6192_v3 }
 0x344   : > { %v2670_v16 = vadd.f32 %v2526_v8, %v684_v6  ;;  %v2530_v17 = vadd.f32 %v2529_v15, %v2176_v13  ;;  %v2531_v20 = vpop.f32.mrb[119].mxu0  ;;  %v6195_v6 = vld [vmem:[%s5861_s24 + $0x8] sm:$0xff] (!%p4417_p5)  ;;  %v6199_v8 = vld [vmem:[%s5861_s24 + $0x10] sm:$0xff] (!%p4417_p5)  ;;  %v2947_v9 = vsub.s32 (!%p4417_p5), 0, %v2946_v5  ;;  %v3291_v13 = vsub.s32 (!%p4417_p5), 1, %v2946_v5  ;;  %v2814_v15 = vld [vmem:[#allocation2] sm:$0xff] (!%p4417_p5) }
 0x345   : > { %v2671_v21 = vadd.f32 %v2528_v12, %v685_v10  ;;  %v2532_v22 = vadd.f32 %v2531_v20, %v2178_v18  ;;  %v2951_v10 = vsub.s32 (!%p4417_p5), 2, %v2946_v5  ;;  %v3283_v12 = vld [vmem:[#allocation9] sm:$0x3] (!%p4417_p5)  ;;  %v3158_v18 = vunpack.c.h.bf16 (!%p4417_p5), %v6195_v6  ;;  %v2824_v5 = vld [vmem:[#allocation2 + $0x50] sm:$0xff] (!%p4417_p5) }
 0x346   : > { %2798 = vst [vmem:[#allocation2 + $0x3a0] sm:$0xff] %v2670_v16  ;;  %v2672_v23 = vadd.f32 %v2530_v17, %v686_v14  ;;  %v3094_v14 = vld [vmem:[%s5861_s24 + $0x18] sm:$0xff] (!%p4417_p5)  ;;  %v2815_v16 = vld [vmem:[#allocation2 + $0x8] sm:$0xff] (!%p4417_p5)  ;;  %v3157_v17 = vunpack.c.l.bf16 (!%p4417_p5), %v6195_v6  ;;  %v3160_v20 = vunpack.c.h.bf16 (!%p4417_p5), %v6199_v8 }
 0x347   : > { %2799 = vst [vmem:[#allocation2 + $0x3a8] sm:$0xff] %v2671_v21  ;;  %v2673_v24 = vadd.f32 %v2532_v22, %v687_v19  ;;  %v3159_v19 = vunpack.c.l.bf16 (!%p4417_p5), %v6199_v8  ;;  %v6208_v21 = vld [vmem:[%s5861_s24 + $0x20] sm:$0xff] (!%p4417_p5)  ;;  %v2948_v22 = vrot.slane (!%p4417_p5), %v2943_v4, %v2947_v9  ;;  %v2825_v6 = vld [vmem:[#allocation2 + $0x58] sm:$0xff] (!%p4417_p5) }
 0x348   : > { %2800 = vst [vmem:[#allocation2 + $0x3b0] sm:$0xff] %v2672_v23  ;;  %v2182_v25 = vpop.f32.mrb[120].mxu1  ;;  %v2952_v23 = vrot.slane (!%p4417_p5), %v2943_v4, %v2951_v10 }
 0x349   : > { %2801 = vst [vmem:[#allocation2 + $0x3b8] sm:$0xff] %v2673_v24  ;;  %v2535_v27 = vpop.f32.mrb[120].mxu0  ;;  %v2184_v29 = vpop.f32.mrb[121].mxu1  ;;  %v2816_v24 = vld [vmem:[#allocation2 + $0x10] sm:$0xff] (!%p4417_p5) }
 0x34a   : > { %v2536_v28 = vadd.f32 %v2535_v27, %v2182_v25  ;;  %v2537_v31 = vpop.f32.mrb[121].mxu0  ;;  %v2186_v33 = vpop.f32.mrb[122].mxu1  ;;  %v2817_v25 = vld [vmem:[#allocation2 + $0x18] sm:$0xff] (!%p4417_p5)  ;;  %v3162_v27 = vunpack.c.h.bf16 (!%p4417_p5), %v3094_v14 }
 0x34b   : > { %v2538_v32 = vadd.f32 %v2537_v31, %v2184_v29  ;;  %v2539_v35 = vpop.f32.mrb[122].mxu0  ;;  %v2188_v38 = vpop.f32.mrb[123].mxu1  ;;  %v6213_v29 = vrot.slane (!%p4417_p5), %v3283_v12, %v2947_v9  ;;  %v2818_v31 = vld [vmem:[#allocation2 + $0x20] sm:$0xff] (!%p4417_p5) }
 0x34c   : > { %v2674_v36 = vadd.f32 %v2536_v28, %v688_v26  ;;  %v2540_v37 = vadd.f32 %v2539_v35, %v2186_v33  ;;  %v2541_v40 = vpop.f32.mrb[123].mxu0  ;;  %v3161_v26 = vunpack.c.l.bf16 (!%p4417_p5), %v3094_v14  ;;  %v6211_v28 = vld [vmem:[%s5861_s24 + $0x28] sm:$0xff] (!%p4417_p5)  ;;  %v3163_v33 = vunpack.c.l.bf16 (!%p4417_p5), %v6208_v21  ;;  %v6220_v35 = vld [vmem:[%s5861_s24 + $0x30] sm:$0xff] (!%p4417_p5) }
 0x34d   : > { %v2675_v41 = vadd.f32 %v2538_v32, %v689_v30  ;;  %v2542_v42 = vadd.f32 %v2541_v40, %v2188_v38  ;;  %v6215_v30 = vrot.slane (!%p4417_p5), %v3283_v12, %v3291_v13  ;;  %v2819_v32 = vld [vmem:[#allocation2 + $0x28] sm:$0xff] (!%p4417_p5)  ;;  %v2820_v38 = vld [vmem:[#allocation2 + $0x30] sm:$0xff] (!%p4417_p5)  ;;  %v3165_v40 = vunpack.c.l.bf16 (!%p4417_p5), %v6211_v28  ;;  %v2826_v13 = vld [vmem:[#allocation2 + $0x60] sm:$0xff] (!%p4417_p5) }
 0x34e   : > { %2802 = vst [vmem:[#allocation2 + $0x3c0] sm:$0xff] %v2674_v36  ;;  %v2676_v43 = vadd.f32 %v2540_v37, %v690_v34  ;;  %v3164_v34 = vunpack.c.h.bf16 (!%p4417_p5), %v6208_v21  ;;  %v6222_v36 = vrot.slane (!%p4417_p5), %v2948_v22, %v2947_v9  ;;  %v6224_v37 = vrot.slane (!%p4417_p5), %v2952_v23, %v2947_v9  ;;  %v2827_v14 = vld [vmem:[#allocation2 + $0x68] sm:$0xff] (!%p4417_p5) }
 0x34f   : > { %2803 = vst [vmem:[#allocation2 + $0x3c8] sm:$0xff] %v2675_v41  ;;  %v2677_v44 = vadd.f32 %v2542_v42, %v691_v39  ;;  %v2821_v39 = vld [vmem:[#allocation2 + $0x38] sm:$0xff] (!%p4417_p5)  ;;  %v3166_v41 = vunpack.c.h.bf16 (!%p4417_p5), %v6211_v28 }
 0x350   : > { %2804 = vst [vmem:[#allocation2 + $0x3d0] sm:$0xff] %v2676_v43  ;;  %v2192_v45 = vpop.f32.mrb[124].mxu1  ;;  %v6229_v42 = vld [vmem:[%s5861_s24 + $0x38] sm:$0xff] (!%p4417_p5)  ;;  %v3167_v43 = vunpack.c.l.bf16 (!%p4417_p5), %v6220_v35 }
 0x351   : > { %2805 = vst [vmem:[#allocation2 + $0x3d8] sm:$0xff] %v2677_v44  ;;  %v2545_v47 = vpop.f32.mrb[124].mxu0  ;;  %v2194_v49 = vpop.f32.mrb[125].mxu1  ;;  %v3168_v44 = vunpack.c.h.bf16 (!%p4417_p5), %v6220_v35 }
 0x352   : > { %v2546_v48 = vadd.f32 %v2545_v47, %v2192_v45  ;;  %v2547_v51 = vpop.f32.mrb[125].mxu0  ;;  %v2196_v53 = vpop.f32.mrb[126].mxu1  ;;  %v3169_v45 = vunpack.c.l.bf16 (!%p4417_p5), %v6229_v42  ;;  %v2963_v47 = vadd.f32 (!%p4417_p5), %v6222_v36, %v2814_v15 }
 0x353   : > { %v2548_v52 = vadd.f32 %v2547_v51, %v2194_v49  ;;  %v2549_v55 = vpop.f32.mrb[126].mxu0  ;;  %v2198_v58 = vpop.f32.mrb[127].mxu1  ;;  %2813 = sbr.rel (%p4417_p5) target bundleno = 999 (0x3e7), region = 68  ;;  %v2965_v49 = vadd.f32 (!%p4417_p5), %v6222_v36, %v2816_v24  ;;  %v2967_v51 = vadd.f32 (!%p4417_p5), %v6222_v36, %v2818_v31 }
 0x354   : > { %v2678_v56 = vadd.f32 %v2546_v48, %v692_v46  ;;  %v2550_v57 = vadd.f32 %v2549_v55, %v2196_v53  ;;  %v2551_v60 = vpop.f32.mrb[127].mxu0  ;;  %v3170_v46 = vunpack.c.h.bf16 (!%p4417_p5), %v6229_v42  ;;  %v2964_v48 = vadd.f32 (!%p4417_p5), %v6224_v37, %v2815_v16 }
 0x355   : > { %v2679_v61 = vadd.f32 %v2548_v52, %v693_v50  ;;  %v2552_v62 = vadd.f32 %v2551_v60, %v2198_v58  ;;  %v2966_v50 = vadd.f32 (!%p4417_p5), %v6224_v37, %v2817_v25  ;;  %v2968_v52 = vadd.f32 (!%p4417_p5), %v6224_v37, %v2819_v32 }
 0x356   : > { %2806 = vst [vmem:[#allocation2 + $0x3e0] sm:$0xff] %v2678_v56  ;;  %v2680_v63 = vadd.f32 %v2550_v57, %v694_v54  ;;  %v2969_v53 = vadd.f32 (!%p4417_p5), %v6222_v36, %v2820_v38  ;;  %v2970_v54 = vadd.f32 (!%p4417_p5), %v6224_v37, %v2821_v39  ;;  %v3295_v55 = vmul.f32 (!%p4417_p5), %v6213_v29, %v2963_v47  ;;  %v2830_v47 = vld [vmem:[#allocation2 + $0x80] sm:$0xff] (!%p4417_p5) }
 0x357   : > { %2807 = vst [vmem:[#allocation2 + $0x3e8] sm:$0xff] %v2679_v61  ;;  %v2681_v0 = vadd.f32 %v2552_v62, %v695_v59  ;;  %v3296_v56 = vmul.f32 (!%p4417_p5), %v6215_v30, %v2964_v48  ;;  %v3297_v57 = vmul.f32 (!%p4417_p5), %v6213_v29, %v2965_v49  ;;  %v3298_v58 = vmul.f32 (!%p4417_p5), %v6215_v30, %v2966_v50 }
 0x358   : > { %2808 = vst [vmem:[#allocation2 + $0x3f0] sm:$0xff] %v2680_v63  ;;  %v3299_v59 = vmul.f32 (!%p4417_p5), %v6213_v29, %v2967_v51  ;;  %v3300_v60 = vmul.f32 (!%p4417_p5), %v6215_v30, %v2968_v52  ;;  %v3301_v61 = vmul.f32 (!%p4417_p5), %v6213_v29, %v2969_v53  ;;  %v3302_v62 = vmul.f32 (!%p4417_p5), %v6215_v30, %v2970_v54  ;;  %v2822_v63 = vld [vmem:[#allocation2 + $0x40] sm:$0xff] (!%p4417_p5)  ;;  %v2831_v52 = vld [vmem:[#allocation2 + $0x88] sm:$0xff] (!%p4417_p5) }
 0x359   : > { %2809 = vst [vmem:[#allocation2 + $0x3f8] sm:$0xff] %v2681_v0  ;;  %v2823_v0 = vld [vmem:[#allocation2 + $0x48] sm:$0xff] (!%p4417_p5)  ;;  %v3423_v1 = vadd.f32 (!%p4417_p5), %v3295_v55, %v3155_v7  ;;  %v3424_v2 = vadd.f32 (!%p4417_p5), %v3296_v56, %v3156_v11  ;;  %v3425_v3 = vadd.f32 (!%p4417_p5), %v3297_v57, %v3157_v17  ;;  %v3426_v4 = vadd.f32 (!%p4417_p5), %v3298_v58, %v3158_v18  ;;  %v2828_v11 = vld [vmem:[#allocation2 + $0x70] sm:$0xff] (!%p4417_p5)  ;;  %v2829_v17 = vld [vmem:[#allocation2 + $0x78] sm:$0xff] (!%p4417_p5) }
 0x35a   : > { %v3427_v8 = vadd.f32 %v3299_v59, %v3159_v19  ;;  %v3428_v9 = vadd.f32 %v3300_v60, %v3160_v20  ;;  %v3429_v10 = vadd.f32 %v3301_v61, %v3161_v26  ;;  %v3430_v12 = vadd.f32 %v3302_v62, %v3162_v27  ;;  %v3099_v56 = vld [vmem:[%s5861_s24 + $0x40] sm:$0xff]  ;;  %v2833_v59 = vld [vmem:[#allocation2 + $0x98] sm:$0xff] }
 0x35b   : > { %v4499_v15 = vpack.c.bf16 %v3424_v2, %v3423_v1  ;;  %v4500_v16 = vpack.c.bf16 %v3426_v4, %v3425_v3  ;;  %v2971_v22 = vadd.f32 %v6222_v36, %v2822_v63  ;;  %v2972_v7 = vadd.f32 %v6224_v37, %v2823_v0  ;;  %v2834_v62 = vld [vmem:[#allocation2 + $0xa0] sm:$0xff]  ;;  %v2835_v1 = vld [vmem:[#allocation2 + $0xa8] sm:$0xff]  ;;  %v3101_v3 = vld [vmem:[%s5861_s24 + $0x50] sm:$0xff] }
 0x35c   : > { %v4501_v18 = vpack.c.bf16 %v3428_v9, %v3427_v8  ;;  %v4502_v23 = vpack.c.bf16 %v3430_v12, %v3429_v10  ;;  %v2973_v19 = vadd.f32 %v6222_v36, %v2824_v5  ;;  %v2974_v20 = vadd.f32 %v6224_v37, %v2825_v6  ;;  %v2836_v4 = vld [vmem:[#allocation2 + $0xb0] sm:$0xff] }
 0x35d   : > { %3935 = vst [vmem:[%s5867_s17] sm:$0xff] %v4499_v15  ;;  %3936 = vst [vmem:[%s5867_s17 + $0x8] sm:$0xff] %v4500_v16  ;;  %v3303_v24 = vmul.f32 %v6213_v29, %v2971_v22  ;;  %v3304_v25 = vmul.f32 %v6215_v30, %v2972_v7  ;;  %v2975_v26 = vadd.f32 %v6222_v36, %v2826_v13  ;;  %v3172_v63 = vunpack.c.h.bf16 %v3099_v56  ;;  %v2837_v15 = vld [vmem:[#allocation2 + $0xb8] sm:$0xff] }
 0x35e   : > { %v2976_v27 = vadd.f32 %v6224_v37, %v2827_v14  ;;  %3937 = vst [vmem:[%s5867_s17 + $0x10] sm:$0xff] %v4501_v18  ;;  %3938 = vst [vmem:[%s5867_s17 + $0x18] sm:$0xff] %v4502_v23  ;;  %v3305_v31 = vmul.f32 %v6213_v29, %v2973_v19  ;;  %v3306_v32 = vmul.f32 %v6215_v30, %v2974_v20  ;;  %v3102_v16 = vld [vmem:[%s5861_s24 + $0x58] sm:$0xff]  ;;  %v3175_v22 = vunpack.c.l.bf16 %v3101_v3 }
 0x35f   : > { %v2977_v38 = vadd.f32 %v6222_v36, %v2828_v11  ;;  %v2978_v39 = vadd.f32 %v6224_v37, %v2829_v17  ;;  %v3431_v48 = vadd.f32 %v3303_v24, %v3163_v33  ;;  %v3432_v49 = vadd.f32 %v3304_v25, %v3164_v34  ;;  %v2838_v18 = vld [vmem:[#allocation2 + $0xc0] sm:$0xff]  ;;  %v2839_v25 = vld [vmem:[#allocation2 + $0xc8] sm:$0xff] }
 0x360   : > { %v3307_v50 = vmul.f32 %v6213_v29, %v2975_v26  ;;  %v3308_v51 = vmul.f32 %v6215_v30, %v2976_v27  ;;  %v3433_v53 = vadd.f32 %v3305_v31, %v3165_v40  ;;  %v3434_v54 = vadd.f32 %v3306_v32, %v3166_v41  ;;  %v2832_v40 = vld [vmem:[#allocation2 + $0x90] sm:$0xff]  ;;  %v3103_v26 = vld [vmem:[%s5861_s24 + $0x60] sm:$0xff] }
 0x361   : > { %v3309_v55 = vmul.f32 %v6213_v29, %v2977_v38  ;;  %v3310_v33 = vmul.f32 %v6215_v30, %v2978_v39  ;;  %v4503_v21 = vpack.c.bf16 %v3432_v49, %v3431_v48  ;;  %v2979_v58 = vadd.f32 %v6222_v36, %v2830_v47  ;;  %v2840_v39 = vld [vmem:[#allocation2 + $0xd0] sm:$0xff] }
 0x362   : > { %v3435_v34 = vadd.f32 %v3307_v50, %v3167_v43  ;;  %v3436_v57 = vadd.f32 %v3308_v51, %v3168_v44  ;;  %v4504_v28 = vpack.c.bf16 %v3434_v54, %v3433_v53  ;;  %v2980_v61 = vadd.f32 %v6224_v37, %v2831_v52  ;;  %v3100_v43 = vld [vmem:[%s5861_s24 + $0x48] sm:$0xff]  ;;  %v2841_v51 = vld [vmem:[#allocation2 + $0xd8] sm:$0xff] }
 0x363   : > { %v3437_v41 = vadd.f32 %v3309_v55, %v3169_v45  ;;  %v3438_v60 = vadd.f32 %v3310_v33, %v3170_v46  ;;  %3939 = vst [vmem:[%s5867_s17 + $0x20] sm:$0xff] %v4503_v21  ;;  %v3171_v44 = vunpack.c.l.bf16 %v3099_v56  ;;  %v3311_v0 = vmul.f32 %v6213_v29, %v2979_v58  ;;  %v3104_v52 = vld [vmem:[%s5861_s24 + $0x68] sm:$0xff]  ;;  %v2842_v56 = vld [vmem:[#allocation2 + $0xe0] sm:$0xff] }
 0x364   : > { %v4505_v35 = vpack.c.bf16 %v3436_v57, %v3435_v34  ;;  %3940 = vst [vmem:[%s5867_s17 + $0x28] sm:$0xff] %v4504_v28  ;;  %v3312_v45 = vmul.f32 %v6215_v30, %v2980_v61  ;;  %v2981_v42 = vadd.f32 %v6222_v36, %v2832_v40  ;;  %v2982_v46 = vadd.f32 %v6224_v37, %v2833_v59  ;;  %v2843_v40 = vld [vmem:[#allocation2 + $0xe8] sm:$0xff]  ;;  %v3105_v61 = vld [vmem:[%s5861_s24 + $0x70] sm:$0xff] }
 0x365   : > { %v4506_v2 = vpack.c.bf16 %v3438_v60, %v3437_v41  ;;  %v3439_v5 = vadd.f32 %v3311_v0, %v3171_v44  ;;  %v3173_v6 = vunpack.c.l.bf16 %v3100_v43  ;;  %v3174_v8 = vunpack.c.h.bf16 %v3100_v43 }
 0x366   : > { %3941 = vst [vmem:[%s5867_s17 + $0x30] sm:$0xff] %v4505_v35  ;;  %v2983_v9 = vadd.f32 %v6222_v36, %v2834_v62  ;;  %v3440_v10 = vadd.f32 %v3312_v45, %v3172_v63  ;;  %v3313_v12 = vmul.f32 %v6213_v29, %v2981_v42  ;;  %v3314_v13 = vmul.f32 %v6215_v30, %v2982_v46  ;;  %v2844_v63 = vld [vmem:[#allocation2 + $0xf0] sm:$0xff]  ;;  %v2845_v42 = vld [vmem:[#allocation2 + $0xf8] sm:$0xff] }
 0x367   : > { %3942 = vst [vmem:[%s5867_s17 + $0x38] sm:$0xff] %v4506_v2  ;;  %v2984_v14 = vadd.f32 %v6224_v37, %v2835_v1  ;;  %v3176_v7 = vunpack.c.h.bf16 %v3101_v3  ;;  %v2985_v17 = vadd.f32 %v6222_v36, %v2836_v4  ;;  %v2986_v31 = vadd.f32 %v6224_v37, %v2837_v15  ;;  %v3106_v46 = vld [vmem:[%s5861_s24 + $0x78] sm:$0xff]  ;;  %v3107_v15 = vld [vmem:[%s5861_s24 + $0x80] sm:$0xff] }
 0x368   : > { %v3315_v11 = vmul.f32 %v6213_v29, %v2983_v9  ;;  %v4507_v23 = vpack.c.bf16 %v3440_v10, %v3439_v5  ;;  %v3441_v19 = vadd.f32 %v3313_v12, %v3173_v6  ;;  %v3442_v20 = vadd.f32 %v3314_v13, %v3174_v8  ;;  %v2846_v8 = vld [vmem:[#allocation2 + $0x100] sm:$0xff] }
 0x369   : > { %v3316_v24 = vmul.f32 %v6215_v30, %v2984_v14  ;;  %v3177_v32 = vunpack.c.l.bf16 %v3102_v16  ;;  %v3178_v38 = vunpack.c.h.bf16 %v3102_v16  ;;  %v3317_v49 = vmul.f32 %v6213_v29, %v2985_v17  ;;  %v2847_v14 = vld [vmem:[#allocation2 + $0x108] sm:$0xff]  ;;  %v2848_v17 = vld [vmem:[#allocation2 + $0x110] sm:$0xff] }
 0x36a   : > { %v3443_v27 = vadd.f32 %v3315_v11, %v3175_v22  ;;  %3943 = vst [vmem:[%s5867_s17 + $0x40] sm:$0xff] %v4507_v23  ;;  %v4508_v47 = vpack.c.bf16 %v3442_v20, %v3441_v19  ;;  %v2987_v50 = vadd.f32 %v6222_v36, %v2838_v18  ;;  %v3318_v53 = vmul.f32 %v6215_v30, %v2986_v31 }
 0x36b   : > { %v3444_v48 = vadd.f32 %v3316_v24, %v3176_v7  ;;  %v2988_v54 = vadd.f32 %v6224_v37, %v2839_v25  ;;  %v3179_v55 = vunpack.c.l.bf16 %v3103_v26  ;;  %v3180_v33 = vunpack.c.h.bf16 %v3103_v26  ;;  %v2849_v24 = vld [vmem:[#allocation2 + $0x118] sm:$0xff]  ;;  %v3108_v25 = vld [vmem:[%s5861_s24 + $0x88] sm:$0xff] }
 0x36c   : > { %3944 = vst [vmem:[%s5867_s17 + $0x48] sm:$0xff] %v4508_v47  ;;  %v3445_v34 = vadd.f32 %v3317_v49, %v3177_v32  ;;  %v3319_v57 = vmul.f32 %v6213_v29, %v2987_v50  ;;  %v2989_v58 = vadd.f32 %v6222_v36, %v2840_v39  ;;  %v3446_v59 = vadd.f32 %v3318_v53, %v3178_v38  ;;  %v2850_v38 = vld [vmem:[#allocation2 + $0x120] sm:$0xff]  ;;  %v2851_v50 = vld [vmem:[#allocation2 + $0x128] sm:$0xff] }
 0x36d   : > { %v4509_v21 = vpack.c.bf16 %v3444_v48, %v3443_v27  ;;  %v3320_v28 = vmul.f32 %v6215_v30, %v2988_v54  ;;  %v2990_v41 = vadd.f32 %v6224_v37, %v2841_v51  ;;  %v3181_v60 = vunpack.c.l.bf16 %v3104_v52 }
 0x36e   : > { %v3447_v43 = vadd.f32 %v3319_v57, %v3179_v55  ;;  %v3182_v62 = vunpack.c.h.bf16 %v3104_v52  ;;  %v3321_v35 = vmul.f32 %v6213_v29, %v2989_v58  ;;  %v2991_v44 = vadd.f32 %v6222_v36, %v2842_v56  ;;  %v3109_v55 = vld [vmem:[%s5861_s24 + $0x90] sm:$0xff] }
 0x36f   : > { %3945 = vst [vmem:[%s5867_s17 + $0x50] sm:$0xff] %v4509_v21  ;;  %v4510_v0 = vpack.c.bf16 %v3446_v59, %v3445_v34  ;;  %v3448_v1 = vadd.f32 %v3320_v28, %v3180_v33  ;;  %v3322_v2 = vmul.f32 %v6215_v30, %v2990_v41  ;;  %v2992_v45 = vadd.f32 %v6224_v37, %v2843_v40  ;;  %v2852_v57 = vld [vmem:[#allocation2 + $0x130] sm:$0xff]  ;;  %v2853_v41 = vld [vmem:[#allocation2 + $0x138] sm:$0xff] }
 0x370   : > { %v3449_v3 = vadd.f32 %v3321_v35, %v3181_v60  ;;  %v3183_v4 = vunpack.c.l.bf16 %v3105_v61  ;;  %v3184_v5 = vunpack.c.h.bf16 %v3105_v61  ;;  %v3323_v6 = vmul.f32 %v6213_v29, %v2991_v44  ;;  %v3110_v60 = vld [vmem:[%s5861_s24 + $0x98] sm:$0xff] }
 0x371   : > { %3946 = vst [vmem:[%s5867_s17 + $0x58] sm:$0xff] %v4510_v0  ;;  %v4511_v9 = vpack.c.bf16 %v3448_v1, %v3447_v43  ;;  %v3450_v10 = vadd.f32 %v3322_v2, %v3182_v62  ;;  %v3324_v12 = vmul.f32 %v6215_v30, %v2992_v45  ;;  %v2993_v13 = vadd.f32 %v6222_v36, %v2844_v63  ;;  %v2854_v44 = vld [vmem:[#allocation2 + $0x140] sm:$0xff]  ;;  %v2855_v45 = vld [vmem:[#allocation2 + $0x148] sm:$0xff] }
 0x372   : > { %v3451_v16 = vadd.f32 %v3323_v6, %v3183_v4  ;;  %v2994_v22 = vadd.f32 %v6224_v37, %v2845_v42  ;;  %v3185_v7 = vunpack.c.l.bf16 %v3106_v46  ;;  %v3186_v11 = vunpack.c.h.bf16 %v3106_v46  ;;  %v3111_v42 = vld [vmem:[%s5861_s24 + $0xa0] sm:$0xff]  ;;  %v2856_v6 = vld [vmem:[#allocation2 + $0x150] sm:$0xff] }
 0x373   : > { %3947 = vst [vmem:[%s5867_s17 + $0x60] sm:$0xff] %v4511_v9  ;;  %v4512_v18 = vpack.c.bf16 %v3450_v10, %v3449_v3  ;;  %v3452_v23 = vadd.f32 %v3324_v12, %v3184_v5  ;;  %v3325_v19 = vmul.f32 %v6213_v29, %v2993_v13  ;;  %v2995_v20 = vadd.f32 %v6222_v36, %v2846_v8  ;;  %v2857_v13 = vld [vmem:[#allocation2 + $0x158] sm:$0xff] }
 0x374   : > { %v3326_v26 = vmul.f32 %v6215_v30, %v2994_v22  ;;  %v2996_v27 = vadd.f32 %v6224_v37, %v2847_v14  ;;  %v3187_v31 = vunpack.c.l.bf16 %v3107_v15  ;;  %v3188_v32 = vunpack.c.h.bf16 %v3107_v15  ;;  %v3112_v14 = vld [vmem:[%s5861_s24 + $0xa8] sm:$0xff] }
 0x375   : > { %3948 = vst [vmem:[%s5867_s17 + $0x68] sm:$0xff] %v4512_v18  ;;  %v4513_v39 = vpack.c.bf16 %v3452_v23, %v3451_v16  ;;  %v3453_v47 = vadd.f32 %v3325_v19, %v3185_v7  ;;  %v3327_v48 = vmul.f32 %v6213_v29, %v2995_v20  ;;  %v2997_v49 = vadd.f32 %v6222_v36, %v2848_v17  ;;  %v2859_v20 = vld [vmem:[#allocation2 + $0x168] sm:$0xff] }
 0x376   : > { %v3454_v51 = vadd.f32 %v3326_v26, %v3186_v11  ;;  %v3328_v52 = vmul.f32 %v6215_v30, %v2996_v27  ;;  %v2998_v53 = vadd.f32 %v6224_v37, %v2849_v24  ;;  %v3189_v54 = vunpack.c.l.bf16 %v3108_v25  ;;  %v2858_v11 = vld [vmem:[#allocation2 + $0x160] sm:$0xff] }
 0x377   : > { %3949 = vst [vmem:[%s5867_s17 + $0x70] sm:$0xff] %v4513_v39  ;;  %v3455_v33 = vadd.f32 %v3327_v48, %v3187_v31  ;;  %v3190_v56 = vunpack.c.h.bf16 %v3108_v25  ;;  %v3329_v21 = vmul.f32 %v6213_v29, %v2997_v49  ;;  %v2999_v34 = vadd.f32 %v6222_v36, %v2850_v38  ;;  %v3113_v31 = vld [vmem:[%s5861_s24 + $0xb0] sm:$0xff] }
 0x378   : > { %v4514_v58 = vpack.c.bf16 %v3454_v51, %v3453_v47  ;;  %v3456_v40 = vadd.f32 %v3328_v52, %v3188_v32  ;;  %v3330_v59 = vmul.f32 %v6215_v30, %v2998_v53  ;;  %v3000_v28 = vadd.f32 %v6224_v37, %v2851_v50  ;;  %v2860_v48 = vld [vmem:[#allocation2 + $0x170] sm:$0xff]  ;;  %v2861_v53 = vld [vmem:[#allocation2 + $0x178] sm:$0xff] }
 0x379   : > { %v3457_v61 = vadd.f32 %v3329_v21, %v3189_v54  ;;  %v3191_v43 = vunpack.c.l.bf16 %v3109_v55  ;;  %v3192_v62 = vunpack.c.h.bf16 %v3109_v55  ;;  %v3331_v35 = vmul.f32 %v6213_v29, %v2999_v34  ;;  %v3114_v54 = vld [vmem:[%s5861_s24 + $0xb8] sm:$0xff] }
 0x37a   : > { %3950 = vst [vmem:[%s5867_s17 + $0x78] sm:$0xff] %v4514_v58  ;;  %v4515_v63 = vpack.c.bf16 %v3456_v40, %v3455_v33  ;;  %v3458_v0 = vadd.f32 %v3330_v59, %v3190_v56  ;;  %v3332_v1 = vmul.f32 %v6215_v30, %v3000_v28  ;;  %v3001_v2 = vadd.f32 %v6222_v36, %v2852_v57  ;;  %v2862_v34 = vld [vmem:[#allocation2 + $0x180] sm:$0xff]  ;;  %v2863_v28 = vld [vmem:[#allocation2 + $0x188] sm:$0xff] }
 0x37b   : > { %v3459_v46 = vadd.f32 %v3331_v35, %v3191_v43  ;;  %v3002_v3 = vadd.f32 %v6224_v37, %v2853_v41  ;;  %v3193_v4 = vunpack.c.l.bf16 %v3110_v60  ;;  %v3194_v5 = vunpack.c.h.bf16 %v3110_v60  ;;  %v3115_v41 = vld [vmem:[%s5861_s24 + $0xc0] sm:$0xff]  ;;  %v2864_v35 = vld [vmem:[#allocation2 + $0x190] sm:$0xff] }
 0x37c   : > { %3951 = vst [vmem:[%s5867_s17 + $0x80] sm:$0xff] %v4515_v63  ;;  %v4516_v8 = vpack.c.bf16 %v3458_v0, %v3457_v61  ;;  %v3460_v9 = vadd.f32 %v3332_v1, %v3192_v62  ;;  %v3333_v10 = vmul.f32 %v6213_v29, %v3001_v2  ;;  %v3003_v12 = vadd.f32 %v6222_v36, %v2854_v44  ;;  %v2865_v2 = vld [vmem:[#allocation2 + $0x198] sm:$0xff] }
 0x37d   : > { %v3334_v15 = vmul.f32 %v6215_v30, %v3002_v3  ;;  %v3004_v16 = vadd.f32 %v6224_v37, %v2855_v45  ;;  %v3195_v22 = vunpack.c.l.bf16 %v3111_v42  ;;  %v3196_v7 = vunpack.c.h.bf16 %v3111_v42  ;;  %v3116_v45 = vld [vmem:[%s5861_s24 + $0xc8] sm:$0xff] }
 0x37e   : > { %3952 = vst [vmem:[%s5867_s17 + $0x88] sm:$0xff] %v4516_v8  ;;  %v4517_v17 = vpack.c.bf16 %v3460_v9, %v3459_v46  ;;  %v3461_v18 = vadd.f32 %v3333_v10, %v3193_v4  ;;  %v3335_v23 = vmul.f32 %v6213_v29, %v3003_v12  ;;  %v3005_v19 = vadd.f32 %v6222_v36, %v2856_v6  ;;  %v2867_v12 = vld [vmem:[#allocation2 + $0x1a8] sm:$0xff] }
 0x37f   : > { %v3462_v24 = vadd.f32 %v3334_v15, %v3194_v5  ;;  %v3336_v25 = vmul.f32 %v6215_v30, %v3004_v16  ;;  %v3006_v26 = vadd.f32 %v6224_v37, %v2857_v13  ;;  %v3197_v27 = vunpack.c.l.bf16 %v3112_v14  ;;  %v2866_v5 = vld [vmem:[#allocation2 + $0x1a0] sm:$0xff] }
 0x380   : > { %3953 = vst [vmem:[%s5867_s17 + $0x90] sm:$0xff] %v4517_v17  ;;  %v3463_v32 = vadd.f32 %v3335_v23, %v3195_v22  ;;  %v3198_v38 = vunpack.c.h.bf16 %v3112_v14  ;;  %v3337_v39 = vmul.f32 %v6213_v29, %v3005_v19  ;;  %v3007_v47 = vadd.f32 %v6222_v36, %v2858_v11  ;;  %v3117_v22 = vld [vmem:[%s5861_s24 + $0xd0] sm:$0xff] }
 0x381   : > { %v4518_v49 = vpack.c.bf16 %v3462_v24, %v3461_v18  ;;  %v3464_v50 = vadd.f32 %v3336_v25, %v3196_v7  ;;  %v3338_v51 = vmul.f32 %v6215_v30, %v3006_v26  ;;  %v3008_v52 = vadd.f32 %v6224_v37, %v2859_v20  ;;  %v2868_v23 = vld [vmem:[#allocation2 + $0x1b0] sm:$0xff]  ;;  %v2869_v26 = vld [vmem:[#allocation2 + $0x1b8] sm:$0xff] }
 0x382   : > { %v3465_v55 = vadd.f32 %v3337_v39, %v3197_v27  ;;  %v3199_v33 = vunpack.c.l.bf16 %v3113_v31  ;;  %v3200_v56 = vunpack.c.h.bf16 %v3113_v31  ;;  %v3339_v21 = vmul.f32 %v6213_v29, %v3007_v47  ;;  %v3118_v27 = vld [vmem:[%s5861_s24 + $0xd8] sm:$0xff] }
 0x383   : > { %3954 = vst [vmem:[%s5867_s17 + $0x98] sm:$0xff] %v4518_v49  ;;  %v4519_v57 = vpack.c.bf16 %v3464_v50, %v3463_v32  ;;  %v3466_v58 = vadd.f32 %v3338_v51, %v3198_v38  ;;  %v3340_v40 = vmul.f32 %v6215_v30, %v3008_v52  ;;  %v3009_v59 = vadd.f32 %v6222_v36, %v2860_v48  ;;  %v2870_v47 = vld [vmem:[#allocation2 + $0x1c0] sm:$0xff]  ;;  %v2871_v52 = vld [vmem:[#allocation2 + $0x1c8] sm:$0xff] }
 0x384   : > { %v3467_v60 = vadd.f32 %v3339_v21, %v3199_v33  ;;  %v3010_v61 = vadd.f32 %v6224_v37, %v2861_v53  ;;  %v3201_v43 = vunpack.c.l.bf16 %v3114_v54  ;;  %v3202_v62 = vunpack.c.h.bf16 %v3114_v54  ;;  %v3119_v53 = vld [vmem:[%s5861_s24 + $0xe0] sm:$0xff]  ;;  %v2872_v21 = vld [vmem:[#allocation2 + $0x1d0] sm:$0xff] }
 0x385   : > { %3955 = vst [vmem:[%s5867_s17 + $0xa0] sm:$0xff] %v4519_v57  ;;  %v4520_v44 = vpack.c.bf16 %v3466_v58, %v3465_v55  ;;  %v3468_v63 = vadd.f32 %v3340_v40, %v3200_v56  ;;  %v3341_v0 = vmul.f32 %v6213_v29, %v3009_v59  ;;  %v3011_v1 = vadd.f32 %v6222_v36, %v2862_v34  ;;  %v2873_v59 = vld [vmem:[#allocation2 + $0x1d8] sm:$0xff] }
 0x386   : > { %v3342_v42 = vmul.f32 %v6215_v30, %v3010_v61  ;;  %v3012_v46 = vadd.f32 %v6224_v37, %v2863_v28  ;;  %v3203_v3 = vunpack.c.l.bf16 %v3115_v41  ;;  %v3204_v4 = vunpack.c.h.bf16 %v3115_v41  ;;  %v3120_v28 = vld [vmem:[%s5861_s24 + $0xe8] sm:$0xff] }
 0x387   : > { %3956 = vst [vmem:[%s5867_s17 + $0xa8] sm:$0xff] %v4520_v44  ;;  %v4521_v6 = vpack.c.bf16 %v3468_v63, %v3467_v60  ;;  %v3469_v8 = vadd.f32 %v3341_v0, %v3201_v43  ;;  %v3343_v9 = vmul.f32 %v6213_v29, %v3011_v1  ;;  %v3013_v10 = vadd.f32 %v6222_v36, %v2864_v35  ;;  %v2875_v1 = vld [vmem:[#allocation2 + $0x1e8] sm:$0xff] }
 0x388   : > { %v3470_v13 = vadd.f32 %v3342_v42, %v3202_v62  ;;  %v3344_v14 = vmul.f32 %v6215_v30, %v3012_v46  ;;  %v3014_v15 = vadd.f32 %v6224_v37, %v2865_v2  ;;  %v3205_v16 = vunpack.c.l.bf16 %v3116_v45  ;;  %v2874_v62 = vld [vmem:[#allocation2 + $0x1e0] sm:$0xff] }
 0x389   : > { %3957 = vst [vmem:[%s5867_s17 + $0xb0] sm:$0xff] %v4521_v6  ;;  %v3471_v7 = vadd.f32 %v3343_v9, %v3203_v3  ;;  %v3206_v11 = vunpack.c.h.bf16 %v3116_v45  ;;  %v3345_v17 = vmul.f32 %v6213_v29, %v3013_v10  ;;  %v3015_v18 = vadd.f32 %v6222_v36, %v2866_v5  ;;  %v3121_v3 = vld [vmem:[%s5861_s24 + $0xf0] sm:$0xff] }
 0x38a   : > { %v4522_v19 = vpack.c.bf16 %v3470_v13, %v3469_v8  ;;  %v3472_v20 = vadd.f32 %v3344_v14, %v3204_v4  ;;  %v3346_v24 = vmul.f32 %v6215_v30, %v3014_v15  ;;  %v3016_v25 = vadd.f32 %v6224_v37, %v2867_v12  ;;  %v2876_v9 = vld [vmem:[#allocation2 + $0x1f0] sm:$0xff]  ;;  %v2877_v15 = vld [vmem:[#allocation2 + $0x1f8] sm:$0xff] }
 0x38b   : > { %v3473_v31 = vadd.f32 %v3345_v17, %v3205_v16  ;;  %v3207_v32 = vunpack.c.l.bf16 %v3117_v22  ;;  %v3208_v38 = vunpack.c.h.bf16 %v3117_v22  ;;  %v3347_v39 = vmul.f32 %v6213_v29, %v3015_v18  ;;  %v3122_v16 = vld [vmem:[%s5861_s24 + $0xf8] sm:$0xff] }
 0x38c   : > { %3958 = vst [vmem:[%s5867_s17 + $0xb8] sm:$0xff] %v4522_v19  ;;  %v4523_v48 = vpack.c.bf16 %v3472_v20, %v3471_v7  ;;  %v3474_v49 = vadd.f32 %v3346_v24, %v3206_v11  ;;  %v3348_v50 = vmul.f32 %v6215_v30, %v3016_v25  ;;  %v3017_v51 = vadd.f32 %v6222_v36, %v2868_v23  ;;  %v2878_v18 = vld [vmem:[#allocation2 + $0x200] sm:$0xff]  ;;  %v2879_v25 = vld [vmem:[#allocation2 + $0x208] sm:$0xff] }
 0x38d   : > { %v3475_v54 = vadd.f32 %v3347_v39, %v3207_v32  ;;  %v3018_v55 = vadd.f32 %v6224_v37, %v2869_v26  ;;  %v3209_v33 = vunpack.c.l.bf16 %v3118_v27  ;;  %v3210_v56 = vunpack.c.h.bf16 %v3118_v27  ;;  %v3123_v26 = vld [vmem:[%s5861_s24 + $0x100] sm:$0xff]  ;;  %v2880_v39 = vld [vmem:[#allocation2 + $0x210] sm:$0xff] }
 0x38e   : > { %3959 = vst [vmem:[%s5867_s17 + $0xc0] sm:$0xff] %v4523_v48  ;;  %v4524_v34 = vpack.c.bf16 %v3474_v49, %v3473_v31  ;;  %v3476_v57 = vadd.f32 %v3348_v50, %v3208_v38  ;;  %v3349_v58 = vmul.f32 %v6213_v29, %v3017_v51  ;;  %v3019_v40 = vadd.f32 %v6222_v36, %v2870_v47  ;;  %v2881_v51 = vld [vmem:[#allocation2 + $0x218] sm:$0xff] }
 0x38f   : > { %v3350_v41 = vmul.f32 %v6215_v30, %v3018_v55  ;;  %v3020_v60 = vadd.f32 %v6224_v37, %v2871_v52  ;;  %v3211_v61 = vunpack.c.l.bf16 %v3119_v53  ;;  %v3212_v43 = vunpack.c.h.bf16 %v3119_v53  ;;  %v3124_v52 = vld [vmem:[%s5861_s24 + $0x108] sm:$0xff] }
 0x390   : > { %3960 = vst [vmem:[%s5867_s17 + $0xc8] sm:$0xff] %v4524_v34  ;;  %v4525_v35 = vpack.c.bf16 %v3476_v57, %v3475_v54  ;;  %v3477_v44 = vadd.f32 %v3349_v58, %v3209_v33  ;;  %v3351_v63 = vmul.f32 %v6213_v29, %v3019_v40  ;;  %v3021_v0 = vadd.f32 %v6222_v36, %v2872_v21  ;;  %v2883_v40 = vld [vmem:[#allocation2 + $0x228] sm:$0xff] }
 0x391   : > { %v3478_v2 = vadd.f32 %v3350_v41, %v3210_v56  ;;  %v3352_v45 = vmul.f32 %v6215_v30, %v3020_v60  ;;  %v3022_v42 = vadd.f32 %v6224_v37, %v2873_v59  ;;  %v3213_v46 = vunpack.c.l.bf16 %v3120_v28  ;;  %v2882_v56 = vld [vmem:[#allocation2 + $0x220] sm:$0xff] }
 0x392   : > { %3961 = vst [vmem:[%s5867_s17 + $0xd0] sm:$0xff] %v4525_v35  ;;  %v3479_v4 = vadd.f32 %v3351_v63, %v3211_v61  ;;  %v3214_v5 = vunpack.c.h.bf16 %v3120_v28  ;;  %v3353_v6 = vmul.f32 %v6213_v29, %v3021_v0  ;;  %v3023_v8 = vadd.f32 %v6222_v36, %v2874_v62  ;;  %v3125_v61 = vld [vmem:[%s5861_s24 + $0x110] sm:$0xff] }
 0x393   : > { %v4526_v10 = vpack.c.bf16 %v3478_v2, %v3477_v44  ;;  %v3480_v12 = vadd.f32 %v3352_v45, %v3212_v43  ;;  %v3354_v13 = vmul.f32 %v6215_v30, %v3022_v42  ;;  %v3024_v14 = vadd.f32 %v6224_v37, %v2875_v1  ;;  %v2884_v63 = vld [vmem:[#allocation2 + $0x230] sm:$0xff]  ;;  %v2885_v42 = vld [vmem:[#allocation2 + $0x238] sm:$0xff] }
 0x394   : > { %v3481_v22 = vadd.f32 %v3353_v6, %v3213_v46  ;;  %v3215_v7 = vunpack.c.l.bf16 %v3121_v3  ;;  %v3216_v11 = vunpack.c.h.bf16 %v3121_v3  ;;  %v3355_v17 = vmul.f32 %v6213_v29, %v3023_v8  ;;  %v3126_v46 = vld [vmem:[%s5861_s24 + $0x118] sm:$0xff] }
 0x395   : > { %3962 = vst [vmem:[%s5867_s17 + $0xd8] sm:$0xff] %v4526_v10  ;;  %v4527_v23 = vpack.c.bf16 %v3480_v12, %v3479_v4  ;;  %v3482_v19 = vadd.f32 %v3354_v13, %v3214_v5  ;;  %v3356_v20 = vmul.f32 %v6215_v30, %v3024_v14  ;;  %v3025_v24 = vadd.f32 %v6222_v36, %v2876_v9  ;;  %v2886_v8 = vld [vmem:[#allocation2 + $0x240] sm:$0xff]  ;;  %v2887_v14 = vld [vmem:[#allocation2 + $0x248] sm:$0xff] }
 0x396   : > { %v3483_v27 = vadd.f32 %v3355_v17, %v3215_v7  ;;  %v3026_v31 = vadd.f32 %v6224_v37, %v2877_v15  ;;  %v3217_v32 = vunpack.c.l.bf16 %v3122_v16  ;;  %v3218_v38 = vunpack.c.h.bf16 %v3122_v16  ;;  %v3127_v15 = vld [vmem:[%s5861_s24 + $0x120] sm:$0xff]  ;;  %v2888_v17 = vld [vmem:[#allocation2 + $0x250] sm:$0xff] }
 0x397   : > { %3963 = vst [vmem:[%s5867_s17 + $0xe0] sm:$0xff] %v4527_v23  ;;  %v4528_v47 = vpack.c.bf16 %v3482_v19, %v3481_v22  ;;  %v3484_v48 = vadd.f32 %v3356_v20, %v3216_v11  ;;  %v3357_v49 = vmul.f32 %v6213_v29, %v3025_v24  ;;  %v3027_v50 = vadd.f32 %v6222_v36, %v2878_v18  ;;  %v2889_v24 = vld [vmem:[#allocation2 + $0x258] sm:$0xff] }
 0x398   : > { %v3358_v53 = vmul.f32 %v6215_v30, %v3026_v31  ;;  %v3028_v54 = vadd.f32 %v6224_v37, %v2879_v25  ;;  %v3219_v55 = vunpack.c.l.bf16 %v3123_v26  ;;  %v3220_v33 = vunpack.c.h.bf16 %v3123_v26  ;;  %v3128_v25 = vld [vmem:[%s5861_s24 + $0x128] sm:$0xff] }
 0x399   : > { %3964 = vst [vmem:[%s5867_s17 + $0xe8] sm:$0xff] %v4528_v47  ;;  %v4529_v21 = vpack.c.bf16 %v3484_v48, %v3483_v27  ;;  %v3485_v34 = vadd.f32 %v3357_v49, %v3217_v32  ;;  %v3359_v57 = vmul.f32 %v6213_v29, %v3027_v50  ;;  %v3029_v58 = vadd.f32 %v6222_v36, %v2880_v39  ;;  %v2891_v50 = vld [vmem:[#allocation2 + $0x268] sm:$0xff] }
 0x39a   : > { %v3486_v59 = vadd.f32 %v3358_v53, %v3218_v38  ;;  %v3360_v28 = vmul.f32 %v6215_v30, %v3028_v54  ;;  %v3030_v41 = vadd.f32 %v6224_v37, %v2881_v51  ;;  %v3221_v60 = vunpack.c.l.bf16 %v3124_v52  ;;  %v2890_v38 = vld [vmem:[#allocation2 + $0x260] sm:$0xff] }
 0x39b   : > { %3965 = vst [vmem:[%s5867_s17 + $0xf0] sm:$0xff] %v4529_v21  ;;  %v3487_v43 = vadd.f32 %v3359_v57, %v3219_v55  ;;  %v3222_v62 = vunpack.c.h.bf16 %v3124_v52  ;;  %v3361_v35 = vmul.f32 %v6213_v29, %v3029_v58  ;;  %v3031_v44 = vadd.f32 %v6222_v36, %v2882_v56  ;;  %v3129_v55 = vld [vmem:[%s5861_s24 + $0x130] sm:$0xff] }
 0x39c   : > { %v4530_v0 = vpack.c.bf16 %v3486_v59, %v3485_v34  ;;  %v3488_v1 = vadd.f32 %v3360_v28, %v3220_v33  ;;  %v3362_v2 = vmul.f32 %v6215_v30, %v3030_v41  ;;  %v3032_v45 = vadd.f32 %v6224_v37, %v2883_v40  ;;  %v2892_v57 = vld [vmem:[#allocation2 + $0x270] sm:$0xff]  ;;  %v2893_v41 = vld [vmem:[#allocation2 + $0x278] sm:$0xff] }
 0x39d   : > { %v3489_v3 = vadd.f32 %v3361_v35, %v3221_v60  ;;  %v3223_v4 = vunpack.c.l.bf16 %v3125_v61  ;;  %v3224_v5 = vunpack.c.h.bf16 %v3125_v61  ;;  %v3363_v6 = vmul.f32 %v6213_v29, %v3031_v44  ;;  %v3130_v60 = vld [vmem:[%s5861_s24 + $0x138] sm:$0xff] }
 0x39e   : > { %3966 = vst [vmem:[%s5867_s17 + $0xf8] sm:$0xff] %v4530_v0  ;;  %v4531_v9 = vpack.c.bf16 %v3488_v1, %v3487_v43  ;;  %v3490_v10 = vadd.f32 %v3362_v2, %v3222_v62  ;;  %v3364_v12 = vmul.f32 %v6215_v30, %v3032_v45  ;;  %v3033_v13 = vadd.f32 %v6222_v36, %v2884_v63  ;;  %v2894_v44 = vld [vmem:[#allocation2 + $0x280] sm:$0xff]  ;;  %v2895_v45 = vld [vmem:[#allocation2 + $0x288] sm:$0xff] }
 0x39f   : > { %v3491_v16 = vadd.f32 %v3363_v6, %v3223_v4  ;;  %v3034_v22 = vadd.f32 %v6224_v37, %v2885_v42  ;;  %v3225_v7 = vunpack.c.l.bf16 %v3126_v46  ;;  %v3226_v11 = vunpack.c.h.bf16 %v3126_v46  ;;  %v3131_v42 = vld [vmem:[%s5861_s24 + $0x140] sm:$0xff]  ;;  %v2896_v6 = vld [vmem:[#allocation2 + $0x290] sm:$0xff] }
 0x3a0   : > { %3967 = vst [vmem:[%s5867_s17 + $0x100] sm:$0xff] %v4531_v9  ;;  %v4532_v18 = vpack.c.bf16 %v3490_v10, %v3489_v3  ;;  %v3492_v23 = vadd.f32 %v3364_v12, %v3224_v5  ;;  %v3365_v19 = vmul.f32 %v6213_v29, %v3033_v13  ;;  %v3035_v20 = vadd.f32 %v6222_v36, %v2886_v8  ;;  %v2897_v13 = vld [vmem:[#allocation2 + $0x298] sm:$0xff] }
 0x3a1   : > { %v3366_v26 = vmul.f32 %v6215_v30, %v3034_v22  ;;  %v3036_v27 = vadd.f32 %v6224_v37, %v2887_v14  ;;  %v3227_v31 = vunpack.c.l.bf16 %v3127_v15  ;;  %v3228_v32 = vunpack.c.h.bf16 %v3127_v15  ;;  %v3132_v14 = vld [vmem:[%s5861_s24 + $0x148] sm:$0xff] }
 0x3a2   : > { %3968 = vst [vmem:[%s5867_s17 + $0x108] sm:$0xff] %v4532_v18  ;;  %v4533_v39 = vpack.c.bf16 %v3492_v23, %v3491_v16  ;;  %v3493_v47 = vadd.f32 %v3365_v19, %v3225_v7  ;;  %v3367_v48 = vmul.f32 %v6213_v29, %v3035_v20  ;;  %v3037_v49 = vadd.f32 %v6222_v36, %v2888_v17  ;;  %v2899_v20 = vld [vmem:[#allocation2 + $0x2a8] sm:$0xff] }
 0x3a3   : > { %v3494_v51 = vadd.f32 %v3366_v26, %v3226_v11  ;;  %v3368_v52 = vmul.f32 %v6215_v30, %v3036_v27  ;;  %v3038_v53 = vadd.f32 %v6224_v37, %v2889_v24  ;;  %v3229_v54 = vunpack.c.l.bf16 %v3128_v25  ;;  %v2898_v11 = vld [vmem:[#allocation2 + $0x2a0] sm:$0xff] }
 0x3a4   : > { %3969 = vst [vmem:[%s5867_s17 + $0x110] sm:$0xff] %v4533_v39  ;;  %v3495_v33 = vadd.f32 %v3367_v48, %v3227_v31  ;;  %v3230_v56 = vunpack.c.h.bf16 %v3128_v25  ;;  %v3369_v21 = vmul.f32 %v6213_v29, %v3037_v49  ;;  %v3039_v34 = vadd.f32 %v6222_v36, %v2890_v38  ;;  %v3133_v31 = vld [vmem:[%s5861_s24 + $0x150] sm:$0xff] }
 0x3a5   : > { %v4534_v58 = vpack.c.bf16 %v3494_v51, %v3493_v47  ;;  %v3496_v40 = vadd.f32 %v3368_v52, %v3228_v32  ;;  %v3370_v59 = vmul.f32 %v6215_v30, %v3038_v53  ;;  %v3040_v28 = vadd.f32 %v6224_v37, %v2891_v50  ;;  %v2900_v48 = vld [vmem:[#allocation2 + $0x2b0] sm:$0xff]  ;;  %v2901_v53 = vld [vmem:[#allocation2 + $0x2b8] sm:$0xff] }
 0x3a6   : > { %v3497_v61 = vadd.f32 %v3369_v21, %v3229_v54  ;;  %v3231_v43 = vunpack.c.l.bf16 %v3129_v55  ;;  %v3232_v62 = vunpack.c.h.bf16 %v3129_v55  ;;  %v3371_v35 = vmul.f32 %v6213_v29, %v3039_v34  ;;  %v3134_v54 = vld [vmem:[%s5861_s24 + $0x158] sm:$0xff] }
 0x3a7   : > { %3970 = vst [vmem:[%s5867_s17 + $0x118] sm:$0xff] %v4534_v58  ;;  %v4535_v63 = vpack.c.bf16 %v3496_v40, %v3495_v33  ;;  %v3498_v0 = vadd.f32 %v3370_v59, %v3230_v56  ;;  %v3372_v1 = vmul.f32 %v6215_v30, %v3040_v28  ;;  %v3041_v2 = vadd.f32 %v6222_v36, %v2892_v57  ;;  %v2902_v34 = vld [vmem:[#allocation2 + $0x2c0] sm:$0xff]  ;;  %v2903_v28 = vld [vmem:[#allocation2 + $0x2c8] sm:$0xff] }
 0x3a8   : > { %v3499_v46 = vadd.f32 %v3371_v35, %v3231_v43  ;;  %v3042_v3 = vadd.f32 %v6224_v37, %v2893_v41  ;;  %v3233_v4 = vunpack.c.l.bf16 %v3130_v60  ;;  %v3234_v5 = vunpack.c.h.bf16 %v3130_v60  ;;  %v3135_v41 = vld [vmem:[%s5861_s24 + $0x160] sm:$0xff]  ;;  %v2904_v35 = vld [vmem:[#allocation2 + $0x2d0] sm:$0xff] }
 0x3a9   : > { %3971 = vst [vmem:[%s5867_s17 + $0x120] sm:$0xff] %v4535_v63  ;;  %v4536_v8 = vpack.c.bf16 %v3498_v0, %v3497_v61  ;;  %v3500_v9 = vadd.f32 %v3372_v1, %v3232_v62  ;;  %v3373_v10 = vmul.f32 %v6213_v29, %v3041_v2  ;;  %v3043_v12 = vadd.f32 %v6222_v36, %v2894_v44  ;;  %v2905_v2 = vld [vmem:[#allocation2 + $0x2d8] sm:$0xff] }
 0x3aa   : > { %v3374_v15 = vmul.f32 %v6215_v30, %v3042_v3  ;;  %v3044_v16 = vadd.f32 %v6224_v37, %v2895_v45  ;;  %v3235_v22 = vunpack.c.l.bf16 %v3131_v42  ;;  %v3236_v7 = vunpack.c.h.bf16 %v3131_v42  ;;  %v3136_v45 = vld [vmem:[%s5861_s24 + $0x168] sm:$0xff] }
 0x3ab   : > { %3972 = vst [vmem:[%s5867_s17 + $0x128] sm:$0xff] %v4536_v8  ;;  %v4537_v17 = vpack.c.bf16 %v3500_v9, %v3499_v46  ;;  %v3501_v18 = vadd.f32 %v3373_v10, %v3233_v4  ;;  %v3375_v23 = vmul.f32 %v6213_v29, %v3043_v12  ;;  %v3045_v19 = vadd.f32 %v6222_v36, %v2896_v6  ;;  %v2907_v12 = vld [vmem:[#allocation2 + $0x2e8] sm:$0xff] }
 0x3ac   : > { %v3502_v24 = vadd.f32 %v3374_v15, %v3234_v5  ;;  %v3376_v25 = vmul.f32 %v6215_v30, %v3044_v16  ;;  %v3046_v26 = vadd.f32 %v6224_v37, %v2897_v13  ;;  %v3237_v27 = vunpack.c.l.bf16 %v3132_v14  ;;  %v2906_v5 = vld [vmem:[#allocation2 + $0x2e0] sm:$0xff] }
 0x3ad   : > { %3973 = vst [vmem:[%s5867_s17 + $0x130] sm:$0xff] %v4537_v17  ;;  %v3503_v32 = vadd.f32 %v3375_v23, %v3235_v22  ;;  %v3238_v38 = vunpack.c.h.bf16 %v3132_v14  ;;  %v3377_v39 = vmul.f32 %v6213_v29, %v3045_v19  ;;  %v3047_v47 = vadd.f32 %v6222_v36, %v2898_v11  ;;  %v3137_v22 = vld [vmem:[%s5861_s24 + $0x170] sm:$0xff] }
 0x3ae   : > { %v4538_v49 = vpack.c.bf16 %v3502_v24, %v3501_v18  ;;  %v3504_v50 = vadd.f32 %v3376_v25, %v3236_v7  ;;  %v3378_v51 = vmul.f32 %v6215_v30, %v3046_v26  ;;  %v3048_v52 = vadd.f32 %v6224_v37, %v2899_v20  ;;  %v2908_v23 = vld [vmem:[#allocation2 + $0x2f0] sm:$0xff]  ;;  %v2909_v26 = vld [vmem:[#allocation2 + $0x2f8] sm:$0xff] }
 0x3af   : > { %v3505_v55 = vadd.f32 %v3377_v39, %v3237_v27  ;;  %v3239_v33 = vunpack.c.l.bf16 %v3133_v31  ;;  %v3240_v56 = vunpack.c.h.bf16 %v3133_v31  ;;  %v3379_v21 = vmul.f32 %v6213_v29, %v3047_v47  ;;  %v3138_v27 = vld [vmem:[%s5861_s24 + $0x178] sm:$0xff] }
 0x3b0   : > { %3974 = vst [vmem:[%s5867_s17 + $0x138] sm:$0xff] %v4538_v49  ;;  %v4539_v57 = vpack.c.bf16 %v3504_v50, %v3503_v32  ;;  %v3506_v58 = vadd.f32 %v3378_v51, %v3238_v38  ;;  %v3380_v40 = vmul.f32 %v6215_v30, %v3048_v52  ;;  %v3049_v59 = vadd.f32 %v6222_v36, %v2900_v48  ;;  %v2910_v47 = vld [vmem:[#allocation2 + $0x300] sm:$0xff]  ;;  %v2911_v52 = vld [vmem:[#allocation2 + $0x308] sm:$0xff] }
 0x3b1   : > { %v3507_v60 = vadd.f32 %v3379_v21, %v3239_v33  ;;  %v3050_v61 = vadd.f32 %v6224_v37, %v2901_v53  ;;  %v3241_v43 = vunpack.c.l.bf16 %v3134_v54  ;;  %v3242_v62 = vunpack.c.h.bf16 %v3134_v54  ;;  %v3139_v53 = vld [vmem:[%s5861_s24 + $0x180] sm:$0xff]  ;;  %v2912_v21 = vld [vmem:[#allocation2 + $0x310] sm:$0xff] }
 0x3b2   : > { %3975 = vst [vmem:[%s5867_s17 + $0x140] sm:$0xff] %v4539_v57  ;;  %v4540_v44 = vpack.c.bf16 %v3506_v58, %v3505_v55  ;;  %v3508_v63 = vadd.f32 %v3380_v40, %v3240_v56  ;;  %v3381_v0 = vmul.f32 %v6213_v29, %v3049_v59  ;;  %v3051_v1 = vadd.f32 %v6222_v36, %v2902_v34  ;;  %v2913_v59 = vld [vmem:[#allocation2 + $0x318] sm:$0xff] }
 0x3b3   : > { %v3382_v42 = vmul.f32 %v6215_v30, %v3050_v61  ;;  %v3052_v46 = vadd.f32 %v6224_v37, %v2903_v28  ;;  %v3243_v3 = vunpack.c.l.bf16 %v3135_v41  ;;  %v3244_v4 = vunpack.c.h.bf16 %v3135_v41  ;;  %v3140_v28 = vld [vmem:[%s5861_s24 + $0x188] sm:$0xff] }
 0x3b4   : > { %3976 = vst [vmem:[%s5867_s17 + $0x148] sm:$0xff] %v4540_v44  ;;  %v4541_v6 = vpack.c.bf16 %v3508_v63, %v3507_v60  ;;  %v3509_v8 = vadd.f32 %v3381_v0, %v3241_v43  ;;  %v3383_v9 = vmul.f32 %v6213_v29, %v3051_v1  ;;  %v3053_v10 = vadd.f32 %v6222_v36, %v2904_v35  ;;  %v2915_v1 = vld [vmem:[#allocation2 + $0x328] sm:$0xff] }
 0x3b5   : > { %v3510_v13 = vadd.f32 %v3382_v42, %v3242_v62  ;;  %v3384_v14 = vmul.f32 %v6215_v30, %v3052_v46  ;;  %v3054_v15 = vadd.f32 %v6224_v37, %v2905_v2  ;;  %v3245_v16 = vunpack.c.l.bf16 %v3136_v45  ;;  %v2914_v62 = vld [vmem:[#allocation2 + $0x320] sm:$0xff] }
 0x3b6   : > { %3977 = vst [vmem:[%s5867_s17 + $0x150] sm:$0xff] %v4541_v6  ;;  %v3511_v7 = vadd.f32 %v3383_v9, %v3243_v3  ;;  %v3246_v11 = vunpack.c.h.bf16 %v3136_v45  ;;  %v3385_v17 = vmul.f32 %v6213_v29, %v3053_v10  ;;  %v3055_v18 = vadd.f32 %v6222_v36, %v2906_v5  ;;  %v3141_v3 = vld [vmem:[%s5861_s24 + $0x190] sm:$0xff] }
 0x3b7   : > { %v4542_v19 = vpack.c.bf16 %v3510_v13, %v3509_v8  ;;  %v3512_v20 = vadd.f32 %v3384_v14, %v3244_v4  ;;  %v3386_v24 = vmul.f32 %v6215_v30, %v3054_v15  ;;  %v3056_v25 = vadd.f32 %v6224_v37, %v2907_v12  ;;  %v2916_v9 = vld [vmem:[#allocation2 + $0x330] sm:$0xff]  ;;  %v2917_v15 = vld [vmem:[#allocation2 + $0x338] sm:$0xff] }
 0x3b8   : > { %v3513_v31 = vadd.f32 %v3385_v17, %v3245_v16  ;;  %v3247_v32 = vunpack.c.l.bf16 %v3137_v22  ;;  %v3248_v38 = vunpack.c.h.bf16 %v3137_v22  ;;  %v3387_v39 = vmul.f32 %v6213_v29, %v3055_v18  ;;  %v3142_v16 = vld [vmem:[%s5861_s24 + $0x198] sm:$0xff] }
 0x3b9   : > { %3978 = vst [vmem:[%s5867_s17 + $0x158] sm:$0xff] %v4542_v19  ;;  %v4543_v48 = vpack.c.bf16 %v3512_v20, %v3511_v7  ;;  %v3514_v49 = vadd.f32 %v3386_v24, %v3246_v11  ;;  %v3388_v50 = vmul.f32 %v6215_v30, %v3056_v25  ;;  %v3057_v51 = vadd.f32 %v6222_v36, %v2908_v23  ;;  %v2918_v18 = vld [vmem:[#allocation2 + $0x340] sm:$0xff]  ;;  %v2919_v25 = vld [vmem:[#allocation2 + $0x348] sm:$0xff] }
 0x3ba   : > { %v3515_v54 = vadd.f32 %v3387_v39, %v3247_v32  ;;  %v3058_v55 = vadd.f32 %v6224_v37, %v2909_v26  ;;  %v3249_v33 = vunpack.c.l.bf16 %v3138_v27  ;;  %v3250_v56 = vunpack.c.h.bf16 %v3138_v27  ;;  %v3143_v26 = vld [vmem:[%s5861_s24 + $0x1a0] sm:$0xff]  ;;  %v2920_v39 = vld [vmem:[#allocation2 + $0x350] sm:$0xff] }
 0x3bb   : > { %3979 = vst [vmem:[%s5867_s17 + $0x160] sm:$0xff] %v4543_v48  ;;  %v4544_v34 = vpack.c.bf16 %v3514_v49, %v3513_v31  ;;  %v3516_v57 = vadd.f32 %v3388_v50, %v3248_v38  ;;  %v3389_v58 = vmul.f32 %v6213_v29, %v3057_v51  ;;  %v3059_v40 = vadd.f32 %v6222_v36, %v2910_v47  ;;  %v2921_v51 = vld [vmem:[#allocation2 + $0x358] sm:$0xff] }
 0x3bc   : > { %v3390_v41 = vmul.f32 %v6215_v30, %v3058_v55  ;;  %v3060_v60 = vadd.f32 %v6224_v37, %v2911_v52  ;;  %v3251_v61 = vunpack.c.l.bf16 %v3139_v53  ;;  %v3252_v43 = vunpack.c.h.bf16 %v3139_v53  ;;  %v3144_v52 = vld [vmem:[%s5861_s24 + $0x1a8] sm:$0xff] }
 0x3bd   : > { %3980 = vst [vmem:[%s5867_s17 + $0x168] sm:$0xff] %v4544_v34  ;;  %v4545_v35 = vpack.c.bf16 %v3516_v57, %v3515_v54  ;;  %v3517_v44 = vadd.f32 %v3389_v58, %v3249_v33  ;;  %v3391_v63 = vmul.f32 %v6213_v29, %v3059_v40  ;;  %v3061_v0 = vadd.f32 %v6222_v36, %v2912_v21  ;;  %v2923_v40 = vld [vmem:[#allocation2 + $0x368] sm:$0xff] }
 0x3be   : > { %v3518_v2 = vadd.f32 %v3390_v41, %v3250_v56  ;;  %v3392_v45 = vmul.f32 %v6215_v30, %v3060_v60  ;;  %v3062_v42 = vadd.f32 %v6224_v37, %v2913_v59  ;;  %v3253_v46 = vunpack.c.l.bf16 %v3140_v28  ;;  %v2922_v56 = vld [vmem:[#allocation2 + $0x360] sm:$0xff] }
 0x3bf   : > { %3981 = vst [vmem:[%s5867_s17 + $0x170] sm:$0xff] %v4545_v35  ;;  %v3519_v4 = vadd.f32 %v3391_v63, %v3251_v61  ;;  %v3254_v5 = vunpack.c.h.bf16 %v3140_v28  ;;  %v3393_v6 = vmul.f32 %v6213_v29, %v3061_v0  ;;  %v3063_v8 = vadd.f32 %v6222_v36, %v2914_v62  ;;  %v3145_v61 = vld [vmem:[%s5861_s24 + $0x1b0] sm:$0xff] }
 0x3c0   : > { %v4546_v10 = vpack.c.bf16 %v3518_v2, %v3517_v44  ;;  %v3520_v12 = vadd.f32 %v3392_v45, %v3252_v43  ;;  %v3394_v13 = vmul.f32 %v6215_v30, %v3062_v42  ;;  %v3064_v14 = vadd.f32 %v6224_v37, %v2915_v1  ;;  %v2924_v63 = vld [vmem:[#allocation2 + $0x370] sm:$0xff]  ;;  %v2925_v42 = vld [vmem:[#allocation2 + $0x378] sm:$0xff] }
 0x3c1   : > { %v3521_v22 = vadd.f32 %v3393_v6, %v3253_v46  ;;  %v3255_v7 = vunpack.c.l.bf16 %v3141_v3  ;;  %v3256_v11 = vunpack.c.h.bf16 %v3141_v3  ;;  %v3395_v17 = vmul.f32 %v6213_v29, %v3063_v8  ;;  %v3146_v46 = vld [vmem:[%s5861_s24 + $0x1b8] sm:$0xff] }
 0x3c2   : > { %3982 = vst [vmem:[%s5867_s17 + $0x178] sm:$0xff] %v4546_v10  ;;  %v4547_v23 = vpack.c.bf16 %v3520_v12, %v3519_v4  ;;  %v3522_v19 = vadd.f32 %v3394_v13, %v3254_v5  ;;  %v3396_v20 = vmul.f32 %v6215_v30, %v3064_v14  ;;  %v3065_v24 = vadd.f32 %v6222_v36, %v2916_v9  ;;  %v2926_v8 = vld [vmem:[#allocation2 + $0x380] sm:$0xff]  ;;  %v2927_v14 = vld [vmem:[#allocation2 + $0x388] sm:$0xff] }
 0x3c3   : > { %v3523_v27 = vadd.f32 %v3395_v17, %v3255_v7  ;;  %v3066_v31 = vadd.f32 %v6224_v37, %v2917_v15  ;;  %v3257_v32 = vunpack.c.l.bf16 %v3142_v16  ;;  %v3258_v38 = vunpack.c.h.bf16 %v3142_v16  ;;  %v3147_v15 = vld [vmem:[%s5861_s24 + $0x1c0] sm:$0xff]  ;;  %v2928_v17 = vld [vmem:[#allocation2 + $0x390] sm:$0xff] }
 0x3c4   : > { %3983 = vst [vmem:[%s5867_s17 + $0x180] sm:$0xff] %v4547_v23  ;;  %v4548_v47 = vpack.c.bf16 %v3522_v19, %v3521_v22  ;;  %v3524_v48 = vadd.f32 %v3396_v20, %v3256_v11  ;;  %v3397_v49 = vmul.f32 %v6213_v29, %v3065_v24  ;;  %v3067_v50 = vadd.f32 %v6222_v36, %v2918_v18  ;;  %v2929_v24 = vld [vmem:[#allocation2 + $0x398] sm:$0xff] }
 0x3c5   : > { %v3398_v53 = vmul.f32 %v6215_v30, %v3066_v31  ;;  %v3068_v54 = vadd.f32 %v6224_v37, %v2919_v25  ;;  %v3259_v55 = vunpack.c.l.bf16 %v3143_v26  ;;  %v3260_v33 = vunpack.c.h.bf16 %v3143_v26  ;;  %v3148_v25 = vld [vmem:[%s5861_s24 + $0x1c8] sm:$0xff] }
 0x3c6   : > { %3984 = vst [vmem:[%s5867_s17 + $0x188] sm:$0xff] %v4548_v47  ;;  %v4549_v21 = vpack.c.bf16 %v3524_v48, %v3523_v27  ;;  %v3525_v34 = vadd.f32 %v3397_v49, %v3257_v32  ;;  %v3399_v57 = vmul.f32 %v6213_v29, %v3067_v50  ;;  %v3069_v58 = vadd.f32 %v6222_v36, %v2920_v39  ;;  %v2931_v50 = vld [vmem:[#allocation2 + $0x3a8] sm:$0xff] }
 0x3c7   : > { %v3526_v59 = vadd.f32 %v3398_v53, %v3258_v38  ;;  %v3400_v28 = vmul.f32 %v6215_v30, %v3068_v54  ;;  %v3070_v41 = vadd.f32 %v6224_v37, %v2921_v51  ;;  %v3261_v60 = vunpack.c.l.bf16 %v3144_v52  ;;  %v2930_v38 = vld [vmem:[#allocation2 + $0x3a0] sm:$0xff] }
 0x3c8   : > { %3985 = vst [vmem:[%s5867_s17 + $0x190] sm:$0xff] %v4549_v21  ;;  %v3527_v43 = vadd.f32 %v3399_v57, %v3259_v55  ;;  %v3262_v62 = vunpack.c.h.bf16 %v3144_v52  ;;  %v3401_v35 = vmul.f32 %v6213_v29, %v3069_v58  ;;  %v3071_v44 = vadd.f32 %v6222_v36, %v2922_v56  ;;  %v3149_v55 = vld [vmem:[%s5861_s24 + $0x1d0] sm:$0xff] }
 0x3c9   : > { %v4550_v0 = vpack.c.bf16 %v3526_v59, %v3525_v34  ;;  %v3528_v1 = vadd.f32 %v3400_v28, %v3260_v33  ;;  %v3402_v2 = vmul.f32 %v6215_v30, %v3070_v41  ;;  %v3072_v45 = vadd.f32 %v6224_v37, %v2923_v40  ;;  %v2932_v57 = vld [vmem:[#allocation2 + $0x3b0] sm:$0xff]  ;;  %v2933_v41 = vld [vmem:[#allocation2 + $0x3b8] sm:$0xff] }
 0x3ca   : > { %v3529_v3 = vadd.f32 %v3401_v35, %v3261_v60  ;;  %v3263_v4 = vunpack.c.l.bf16 %v3145_v61  ;;  %v3264_v5 = vunpack.c.h.bf16 %v3145_v61  ;;  %v3403_v6 = vmul.f32 %v6213_v29, %v3071_v44  ;;  %v3150_v60 = vld [vmem:[%s5861_s24 + $0x1d8] sm:$0xff] }
 0x3cb   : > { %3986 = vst [vmem:[%s5867_s17 + $0x198] sm:$0xff] %v4550_v0  ;;  %v4551_v9 = vpack.c.bf16 %v3528_v1, %v3527_v43  ;;  %v3530_v10 = vadd.f32 %v3402_v2, %v3262_v62  ;;  %v3404_v12 = vmul.f32 %v6215_v30, %v3072_v45  ;;  %v3073_v13 = vadd.f32 %v6222_v36, %v2924_v63  ;;  %v2934_v44 = vld [vmem:[#allocation2 + $0x3c0] sm:$0xff]  ;;  %v2935_v45 = vld [vmem:[#allocation2 + $0x3c8] sm:$0xff] }
 0x3cc   : > { %v3531_v16 = vadd.f32 %v3403_v6, %v3263_v4  ;;  %v3074_v22 = vadd.f32 %v6224_v37, %v2925_v42  ;;  %v3265_v7 = vunpack.c.l.bf16 %v3146_v46  ;;  %v3266_v11 = vunpack.c.h.bf16 %v3146_v46  ;;  %v3151_v42 = vld [vmem:[%s5861_s24 + $0x1e0] sm:$0xff]  ;;  %v2936_v6 = vld [vmem:[#allocation2 + $0x3d0] sm:$0xff] }
 0x3cd   : > { %3987 = vst [vmem:[%s5867_s17 + $0x1a0] sm:$0xff] %v4551_v9  ;;  %v4552_v18 = vpack.c.bf16 %v3530_v10, %v3529_v3  ;;  %v3532_v23 = vadd.f32 %v3404_v12, %v3264_v5  ;;  %v3405_v19 = vmul.f32 %v6213_v29, %v3073_v13  ;;  %v3075_v20 = vadd.f32 %v6222_v36, %v2926_v8  ;;  %v2937_v13 = vld [vmem:[#allocation2 + $0x3d8] sm:$0xff] }
 0x3ce   : > { %v3406_v26 = vmul.f32 %v6215_v30, %v3074_v22  ;;  %v3076_v27 = vadd.f32 %v6224_v37, %v2927_v14  ;;  %v3267_v31 = vunpack.c.l.bf16 %v3147_v15  ;;  %v3268_v32 = vunpack.c.h.bf16 %v3147_v15  ;;  %v3152_v14 = vld [vmem:[%s5861_s24 + $0x1e8] sm:$0xff] }
 0x3cf   : > { %3988 = vst [vmem:[%s5867_s17 + $0x1a8] sm:$0xff] %v4552_v18  ;;  %v4553_v39 = vpack.c.bf16 %v3532_v23, %v3531_v16  ;;  %v3533_v47 = vadd.f32 %v3405_v19, %v3265_v7  ;;  %v3407_v48 = vmul.f32 %v6213_v29, %v3075_v20  ;;  %v3077_v49 = vadd.f32 %v6222_v36, %v2928_v17  ;;  %v2939_v20 = vld [vmem:[#allocation2 + $0x3e8] sm:$0xff] }
 0x3d0   : > { %v3534_v51 = vadd.f32 %v3406_v26, %v3266_v11  ;;  %v3408_v52 = vmul.f32 %v6215_v30, %v3076_v27  ;;  %v3078_v53 = vadd.f32 %v6224_v37, %v2929_v24  ;;  %v3269_v54 = vunpack.c.l.bf16 %v3148_v25  ;;  %v2938_v11 = vld [vmem:[#allocation2 + $0x3e0] sm:$0xff] }
 0x3d1   : > { %3989 = vst [vmem:[%s5867_s17 + $0x1b0] sm:$0xff] %v4553_v39  ;;  %v3535_v33 = vadd.f32 %v3407_v48, %v3267_v31  ;;  %v3270_v56 = vunpack.c.h.bf16 %v3148_v25  ;;  %v3409_v21 = vmul.f32 %v6213_v29, %v3077_v49  ;;  %v3079_v34 = vadd.f32 %v6222_v36, %v2930_v38  ;;  %v3153_v31 = vld [vmem:[%s5861_s24 + $0x1f0] sm:$0xff] }
 0x3d2   : > { %v4554_v58 = vpack.c.bf16 %v3534_v51, %v3533_v47  ;;  %v3536_v40 = vadd.f32 %v3408_v52, %v3268_v32  ;;  %v3410_v59 = vmul.f32 %v6215_v30, %v3078_v53  ;;  %v3080_v28 = vadd.f32 %v6224_v37, %v2931_v50  ;;  %v2940_v48 = vld [vmem:[#allocation2 + $0x3f0] sm:$0xff]  ;;  %v2941_v53 = vld [vmem:[#allocation2 + $0x3f8] sm:$0xff] }
 0x3d3   : > { %v3537_v61 = vadd.f32 %v3409_v21, %v3269_v54  ;;  %v3271_v43 = vunpack.c.l.bf16 %v3149_v55  ;;  %v3272_v62 = vunpack.c.h.bf16 %v3149_v55  ;;  %v3411_v35 = vmul.f32 %v6213_v29, %v3079_v34  ;;  %v3154_v54 = vld [vmem:[%s5861_s24 + $0x1f8] sm:$0xff] }
 0x3d4   : > { %3990 = vst [vmem:[%s5867_s17 + $0x1b8] sm:$0xff] %v4554_v58  ;;  %v4555_v63 = vpack.c.bf16 %v3536_v40, %v3535_v33  ;;  %v3538_v0 = vadd.f32 %v3410_v59, %v3270_v56  ;;  %v3412_v1 = vmul.f32 %v6215_v30, %v3080_v28  ;;  %v3081_v2 = vadd.f32 %v6222_v36, %v2932_v57 }
 0x3d5   : > { %v3539_v46 = vadd.f32 %v3411_v35, %v3271_v43  ;;  %v3082_v3 = vadd.f32 %v6224_v37, %v2933_v41  ;;  %v3273_v4 = vunpack.c.l.bf16 %v3150_v60  ;;  %v3274_v5 = vunpack.c.h.bf16 %v3150_v60 }
 0x3d6   : > { %3991 = vst [vmem:[%s5867_s17 + $0x1c0] sm:$0xff] %v4555_v63  ;;  %v4556_v8 = vpack.c.bf16 %v3538_v0, %v3537_v61  ;;  %v3540_v9 = vadd.f32 %v3412_v1, %v3272_v62  ;;  %v3413_v10 = vmul.f32 %v6213_v29, %v3081_v2  ;;  %v3083_v12 = vadd.f32 %v6222_v36, %v2934_v44 }
 0x3d7   : > { %v3414_v15 = vmul.f32 %v6215_v30, %v3082_v3  ;;  %v3084_v16 = vadd.f32 %v6224_v37, %v2935_v45  ;;  %v3275_v22 = vunpack.c.l.bf16 %v3151_v42  ;;  %v3276_v7 = vunpack.c.h.bf16 %v3151_v42 }
 0x3d8   : > { %3992 = vst [vmem:[%s5867_s17 + $0x1c8] sm:$0xff] %v4556_v8  ;;  %v4557_v17 = vpack.c.bf16 %v3540_v9, %v3539_v46  ;;  %v3541_v18 = vadd.f32 %v3413_v10, %v3273_v4  ;;  %v3415_v23 = vmul.f32 %v6213_v29, %v3083_v12  ;;  %v3085_v19 = vadd.f32 %v6222_v36, %v2936_v6 }
 0x3d9   : > { %v3542_v24 = vadd.f32 %v3414_v15, %v3274_v5  ;;  %v3416_v25 = vmul.f32 %v6215_v30, %v3084_v16  ;;  %v3086_v26 = vadd.f32 %v6224_v37, %v2937_v13  ;;  %v3277_v27 = vunpack.c.l.bf16 %v3152_v14 }
 0x3da   : > { %3993 = vst [vmem:[%s5867_s17 + $0x1d0] sm:$0xff] %v4557_v17  ;;  %v3543_v32 = vadd.f32 %v3415_v23, %v3275_v22  ;;  %v3278_v38 = vunpack.c.h.bf16 %v3152_v14  ;;  %v3417_v39 = vmul.f32 %v6213_v29, %v3085_v19  ;;  %v3087_v47 = vadd.f32 %v6222_v36, %v2938_v11 }
 0x3db   : > { %v4558_v49 = vpack.c.bf16 %v3542_v24, %v3541_v18  ;;  %v3544_v50 = vadd.f32 %v3416_v25, %v3276_v7  ;;  %v3418_v51 = vmul.f32 %v6215_v30, %v3086_v26  ;;  %v3088_v52 = vadd.f32 %v6224_v37, %v2939_v20 }
 0x3dc   : > { %v3545_v55 = vadd.f32 %v3417_v39, %v3277_v27  ;;  %v3279_v33 = vunpack.c.l.bf16 %v3153_v31  ;;  %v3280_v56 = vunpack.c.h.bf16 %v3153_v31  ;;  %v3419_v21 = vmul.f32 %v6213_v29, %v3087_v47 }
 0x3dd   : > { %3994 = vst [vmem:[%s5867_s17 + $0x1d8] sm:$0xff] %v4558_v49  ;;  %v4559_v34 = vpack.c.bf16 %v3544_v50, %v3543_v32  ;;  %v3546_v57 = vadd.f32 %v3418_v51, %v3278_v38  ;;  %v3420_v58 = vmul.f32 %v6215_v30, %v3088_v52  ;;  %v3089_v40 = vadd.f32 %v6222_v36, %v2940_v48 }
 0x3de   : > { %v3547_v59 = vadd.f32 %v3419_v21, %v3279_v33  ;;  %v3090_v28 = vadd.f32 %v6224_v37, %v2941_v53  ;;  %v3281_v41 = vunpack.c.l.bf16 %v3154_v54  ;;  %v3282_v60 = vunpack.c.h.bf16 %v3154_v54 }
 0x3df   : > { %3995 = vst [vmem:[%s5867_s17 + $0x1e0] sm:$0xff] %v4559_v34  ;;  %v4560_v61 = vpack.c.bf16 %v3546_v57, %v3545_v55  ;;  %v3548_v43 = vadd.f32 %v3420_v58, %v3280_v56  ;;  %v3421_v62 = vmul.f32 %v6213_v29, %v3089_v40 }
 0x3e0   : > { %v3422_v35 = vmul.f32 %v6215_v30, %v3090_v28 }
 0x3e1   : > { %3996 = vst [vmem:[%s5867_s17 + $0x1e8] sm:$0xff] %v4560_v61  ;;  %v4561_v44 = vpack.c.bf16 %v3548_v43, %v3547_v59  ;;  %v3549_v63 = vadd.f32 %v3421_v62, %v3281_v41 }
 0x3e2   : > { %v3550_v0 = vadd.f32 %v3422_v35, %v3282_v60 }
 0x3e3   : > { %3997 = vst [vmem:[%s5867_s17 + $0x1f0] sm:$0xff] %v4561_v44 }
 0x3e4   : > { %v4562_v1 = vpack.c.bf16 %v3550_v0, %v3549_v63 }
 0x3e6   : > { %3998 = vst [vmem:[%s5867_s17 + $0x1f8] sm:$0xff] %v4562_v1 }
 0x3e7 PF: > { %s6629_s2 = scalar_lea.sflag [#allocation5], %s372_s27  ;;  %s6795_s10 = sld [smem:[#allocation30_spill]] }
 0x3ed   : > { %p6796_p11 = scmp.ne.s32.totalorder %s6795_s10, 0 }
 0x3ee   : > { %s6797_s28 = sld [smem:[#allocation22_spill]] (%p6796_p11) }
 0x3ef   : > { %4006 = sbr.rel (!%p6796_p11) target bundleno = 1045 (0x415), region = 72 }
 0x3f4   : > { %s4483_s16 = sshll.u32 (%p6796_p11), %s6797_s28, 6 }
 0x3f5   : > { %s4009_s18 = ssub.s32 (%p6796_p11), 65, %s4483_s16 }
 0x3f6   : > { %p4010_p2 = scmp.lt.s32.totalorder %s4009_s18, 64 }
 0x3f8   : > { %s6832_s18 = smov (!%p4010_p2, %s4009_s18), 64 }
 0x3f9   : > { %s6634_s8 = sshll.u32 %s6832_s18, 7 }
 0x3fa   : > { %s4015_s12 = ssub.s32 8192, %s6634_s8 }
 0x3fb   : > { %4016 = vsyncadd %s6629_s2, %s4015_s12  ;;  %p4486_p1 = scmp.ne.s32.totalorder %s6634_s8, 0  ;;  %s4565_s19 = sshll.u32 %s6797_s28, 13 }
 0x3fc   : > { %s6798_s14 = sld [smem:[#allocation33_spill]]  ;;  %s4023_s27 = sshll.u32 %s5867_s17, 4  ;;  %s6646_s27 = int_to_ptr.vmem [resolvable:$true] %s4023_s27 }
 0x3fd   : > { %s5276_s15 = scalar_lea.vmem %s6646_s27, %s6634_s8  ;;  %s5453_s24 = smov [#allocation12]  }
 0x3fe   : > { %p5277_p8 = scmp.ne.s32.totalorder %s6646_s27, %s5276_s15  ;;  %s5280_s11 = sshll.u32 %s5453_s24, 4  ;;  %s5281_s11 = int_to_ptr.vmem [resolvable:$false] %s5280_s11 }
 0x3ff   : > { %s5282_s7 = scalar_lea.vmem %s5281_s11, 16384  ;;  %p5283_p4 = scmp.lt.s32.totalorder %s6646_s27, %s5281_s11 }
 0x400   : > { %p5278_p13 = pnand %p5277_p8, %p4486_p1  ;;  %p5284_p12 = scmp.lt.s32.totalorder %s5282_s7, %s5276_s15 }
 0x402   : > { %s6643_s13 = scalar_lea.hbm %s6798_s14, %s4565_s19  ;;  %p5279_p9 = pneg %p5278_p13 }
 0x403   : > { %p5285_p3 = por %p5284_p12, %p5283_p4 }
 0x405   : > { %p5286_p10 = pnand %p5285_p3, %p5279_p9 }
 0x407   : > { %5289 = shalt.err (!%p5286_p10)
}
 0x408   : > { %s5290_s17 = scalar_lea.hbm %s6643_s13, %s6634_s8  ;;  %s5294_s28 = scalar_lea.hbm %s6798_s14, 8320 }
 0x409   : > { %p5291_p7 = scmp.ne.s32.totalorder %s6643_s13, %s5290_s17  ;;  %p5295_p5 = scmp.lt.u32.totalorder %s6643_s13, %s6798_s14 }
 0x40a   : > { %p5296_p11 = scmp.lt.u32.totalorder %s5294_s28, %s5290_s17  ;;  %p5298_p8 = scmp.lt.u32.totalorder %s5290_s17, %s6643_s13 }
 0x40b   : > { %p5292_p0 = pnand %p5291_p7, %p4486_p1 }
 0x40c   : > { %p5297_p2 = por %p5296_p11, %p5295_p5 }
 0x40d   : > { %p5293_p6 = pneg %p5292_p0 }
 0x40e   : > { %p5299_p13 = por %p5298_p8, %p5297_p2 }
 0x410   : > { %p5300_p9 = pnand %p5299_p13, %p5293_p6 }
 0x412   : > { %5303 = shalt.err (!%p5300_p9)
}
 0x413   : > { %s5454_s12 = smov 128   ;;  %s5455_s19 = smov 8  }
 0x414   : > { %4029 = dma.vmem_to_hbm [thread:$0]  (%p4486_p1), %s6646_s27, %s6634_s8, %s6643_s13, %s6629_s2, %s5454_s12, %s5454_s12, %s5455_s19  }
 0x415 PF: > { %s6799_s9 = sld [smem:[#allocation19_spill]]  ;;  %s6800_s5 = sld [smem:[#allocation31_spill]] }
 0x416   : > { %p4723_p4 = scmp.ge.s32.totalorder %s5438_s6, 2 }
 0x41b   : > { %s4038_s15 = sand.u32 1, %s6799_s9   ;;  %p6801_p12 = scmp.ne.s32.totalorder %s6800_s5, 0 }
 0x41c   : > { %s4039_s24 = scalar_lea.sflag [#allocation5], %s4038_s15 }
 0x41d   : > { %p4716_p3 = pnand %p4723_p4, %p6801_p12 }
 0x41f   : > { %5381 = dma.done.wait (!%p4716_p3), %s4039_s24, 8192  }
 0x420   : > { %5383 = vsyncadd (!%p4716_p3), %s4039_s24, 4294959104  ;;  %s25_s6 = sadd.s32 1, %s5438_s6   ;;  %s6803_s18 = sld [smem:[#allocation20_spill]] }
 0x421   : > { %p6678_p10 = scmp.ge.s32.totalorder %s25_s6, 8   ;;  %s6804_s2 = sld [smem:[#allocation28_spill]] }
 0x422   : > { %s6805_s8 = sld [smem:[#allocation25_spill]]  ;;  %s6806_s13 = sld [smem:[#allocation26_spill]] }
 0x423   : > { %s6807_s7 = sld [smem:[#allocation23_spill]]  ;;  %s6808_s17 = sld [smem:[#allocation24_spill]] }
 0x424   : > { %s6809_s19 = smov %s5394_s20  ;;  %s6811_s21 = smov %s5402_s22 }
 0x425   : > { %s6812_s22 = smov %s5406_s23  ;;  %s6814_s24 = smov %s5414_s25 }
 0x426   : > { %s6815_s25 = smov %s5418_s26  ;;  %s6817_s27 = smov %s5430_s29 }
 0x427   : > { %s6810_s20 = smov %s6804_s2  ;;  %s6818_s28 = smov %s5434_s30 }
 0x428   : > { %s6813_s23 = smov %s6805_s8  ;;  %s6816_s26 = smov %s6806_s13 }
 0x429   : > { %s6819_s29 = smov %s6807_s7  ;;  %s6820_s30 = smov %s6808_s17 }
 0x42a   :  { %24 = sbr.rel (!%p6678_p10) target bundleno = 16 (0x10), region = 127 }
 0x431   :  { %4044 = vsyncpa [#allocation4], 1 }
 0x432   :  { %4046 = vsyncpa [#allocation4 + $0x1], 1 }
 0x433   :  { %4047 = vsyncpa [#allocation7], 1 }
 0x434   :  { %4049 = vsyncpa [#allocation7 + $0x1], 1 }
 0x435   :  { %4050 = vsyncpa [#allocation10], 1 }
 0x436   :  { %4051 = vsyncpa [#allocation5], 1 }
 0x437   :  { %4053 = vsyncpa [#allocation5 + $0x1], 1 }

</bundles_post_ra>
